<compile_context>
chip_gen: v5e
topology: v5e:2x2
jax: 0.10.0
libtpu: 0.0.40
codegen_flags: <defaults>
</compile_context>

<pallas_src>
import functools

import jax
import jax.numpy as jnp
from jax.experimental import pallas as pl
from jax.experimental.pallas import tpu as pltpu

# Keep the Pallas kernel matmuls and the pure-JAX reference matmuls at the same
# (full f32) precision so the correctness comparison is meaningful.
jax.config.update("jax_default_matmul_precision", "highest")


# ----------------------------------------------------------------------------
# Shared cell math
# ----------------------------------------------------------------------------

def _cell_update(gates, c, H):
    """gates: [B, 4H] pre-activation in PyTorch order (i, f, g, o)."""
    # Two full-width transcendental passes instead of five quarter-width ones;
    # slicing afterwards is a cheap lane relayout on the otherwise idle XLU.
    sig = jax.nn.sigmoid(gates)          # [B, 4H]
    tnh = jnp.tanh(gates)                # [B, 4H]
    i_g = sig[:, 0:H]
    f_g = sig[:, H:2 * H]
    g_g = tnh[:, 2 * H:3 * H]
    o_g = sig[:, 3 * H:4 * H]
    c_new = f_g * c + i_g * g_g
    h_new = o_g * jnp.tanh(c_new)
    return h_new, c_new


# ----------------------------------------------------------------------------
# Fused encoder + autoregressive decoder kernel  (grid = time chunks)
# ----------------------------------------------------------------------------

def _forecast_kernel(x_ref, enc_wih0, enc_whh0, enc_b0, *rest,
                     num_layers, chunk, batch, hidden, out_window, out_dim):
    """Argument layout (after the 4 named ones), all via *rest:

      enc_wf[1..L-1]   (2H, 4H)   fused [W_ih; W_hh]^T per encoder layer l>0
      enc_bf[1..L-1]   (1, 4H)
      dec_win0         (out_dim, 4H)  proj folded into decoder layer-0 W_ih
      dec_whh0         (H, 4H)
      dec_b0           (1, 4H)        proj bias folded in
      dec_wf[1..L-1]   (2H, 4H)
      dec_bf[1..L-1]   (1, 4H)
      fc_w             (H, out_dim)
      fc_b             (1, out_dim)
      din0             (B, out_dim)   first decoder input (src[:, -1, [0, 2]])
      out_ref          (out_window, B, out_dim)   output block (resident)
      h_sc, c_sc       (L, B, H)      VMEM scratch carrying state across chunks
    """
    L, Tt, B, H = num_layers, chunk, batch, hidden

    i = 0
    enc_wf = rest[i:i + L - 1]; i += L - 1
    enc_bf = rest[i:i + L - 1]; i += L - 1
    dec_win0, dec_whh0, dec_b0 = rest[i], rest[i + 1], rest[i + 2]; i += 3
    dec_wf = rest[i:i + L - 1]; i += L - 1
    dec_bf = rest[i:i + L - 1]; i += L - 1
    fc_w, fc_b, din0 = rest[i], rest[i + 1], rest[i + 2]; i += 3
    out_ref = rest[i]; i += 1
    h_sc, c_sc = rest[i], rest[i + 1]

    t0 = pl.program_id(0)

    @pl.when(t0 == 0)
    def _():
        h_sc[...] = jnp.zeros_like(h_sc)
        c_sc[...] = jnp.zeros_like(c_sc)

    # Recurrent state lives in registers for the whole chunk.
    h_loc = [h_sc[l] for l in range(L)]
    c_loc = [c_sc[l] for l in range(L)]

    # ---- Encoder ------------------------------------------------------------
    # Chunk-wide layer-0 input projection: ONE matmul (M = Tt*B), hoisted off
    # the serial h-recurrence path.
    x_proj = (jnp.dot(x_ref[...], enc_wih0[...],
                      preferred_element_type=jnp.float32)
              + enc_b0[...])                                   # (Tt*B, 4H)

    for t in range(Tt):
        # Layer 0: x-part precomputed, only the h matmul is on the serial path.
        gates = (x_proj[t * B:(t + 1) * B, :]
                 + jnp.dot(h_loc[0], enc_whh0[...],
                           preferred_element_type=jnp.float32))
        h_loc[0], c_loc[0] = _cell_update(gates, c_loc[0], H)
        layer_in = h_loc[0]
        # Layers l>0: fused [x | h] @ [W_ih; W_hh].
        for l in range(1, L):
            xin = jnp.concatenate([layer_in, h_loc[l]], axis=-1)   # (B, 2H)
            gates = (jnp.dot(xin, enc_wf[l - 1][...],
                             preferred_element_type=jnp.float32)
                     + enc_bf[l - 1][...])
            h_loc[l], c_loc[l] = _cell_update(gates, c_loc[l], H)
            layer_in = h_loc[l]

    # Carry state to the next chunk.
    for l in range(L):
        h_sc[l] = h_loc[l]
        c_sc[l] = c_loc[l]

    # ---- Decoder (runs entirely inside the last grid step) ------------------
    @pl.when(t0 == pl.num_programs(0) - 1)
    def _():
        h_d = list(h_loc)
        c_d = list(c_loc)
        din = din0[...]                                        # (B, out_dim)
        for step in range(out_window):
            # Layer 0: input projection folded into dec_win0 / dec_b0.
            gates = (jnp.dot(din, dec_win0[...],
                             preferred_element_type=jnp.float32)
                     + jnp.dot(h_d[0], dec_whh0[...],
                               preferred_element_type=jnp.float32)
                     + dec_b0[...])
            h_d[0], c_d[0] = _cell_update(gates, c_d[0], H)
            layer_in = h_d[0]
            for l in range(1, L):
                xin = jnp.concatenate([layer_in, h_d[l]], axis=-1)
                gates = (jnp.dot(xin, dec_wf[l - 1][...],
                                 preferred_element_type=jnp.float32)
                         + dec_bf[l - 1][...])
                h_d[l], c_d[l] = _cell_update(gates, c_d[l], H)
                layer_in = h_d[l]
            pred = (jnp.dot(layer_in, fc_w[...],
                            preferred_element_type=jnp.float32)
                    + fc_b[...])                               # (B, out_dim)
            out_ref[step] = pred
            din = pred


# ----------------------------------------------------------------------------
# pallas_call wrapper
# ----------------------------------------------------------------------------

def _pick_time_chunk(T, B, max_chunk=64):
    """Largest chunk that keeps (Tt*B) a multiple of 8 (block constraint) or a
    single chunk covering the whole sequence."""
    if T <= max_chunk:
        return T
    for c in range(max_chunk, 0, -1):
        if T % c == 0 and (c * B) % 8 == 0:
            return c
    return T


def _prepare_fused(params):
    """Build kernel-side fused weights from the raw (PyTorch-layout) params."""
    L = params["num_layers"]
    enc, dec = params["enc"], params["dec"]
    fused = {
        "enc_wih0": enc[0][0],                       # (F, 4H)
        "enc_whh0": enc[0][1],                       # (H, 4H)
        "enc_b0": enc[0][2],                         # (1, 4H)
        "enc_wf": [jnp.concatenate([enc[l][0], enc[l][1]], axis=0)
                   for l in range(1, L)],            # (2H, 4H)
        "enc_bf": [enc[l][2] for l in range(1, L)],
        # Decoder layer 0 with the proj Linear folded in algebraically.
        "dec_win0": params["proj_wT"] @ dec[0][0],   # (out_dim, 4H)
        "dec_whh0": dec[0][1],                       # (H, 4H)
        "dec_b0": params["proj_b"] @ dec[0][0] + dec[0][2],   # (1, 4H)
        "dec_wf": [jnp.concatenate([dec[l][0], dec[l][1]], axis=0)
                   for l in range(1, L)],
        "dec_bf": [dec[l][2] for l in range(1, L)],
        "fc_wT": params["fc_wT"],                    # (H, out_dim)
        "fc_b": params["fc_b"],                      # (1, out_dim)
    }
    return fused


def forecast_net_forward(src, params, output_window):
    """src: [B, T_in, F] -> [B, output_window, output_dim]."""
    B, T, F = src.shape
    H = params["hidden_size"]
    L = params["num_layers"]
    out_dim = params["fc_b"].shape[-1]

    fused = _prepare_fused(params)

    x_tm = jnp.transpose(src, (1, 0, 2))             # time-major [T, B, F]
    x_flat = x_tm.reshape(T * B, F)                  # rows = (t, b) pairs
    din0 = src[:, -1, :][:, jnp.array([0, 2])]       # [B, out_dim]

    Tt = _pick_time_chunk(T, B)
    n_chunks = T // Tt

    cmap2 = lambda t: (0, 0)
    cmap3 = lambda t: (0, 0, 0)

    weights = [fused["enc_wih0"], fused["enc_whh0"], fused["enc_b0"],
               *fused["enc_wf"], *fused["enc_bf"],
               fused["dec_win0"], fused["dec_whh0"], fused["dec_b0"],
               *fused["dec_wf"], *fused["dec_bf"],
               fused["fc_wT"], fused["fc_b"], din0]

    in_specs = [pl.BlockSpec((Tt * B, F), lambda t: (t, 0))]
    in_specs += [pl.BlockSpec(w.shape, cmap2) for w in weights]
    out_specs = pl.BlockSpec((output_window, B, out_dim), cmap3)

    kernel = functools.partial(_forecast_kernel, num_layers=L, chunk=Tt,
                               batch=B, hidden=H, out_window=output_window,
                               out_dim=out_dim)
    preds = pl.pallas_call(
        kernel,
        out_shape=jax.ShapeDtypeStruct((output_window, B, out_dim),
                                       jnp.float32),
        grid_spec=pltpu.PrefetchScalarGridSpec(
            num_scalar_prefetch=0,
            grid=(n_chunks,),
            in_specs=in_specs,
            out_specs=out_specs,
            scratch_shapes=[pltpu.VMEM((L, B, H), jnp.float32),
                            pltpu.VMEM((L, B, H), jnp.float32)]),
        compiler_params=pltpu.CompilerParams(
            dimension_semantics=("arbitrary",)),
    )(x_flat, *weights)
    return jnp.transpose(preds, (1, 0, 2))           # [B, out_window, out_dim]


# ----------------------------------------------------------------------------
# Parameter init (deterministic, PyTorch-style uniform(-1/sqrt(fan), 1/sqrt(fan)))
# ----------------------------------------------------------------------------

def _uniform(key, shape, bound):
    return jax.random.uniform(key, shape, jnp.float32, -bound, bound)


def init_params(key, num_features, hidden_size, num_layers, output_dim):
    H = hidden_size
    k_lstm = 1.0 / jnp.sqrt(H)
    params = {"hidden_size": H, "num_layers": num_layers,
              "enc": [], "dec": []}

    def make_lstm_stack(key, in0):
        layers = []
        for l in range(num_layers):
            in_dim = in0 if l == 0 else H
            key, k1, k2, k3, k4 = jax.random.split(key, 5)
            w_ih = _uniform(k1, (4 * H, in_dim), k_lstm)
            w_hh = _uniform(k2, (4 * H, H), k_lstm)
            b_ih = _uniform(k3, (4 * H,), k_lstm)
            b_hh = _uniform(k4, (4 * H,), k_lstm)
            layers.append((w_ih.T, w_hh.T, (b_ih + b_hh).reshape(1, 4 * H)))
        return key, layers

    key, params["enc"] = make_lstm_stack(key, num_features)
    key, params["dec"] = make_lstm_stack(key, num_features)

    key, k1, k2, k3, k4 = jax.random.split(key, 5)
    k_fc = 1.0 / jnp.sqrt(H)
    fc_w = _uniform(k1, (output_dim, H), k_fc)
    fc_b = _uniform(k2, (output_dim,), k_fc)
    k_proj = 1.0 / jnp.sqrt(output_dim)
    proj_w = _uniform(k3, (num_features, output_dim), k_proj)
    proj_b = _uniform(k4, (num_features,), k_proj)
    params["fc_wT"] = fc_w.T
    params["fc_b"] = fc_b.reshape(1, output_dim)
    params["proj_wT"] = proj_w.T
    params["proj_b"] = proj_b.reshape(1, num_features)
    return params


# ----------------------------------------------------------------------------
# Pure-JAX reference (mirrors the PyTorch module exactly) for correctness check
# ----------------------------------------------------------------------------

def _ref_lstm_layer(x_tm, w_ih_T, w_hh_T, b, h0, c0):
    def step(carry, x_t):
        h, c = carry
        gates = x_t @ w_ih_T + h @ w_hh_T + b
        H = h.shape[-1]
        i = jax.nn.sigmoid(gates[:, 0:H])
        f = jax.nn.sigmoid(gates[:, H:2 * H])
        g = jnp.tanh(gates[:, 2 * H:3 * H])
        o = jax.nn.sigmoid(gates[:, 3 * H:4 * H])
        c = f * c + i * g
        h = o * jnp.tanh(c)
        return (h, c), h
    (hN, cN), out = jax.lax.scan(step, (h0, c0), x_tm)
    return out, hN, cN


def _ref_forward(src, params, output_window):
    B, T, F = src.shape
    H = params["hidden_size"]
    L = params["num_layers"]
    x = jnp.transpose(src, (1, 0, 2))
    hs, cs = [], []
    layer_in = x
    for l in range(L):
        w_ih_T, w_hh_T, b = params["enc"][l]
        out, hN, cN = _ref_lstm_layer(layer_in, w_ih_T, w_hh_T, b,
                                      jnp.zeros((B, H)), jnp.zeros((B, H)))
        hs.append(hN); cs.append(cN); layer_in = out
    dec_in = src[:, -1, :][:, jnp.array([0, 2])]
    outs = []
    for _ in range(output_window):
        proj_in = dec_in @ params["proj_wT"] + params["proj_b"]
        layer_in = proj_in[None]
        for l in range(L):
            w_ih_T, w_hh_T, b = params["dec"][l]
            out, hN, cN = _ref_lstm_layer(layer_in, w_ih_T, w_hh_T, b,
                                          hs[l], cs[l])
            hs[l] = hN; cs[l] = cN; layer_in = out
        pred = layer_in[0] @ params["fc_wT"] + params["fc_b"]
        outs.append(pred)
        dec_in = pred
    return jnp.stack(outs, axis=1)


# ----------------------------------------------------------------------------

if __name__ == "__main__":
    # Small, forward-consistent config: src [batch, INPUT_WINDOW, num_features]
    batch = 2
    input_window = 8
    num_features = 4       # must be >= 3 (decoder seeds from feature idx [0, 2])
    hidden_size = 32
    num_layers = 2
    output_window = 4
    output_dim = 2

    key = jax.random.PRNGKey(0)
    k_param, k_data = jax.random.split(key)
    params = init_params(k_param, num_features, hidden_size, num_layers,
                         output_dim)
    src = jax.random.normal(k_data, (batch, input_window, num_features),
                            jnp.float32)

    fwd = jax.jit(functools.partial(forecast_net_forward, params=params,
                                    output_window=output_window))
    out = jax.block_until_ready(fwd(src))
    assert out.shape == (batch, output_window, output_dim), out.shape

    ref = jax.block_until_ready(_ref_forward(src, params, output_window))
    # Slightly relaxed tolerance: proj-folding / [x|h]-fusion reassociate the
    # f32 matmul sums relative to the un-fused reference.
    assert jnp.allclose(out, ref, atol=2e-3, rtol=2e-3), \
        f"max abs err {jnp.max(jnp.abs(out - ref))}"

    print("KERNEL_OK")
</pallas_src>

<mosaic_0001>
module attributes {stable_mosaic.version = 11 : i64} {
  func.func @_forecast_kernel(%arg0: i32, %arg1: memref<16x4xf32, #tpu.memory_space<vmem>>, %arg2: memref<4x128xf32, #tpu.memory_space<vmem>>, %arg3: memref<32x128xf32, #tpu.memory_space<vmem>>, %arg4: memref<1x128xf32, #tpu.memory_space<vmem>>, %arg5: memref<64x128xf32, #tpu.memory_space<vmem>>, %arg6: memref<1x128xf32, #tpu.memory_space<vmem>>, %arg7: memref<2x128xf32, #tpu.memory_space<vmem>>, %arg8: memref<32x128xf32, #tpu.memory_space<vmem>>, %arg9: memref<1x128xf32, #tpu.memory_space<vmem>>, %arg10: memref<64x128xf32, #tpu.memory_space<vmem>>, %arg11: memref<1x128xf32, #tpu.memory_space<vmem>>, %arg12: memref<32x2xf32, #tpu.memory_space<vmem>>, %arg13: memref<1x2xf32, #tpu.memory_space<vmem>>, %arg14: memref<2x2xf32, #tpu.memory_space<vmem>>, %arg15: memref<4x2x2xf32, #tpu.memory_space<vmem>>, %arg16: memref<2x2x32xf32, #tpu.memory_space<vmem>>, %arg17: memref<2x2x32xf32, #tpu.memory_space<vmem>>) attributes {dimension_semantics = [#tpu.dimension_semantics<arbitrary>], iteration_bounds = array<i64: 1>, scalar_prefetch = 0 : i64, scratch_operands = 2 : i64, tpu.core_type = #tpu.core_type<tc>, window_params = [{transform_indices = @transform_0, window_bounds = array<i64: 16, 4>}, {pipeline_mode = #tpu.pipeline_mode<synchronous>, transform_indices = @transform_1, window_bounds = array<i64: 4, 128>}, {pipeline_mode = #tpu.pipeline_mode<synchronous>, transform_indices = @transform_2, window_bounds = array<i64: 32, 128>}, {pipeline_mode = #tpu.pipeline_mode<synchronous>, transform_indices = @transform_3, window_bounds = array<i64: 1, 128>}, {pipeline_mode = #tpu.pipeline_mode<synchronous>, transform_indices = @transform_4, window_bounds = array<i64: 64, 128>}, {pipeline_mode = #tpu.pipeline_mode<synchronous>, transform_indices = @transform_5, window_bounds = array<i64: 1, 128>}, {pipeline_mode = #tpu.pipeline_mode<synchronous>, transform_indices = @transform_6, window_bounds = array<i64: 2, 128>}, {pipeline_mode = #tpu.pipeline_mode<synchronous>, transform_indices = @transform_7, window_bounds = array<i64: 32, 128>}, {pipeline_mode = #tpu.pipeline_mode<synchronous>, transform_indices = @transform_8, window_bounds = array<i64: 1, 128>}, {pipeline_mode = #tpu.pipeline_mode<synchronous>, transform_indices = @transform_9, window_bounds = array<i64: 64, 128>}, {pipeline_mode = #tpu.pipeline_mode<synchronous>, transform_indices = @transform_10, window_bounds = array<i64: 1, 128>}, {pipeline_mode = #tpu.pipeline_mode<synchronous>, transform_indices = @transform_11, window_bounds = array<i64: 32, 2>}, {pipeline_mode = #tpu.pipeline_mode<synchronous>, transform_indices = @transform_12, window_bounds = array<i64: 1, 2>}, {pipeline_mode = #tpu.pipeline_mode<synchronous>, transform_indices = @transform_13, window_bounds = array<i64: 2, 2>}, {pipeline_mode = #tpu.pipeline_mode<synchronous>, transform_indices = @transform_14, window_bounds = array<i64: 4, 2, 2>}]} {
    %c0_i32 = arith.constant 0 : i32
    %0 = arith.cmpi eq, %arg0, %c0_i32 : i32
    %1 = arith.extui %0 : i1 to i32
    %c0_i32_0 = arith.constant 0 : i32
    %2 = arith.cmpi ne, %1, %c0_i32_0 : i32
    scf.if %2 {
      %cst_111 = arith.constant 0.000000e+00 : f32
      %352 = vector.broadcast %cst_111 : f32 to vector<2x2x32xf32>
      %c0_112 = arith.constant 0 : index
      %c0_113 = arith.constant 0 : index
      %c0_114 = arith.constant 0 : index
      %353 = vector.load %arg16[%c0_112, %c0_113, %c0_114] : memref<2x2x32xf32, #tpu.memory_space<vmem>>, vector<2x2x32xf32>
      tpu.vector_store %arg16[%c0_112, %c0_113, %c0_114], %352 {strides = array<i32>} : memref<2x2x32xf32, #tpu.memory_space<vmem>>, vector<2x2x32xf32>,
      %cst_115 = arith.constant 0.000000e+00 : f32
      %354 = vector.broadcast %cst_115 : f32 to vector<2x2x32xf32>
      %c0_116 = arith.constant 0 : index
      %c0_117 = arith.constant 0 : index
      %c0_118 = arith.constant 0 : index
      %355 = vector.load %arg17[%c0_116, %c0_117, %c0_118] : memref<2x2x32xf32, #tpu.memory_space<vmem>>, vector<2x2x32xf32>
      tpu.vector_store %arg17[%c0_116, %c0_117, %c0_118], %354 {strides = array<i32>} : memref<2x2x32xf32, #tpu.memory_space<vmem>>, vector<2x2x32xf32>,
    } else {
    }
    %c0 = arith.constant 0 : index
    %c0_1 = arith.constant 0 : index
    %c0_2 = arith.constant 0 : index
    %3 = vector.load %arg16[%c0, %c0_1, %c0_2] : memref<2x2x32xf32, #tpu.memory_space<vmem>>, vector<1x2x32xf32>
    %4 = vector.shape_cast %3 : vector<1x2x32xf32> to vector<2x32xf32>
    %c1 = arith.constant 1 : index
    %c0_3 = arith.constant 0 : index
    %c0_4 = arith.constant 0 : index
    %5 = vector.load %arg16[%c1, %c0_3, %c0_4] : memref<2x2x32xf32, #tpu.memory_space<vmem>>, vector<1x2x32xf32>
    %6 = vector.shape_cast %5 : vector<1x2x32xf32> to vector<2x32xf32>
    %c0_5 = arith.constant 0 : index
    %c0_6 = arith.constant 0 : index
    %c0_7 = arith.constant 0 : index
    %7 = vector.load %arg17[%c0_5, %c0_6, %c0_7] : memref<2x2x32xf32, #tpu.memory_space<vmem>>, vector<1x2x32xf32>
    %8 = vector.shape_cast %7 : vector<1x2x32xf32> to vector<2x32xf32>
    %c1_8 = arith.constant 1 : index
    %c0_9 = arith.constant 0 : index
    %c0_10 = arith.constant 0 : index
    %9 = vector.load %arg17[%c1_8, %c0_9, %c0_10] : memref<2x2x32xf32, #tpu.memory_space<vmem>>, vector<1x2x32xf32>
    %10 = vector.shape_cast %9 : vector<1x2x32xf32> to vector<2x32xf32>
    %c0_11 = arith.constant 0 : index
    %c0_12 = arith.constant 0 : index
    %11 = vector.load %arg1[%c0_11, %c0_12] : memref<16x4xf32, #tpu.memory_space<vmem>>, vector<16x4xf32>
    %c0_13 = arith.constant 0 : index
    %c0_14 = arith.constant 0 : index
    %12 = vector.load %arg2[%c0_13, %c0_14] : memref<4x128xf32, #tpu.memory_space<vmem>>, vector<4x128xf32>
    %cst = arith.constant dense<0.000000e+00> : vector<16x128xf32>
    %13 = tpu.matmul %11, %12, %cst {dimension_numbers = #tpu.dot_dimension_numbers<[1], [0], [0], [1], [0, 0, 1, 1], [], []>, precision = #tpu.contract_precision<fp32>} : vector<16x4xf32>, vector<4x128xf32>, vector<16x128xf32> -> vector<16x128xf32>
    %c0_15 = arith.constant 0 : index
    %c0_16 = arith.constant 0 : index
    %14 = vector.load %arg4[%c0_15, %c0_16] : memref<1x128xf32, #tpu.memory_space<vmem>>, vector<1x128xf32>
    %15 = vector.broadcast %14 : vector<1x128xf32> to vector<16x128xf32>
    %16 = arith.addf %13, %15 : vector<16x128xf32>
    %17 = vector.extract_strided_slice %16 {offsets = [0, 0], sizes = [2, 128], strides = [1, 1]} : vector<16x128xf32> to vector<2x128xf32>
    %c0_17 = arith.constant 0 : index
    %c0_18 = arith.constant 0 : index
    %18 = vector.load %arg3[%c0_17, %c0_18] : memref<32x128xf32, #tpu.memory_space<vmem>>, vector<32x128xf32>
    %cst_19 = arith.constant dense<0.000000e+00> : vector<2x128xf32>
    %19 = tpu.matmul %4, %18, %cst_19 {dimension_numbers = #tpu.dot_dimension_numbers<[1], [0], [0], [1], [0, 0, 1, 1], [], []>, precision = #tpu.contract_precision<fp32>} : vector<2x32xf32>, vector<32x128xf32>, vector<2x128xf32> -> vector<2x128xf32>
    %20 = arith.addf %17, %19 : vector<2x128xf32>
    %21 = arith.negf %20 : vector<2x128xf32>
    %22 = math.exp %21 : vector<2x128xf32>
    %cst_20 = arith.constant 1.000000e+00 : f32
    %23 = vector.broadcast %cst_20 : f32 to vector<2x128xf32>
    %24 = arith.addf %23, %22 : vector<2x128xf32>
    %25 = arith.divf %23, %24 : vector<2x128xf32>
    %26 = math.tanh %20 : vector<2x128xf32>
    %27 = vector.extract_strided_slice %25 {offsets = [0, 0], sizes = [2, 32], strides = [1, 1]} : vector<2x128xf32> to vector<2x32xf32>
    %28 = vector.extract_strided_slice %25 {offsets = [0, 32], sizes = [2, 32], strides = [1, 1]} : vector<2x128xf32> to vector<2x32xf32>
    %29 = vector.extract_strided_slice %26 {offsets = [0, 64], sizes = [2, 32], strides = [1, 1]} : vector<2x128xf32> to vector<2x32xf32>
    %30 = vector.extract_strided_slice %25 {offsets = [0, 96], sizes = [2, 32], strides = [1, 1]} : vector<2x128xf32> to vector<2x32xf32>
    %31 = arith.mulf %28, %8 : vector<2x32xf32>
    %32 = arith.mulf %27, %29 : vector<2x32xf32>
    %33 = arith.addf %31, %32 : vector<2x32xf32>
    %34 = math.tanh %33 : vector<2x32xf32>
    %35 = arith.mulf %30, %34 : vector<2x32xf32>
    %36 = tpu.concatenate %35, %6 in 1 : vector<2x32xf32>, vector<2x32xf32> -> vector<2x64xf32>
    %c0_21 = arith.constant 0 : index
    %c0_22 = arith.constant 0 : index
    %37 = vector.load %arg5[%c0_21, %c0_22] : memref<64x128xf32, #tpu.memory_space<vmem>>, vector<64x128xf32>
    %cst_23 = arith.constant dense<0.000000e+00> : vector<2x128xf32>
    %38 = tpu.matmul %36, %37, %cst_23 {dimension_numbers = #tpu.dot_dimension_numbers<[1], [0], [0], [1], [0, 0, 1, 1], [], []>, precision = #tpu.contract_precision<fp32>} : vector<2x64xf32>, vector<64x128xf32>, vector<2x128xf32> -> vector<2x128xf32>
    %c0_24 = arith.constant 0 : index
    %c0_25 = arith.constant 0 : index
    %39 = vector.load %arg6[%c0_24, %c0_25] : memref<1x128xf32, #tpu.memory_space<vmem>>, vector<1x128xf32>
    %40 = vector.broadcast %39 : vector<1x128xf32> to vector<2x128xf32>
    %41 = arith.addf %38, %40 : vector<2x128xf32>
    %42 = arith.negf %41 : vector<2x128xf32>
    %43 = math.exp %42 : vector<2x128xf32>
    %cst_26 = arith.constant 1.000000e+00 : f32
    %44 = vector.broadcast %cst_26 : f32 to vector<2x128xf32>
    %45 = arith.addf %44, %43 : vector<2x128xf32>
    %46 = arith.divf %44, %45 : vector<2x128xf32>
    %47 = math.tanh %41 : vector<2x128xf32>
    %48 = vector.extract_strided_slice %46 {offsets = [0, 0], sizes = [2, 32], strides = [1, 1]} : vector<2x128xf32> to vector<2x32xf32>
    %49 = vector.extract_strided_slice %46 {offsets = [0, 32], sizes = [2, 32], strides = [1, 1]} : vector<2x128xf32> to vector<2x32xf32>
    %50 = vector.extract_strided_slice %47 {offsets = [0, 64], sizes = [2, 32], strides = [1, 1]} : vector<2x128xf32> to vector<2x32xf32>
    %51 = vector.extract_strided_slice %46 {offsets = [0, 96], sizes = [2, 32], strides = [1, 1]} : vector<2x128xf32> to vector<2x32xf32>
    %52 = arith.mulf %49, %10 : vector<2x32xf32>
    %53 = arith.mulf %48, %50 : vector<2x32xf32>
    %54 = arith.addf %52, %53 : vector<2x32xf32>
    %55 = math.tanh %54 : vector<2x32xf32>
    %56 = arith.mulf %51, %55 : vector<2x32xf32>
    %57 = vector.extract_strided_slice %16 {offsets = [2, 0], sizes = [2, 128], strides = [1, 1]} : vector<16x128xf32> to vector<2x128xf32>
    %c0_27 = arith.constant 0 : index
    %c0_28 = arith.constant 0 : index
    %58 = vector.load %arg3[%c0_27, %c0_28] : memref<32x128xf32, #tpu.memory_space<vmem>>, vector<32x128xf32>
    %cst_29 = arith.constant dense<0.000000e+00> : vector<2x128xf32>
    %59 = tpu.matmul %35, %58, %cst_29 {dimension_numbers = #tpu.dot_dimension_numbers<[1], [0], [0], [1], [0, 0, 1, 1], [], []>, precision = #tpu.contract_precision<fp32>} : vector<2x32xf32>, vector<32x128xf32>, vector<2x128xf32> -> vector<2x128xf32>
    %60 = arith.addf %57, %59 : vector<2x128xf32>
    %61 = arith.negf %60 : vector<2x128xf32>
    %62 = math.exp %61 : vector<2x128xf32>
    %cst_30 = arith.constant 1.000000e+00 : f32
    %63 = vector.broadcast %cst_30 : f32 to vector<2x128xf32>
    %64 = arith.addf %63, %62 : vector<2x128xf32>
    %65 = arith.divf %63, %64 : vector<2x128xf32>
    %66 = math.tanh %60 : vector<2x128xf32>
    %67 = vector.extract_strided_slice %65 {offsets = [0, 0], sizes = [2, 32], strides = [1, 1]} : vector<2x128xf32> to vector<2x32xf32>
    %68 = vector.extract_strided_slice %65 {offsets = [0, 32], sizes = [2, 32], strides = [1, 1]} : vector<2x128xf32> to vector<2x32xf32>
    %69 = vector.extract_strided_slice %66 {offsets = [0, 64], sizes = [2, 32], strides = [1, 1]} : vector<2x128xf32> to vector<2x32xf32>
    %70 = vector.extract_strided_slice %65 {offsets = [0, 96], sizes = [2, 32], strides = [1, 1]} : vector<2x128xf32> to vector<2x32xf32>
    %71 = arith.mulf %68, %33 : vector<2x32xf32>
    %72 = arith.mulf %67, %69 : vector<2x32xf32>
    %73 = arith.addf %71, %72 : vector<2x32xf32>
    %74 = math.tanh %73 : vector<2x32xf32>
    %75 = arith.mulf %70, %74 : vector<2x32xf32>
    %76 = tpu.concatenate %75, %56 in 1 : vector<2x32xf32>, vector<2x32xf32> -> vector<2x64xf32>
    %c0_31 = arith.constant 0 : index
    %c0_32 = arith.constant 0 : index
    %77 = vector.load %arg5[%c0_31, %c0_32] : memref<64x128xf32, #tpu.memory_space<vmem>>, vector<64x128xf32>
    %cst_33 = arith.constant dense<0.000000e+00> : vector<2x128xf32>
    %78 = tpu.matmul %76, %77, %cst_33 {dimension_numbers = #tpu.dot_dimension_numbers<[1], [0], [0], [1], [0, 0, 1, 1], [], []>, precision = #tpu.contract_precision<fp32>} : vector<2x64xf32>, vector<64x128xf32>, vector<2x128xf32> -> vector<2x128xf32>
    %c0_34 = arith.constant 0 : index
    %c0_35 = arith.constant 0 : index
    %79 = vector.load %arg6[%c0_34, %c0_35] : memref<1x128xf32, #tpu.memory_space<vmem>>, vector<1x128xf32>
    %80 = vector.broadcast %79 : vector<1x128xf32> to vector<2x128xf32>
    %81 = arith.addf %78, %80 : vector<2x128xf32>
    %82 = arith.negf %81 : vector<2x128xf32>
    %83 = math.exp %82 : vector<2x128xf32>
    %cst_36 = arith.constant 1.000000e+00 : f32
    %84 = vector.broadcast %cst_36 : f32 to vector<2x128xf32>
    %85 = arith.addf %84, %83 : vector<2x128xf32>
    %86 = arith.divf %84, %85 : vector<2x128xf32>
    %87 = math.tanh %81 : vector<2x128xf32>
    %88 = vector.extract_strided_slice %86 {offsets = [0, 0], sizes = [2, 32], strides = [1, 1]} : vector<2x128xf32> to vector<2x32xf32>
    %89 = vector.extract_strided_slice %86 {offsets = [0, 32], sizes = [2, 32], strides = [1, 1]} : vector<2x128xf32> to vector<2x32xf32>
    %90 = vector.extract_strided_slice %87 {offsets = [0, 64], sizes = [2, 32], strides = [1, 1]} : vector<2x128xf32> to vector<2x32xf32>
    %91 = vector.extract_strided_slice %86 {offsets = [0, 96], sizes = [2, 32], strides = [1, 1]} : vector<2x128xf32> to vector<2x32xf32>
    %92 = arith.mulf %89, %54 : vector<2x32xf32>
    %93 = arith.mulf %88, %90 : vector<2x32xf32>
    %94 = arith.addf %92, %93 : vector<2x32xf32>
    %95 = math.tanh %94 : vector<2x32xf32>
    %96 = arith.mulf %91, %95 : vector<2x32xf32>
    %97 = vector.extract_strided_slice %16 {offsets = [4, 0], sizes = [2, 128], strides = [1, 1]} : vector<16x128xf32> to vector<2x128xf32>
    %c0_37 = arith.constant 0 : index
    %c0_38 = arith.constant 0 : index
    %98 = vector.load %arg3[%c0_37, %c0_38] : memref<32x128xf32, #tpu.memory_space<vmem>>, vector<32x128xf32>
    %cst_39 = arith.constant dense<0.000000e+00> : vector<2x128xf32>
    %99 = tpu.matmul %75, %98, %cst_39 {dimension_numbers = #tpu.dot_dimension_numbers<[1], [0], [0], [1], [0, 0, 1, 1], [], []>, precision = #tpu.contract_precision<fp32>} : vector<2x32xf32>, vector<32x128xf32>, vector<2x128xf32> -> vector<2x128xf32>
    %100 = arith.addf %97, %99 : vector<2x128xf32>
    %101 = arith.negf %100 : vector<2x128xf32>
    %102 = math.exp %101 : vector<2x128xf32>
    %cst_40 = arith.constant 1.000000e+00 : f32
    %103 = vector.broadcast %cst_40 : f32 to vector<2x128xf32>
    %104 = arith.addf %103, %102 : vector<2x128xf32>
    %105 = arith.divf %103, %104 : vector<2x128xf32>
    %106 = math.tanh %100 : vector<2x128xf32>
    %107 = vector.extract_strided_slice %105 {offsets = [0, 0], sizes = [2, 32], strides = [1, 1]} : vector<2x128xf32> to vector<2x32xf32>
    %108 = vector.extract_strided_slice %105 {offsets = [0, 32], sizes = [2, 32], strides = [1, 1]} : vector<2x128xf32> to vector<2x32xf32>
    %109 = vector.extract_strided_slice %106 {offsets = [0, 64], sizes = [2, 32], strides = [1, 1]} : vector<2x128xf32> to vector<2x32xf32>
    %110 = vector.extract_strided_slice %105 {offsets = [0, 96], sizes = [2, 32], strides = [1, 1]} : vector<2x128xf32> to vector<2x32xf32>
    %111 = arith.mulf %108, %73 : vector<2x32xf32>
    %112 = arith.mulf %107, %109 : vector<2x32xf32>
    %113 = arith.addf %111, %112 : vector<2x32xf32>
    %114 = math.tanh %113 : vector<2x32xf32>
    %115 = arith.mulf %110, %114 : vector<2x32xf32>
    %116 = tpu.concatenate %115, %96 in 1 : vector<2x32xf32>, vector<2x32xf32> -> vector<2x64xf32>
    %c0_41 = arith.constant 0 : index
    %c0_42 = arith.constant 0 : index
    %117 = vector.load %arg5[%c0_41, %c0_42] : memref<64x128xf32, #tpu.memory_space<vmem>>, vector<64x128xf32>
    %cst_43 = arith.constant dense<0.000000e+00> : vector<2x128xf32>
    %118 = tpu.matmul %116, %117, %cst_43 {dimension_numbers = #tpu.dot_dimension_numbers<[1], [0], [0], [1], [0, 0, 1, 1], [], []>, precision = #tpu.contract_precision<fp32>} : vector<2x64xf32>, vector<64x128xf32>, vector<2x128xf32> -> vector<2x128xf32>
    %c0_44 = arith.constant 0 : index
    %c0_45 = arith.constant 0 : index
    %119 = vector.load %arg6[%c0_44, %c0_45] : memref<1x128xf32, #tpu.memory_space<vmem>>, vector<1x128xf32>
    %120 = vector.broadcast %119 : vector<1x128xf32> to vector<2x128xf32>
    %121 = arith.addf %118, %120 : vector<2x128xf32>
    %122 = arith.negf %121 : vector<2x128xf32>
    %123 = math.exp %122 : vector<2x128xf32>
    %cst_46 = arith.constant 1.000000e+00 : f32
    %124 = vector.broadcast %cst_46 : f32 to vector<2x128xf32>
    %125 = arith.addf %124, %123 : vector<2x128xf32>
    %126 = arith.divf %124, %125 : vector<2x128xf32>
    %127 = math.tanh %121 : vector<2x128xf32>
    %128 = vector.extract_strided_slice %126 {offsets = [0, 0], sizes = [2, 32], strides = [1, 1]} : vector<2x128xf32> to vector<2x32xf32>
    %129 = vector.extract_strided_slice %126 {offsets = [0, 32], sizes = [2, 32], strides = [1, 1]} : vector<2x128xf32> to vector<2x32xf32>
    %130 = vector.extract_strided_slice %127 {offsets = [0, 64], sizes = [2, 32], strides = [1, 1]} : vector<2x128xf32> to vector<2x32xf32>
    %131 = vector.extract_strided_slice %126 {offsets = [0, 96], sizes = [2, 32], strides = [1, 1]} : vector<2x128xf32> to vector<2x32xf32>
    %132 = arith.mulf %129, %94 : vector<2x32xf32>
    %133 = arith.mulf %128, %130 : vector<2x32xf32>
    %134 = arith.addf %132, %133 : vector<2x32xf32>
    %135 = math.tanh %134 : vector<2x32xf32>
    %136 = arith.mulf %131, %135 : vector<2x32xf32>
    %137 = vector.extract_strided_slice %16 {offsets = [6, 0], sizes = [2, 128], strides = [1, 1]} : vector<16x128xf32> to vector<2x128xf32>
    %c0_47 = arith.constant 0 : index
    %c0_48 = arith.constant 0 : index
    %138 = vector.load %arg3[%c0_47, %c0_48] : memref<32x128xf32, #tpu.memory_space<vmem>>, vector<32x128xf32>
    %cst_49 = arith.constant dense<0.000000e+00> : vector<2x128xf32>
    %139 = tpu.matmul %115, %138, %cst_49 {dimension_numbers = #tpu.dot_dimension_numbers<[1], [0], [0], [1], [0, 0, 1, 1], [], []>, precision = #tpu.contract_precision<fp32>} : vector<2x32xf32>, vector<32x128xf32>, vector<2x128xf32> -> vector<2x128xf32>
    %140 = arith.addf %137, %139 : vector<2x128xf32>
    %141 = arith.negf %140 : vector<2x128xf32>
    %142 = math.exp %141 : vector<2x128xf32>
    %cst_50 = arith.constant 1.000000e+00 : f32
    %143 = vector.broadcast %cst_50 : f32 to vector<2x128xf32>
    %144 = arith.addf %143, %142 : vector<2x128xf32>
    %145 = arith.divf %143, %144 : vector<2x128xf32>
    %146 = math.tanh %140 : vector<2x128xf32>
    %147 = vector.extract_strided_slice %145 {offsets = [0, 0], sizes = [2, 32], strides = [1, 1]} : vector<2x128xf32> to vector<2x32xf32>
    %148 = vector.extract_strided_slice %145 {offsets = [0, 32], sizes = [2, 32], strides = [1, 1]} : vector<2x128xf32> to vector<2x32xf32>
    %149 = vector.extract_strided_slice %146 {offsets = [0, 64], sizes = [2, 32], strides = [1, 1]} : vector<2x128xf32> to vector<2x32xf32>
    %150 = vector.extract_strided_slice %145 {offsets = [0, 96], sizes = [2, 32], strides = [1, 1]} : vector<2x128xf32> to vector<2x32xf32>
    %151 = arith.mulf %148, %113 : vector<2x32xf32>
    %152 = arith.mulf %147, %149 : vector<2x32xf32>
    %153 = arith.addf %151, %152 : vector<2x32xf32>
    %154 = math.tanh %153 : vector<2x32xf32>
    %155 = arith.mulf %150, %154 : vector<2x32xf32>
    %156 = tpu.concatenate %155, %136 in 1 : vector<2x32xf32>, vector<2x32xf32> -> vector<2x64xf32>
    %c0_51 = arith.constant 0 : index
    %c0_52 = arith.constant 0 : index
    %157 = vector.load %arg5[%c0_51, %c0_52] : memref<64x128xf32, #tpu.memory_space<vmem>>, vector<64x128xf32>
    %cst_53 = arith.constant dense<0.000000e+00> : vector<2x128xf32>
    %158 = tpu.matmul %156, %157, %cst_53 {dimension_numbers = #tpu.dot_dimension_numbers<[1], [0], [0], [1], [0, 0, 1, 1], [], []>, precision = #tpu.contract_precision<fp32>} : vector<2x64xf32>, vector<64x128xf32>, vector<2x128xf32> -> vector<2x128xf32>
    %c0_54 = arith.constant 0 : index
    %c0_55 = arith.constant 0 : index
    %159 = vector.load %arg6[%c0_54, %c0_55] : memref<1x128xf32, #tpu.memory_space<vmem>>, vector<1x128xf32>
    %160 = vector.broadcast %159 : vector<1x128xf32> to vector<2x128xf32>
    %161 = arith.addf %158, %160 : vector<2x128xf32>
    %162 = arith.negf %161 : vector<2x128xf32>
    %163 = math.exp %162 : vector<2x128xf32>
    %cst_56 = arith.constant 1.000000e+00 : f32
    %164 = vector.broadcast %cst_56 : f32 to vector<2x128xf32>
    %165 = arith.addf %164, %163 : vector<2x128xf32>
    %166 = arith.divf %164, %165 : vector<2x128xf32>
    %167 = math.tanh %161 : vector<2x128xf32>
    %168 = vector.extract_strided_slice %166 {offsets = [0, 0], sizes = [2, 32], strides = [1, 1]} : vector<2x128xf32> to vector<2x32xf32>
    %169 = vector.extract_strided_slice %166 {offsets = [0, 32], sizes = [2, 32], strides = [1, 1]} : vector<2x128xf32> to vector<2x32xf32>
    %170 = vector.extract_strided_slice %167 {offsets = [0, 64], sizes = [2, 32], strides = [1, 1]} : vector<2x128xf32> to vector<2x32xf32>
    %171 = vector.extract_strided_slice %166 {offsets = [0, 96], sizes = [2, 32], strides = [1, 1]} : vector<2x128xf32> to vector<2x32xf32>
    %172 = arith.mulf %169, %134 : vector<2x32xf32>
    %173 = arith.mulf %168, %170 : vector<2x32xf32>
    %174 = arith.addf %172, %173 : vector<2x32xf32>
    %175 = math.tanh %174 : vector<2x32xf32>
    %176 = arith.mulf %171, %175 : vector<2x32xf32>
    %177 = vector.extract_strided_slice %16 {offsets = [8, 0], sizes = [2, 128], strides = [1, 1]} : vector<16x128xf32> to vector<2x128xf32>
    %c0_57 = arith.constant 0 : index
    %c0_58 = arith.constant 0 : index
    %178 = vector.load %arg3[%c0_57, %c0_58] : memref<32x128xf32, #tpu.memory_space<vmem>>, vector<32x128xf32>
    %cst_59 = arith.constant dense<0.000000e+00> : vector<2x128xf32>
    %179 = tpu.matmul %155, %178, %cst_59 {dimension_numbers = #tpu.dot_dimension_numbers<[1], [0], [0], [1], [0, 0, 1, 1], [], []>, precision = #tpu.contract_precision<fp32>} : vector<2x32xf32>, vector<32x128xf32>, vector<2x128xf32> -> vector<2x128xf32>
    %180 = arith.addf %177, %179 : vector<2x128xf32>
    %181 = arith.negf %180 : vector<2x128xf32>
    %182 = math.exp %181 : vector<2x128xf32>
    %cst_60 = arith.constant 1.000000e+00 : f32
    %183 = vector.broadcast %cst_60 : f32 to vector<2x128xf32>
    %184 = arith.addf %183, %182 : vector<2x128xf32>
    %185 = arith.divf %183, %184 : vector<2x128xf32>
    %186 = math.tanh %180 : vector<2x128xf32>
    %187 = vector.extract_strided_slice %185 {offsets = [0, 0], sizes = [2, 32], strides = [1, 1]} : vector<2x128xf32> to vector<2x32xf32>
    %188 = vector.extract_strided_slice %185 {offsets = [0, 32], sizes = [2, 32], strides = [1, 1]} : vector<2x128xf32> to vector<2x32xf32>
    %189 = vector.extract_strided_slice %186 {offsets = [0, 64], sizes = [2, 32], strides = [1, 1]} : vector<2x128xf32> to vector<2x32xf32>
    %190 = vector.extract_strided_slice %185 {offsets = [0, 96], sizes = [2, 32], strides = [1, 1]} : vector<2x128xf32> to vector<2x32xf32>
    %191 = arith.mulf %188, %153 : vector<2x32xf32>
    %192 = arith.mulf %187, %189 : vector<2x32xf32>
    %193 = arith.addf %191, %192 : vector<2x32xf32>
    %194 = math.tanh %193 : vector<2x32xf32>
    %195 = arith.mulf %190, %194 : vector<2x32xf32>
    %196 = tpu.concatenate %195, %176 in 1 : vector<2x32xf32>, vector<2x32xf32> -> vector<2x64xf32>
    %c0_61 = arith.constant 0 : index
    %c0_62 = arith.constant 0 : index
    %197 = vector.load %arg5[%c0_61, %c0_62] : memref<64x128xf32, #tpu.memory_space<vmem>>, vector<64x128xf32>
    %cst_63 = arith.constant dense<0.000000e+00> : vector<2x128xf32>
    %198 = tpu.matmul %196, %197, %cst_63 {dimension_numbers = #tpu.dot_dimension_numbers<[1], [0], [0], [1], [0, 0, 1, 1], [], []>, precision = #tpu.contract_precision<fp32>} : vector<2x64xf32>, vector<64x128xf32>, vector<2x128xf32> -> vector<2x128xf32>
    %c0_64 = arith.constant 0 : index
    %c0_65 = arith.constant 0 : index
    %199 = vector.load %arg6[%c0_64, %c0_65] : memref<1x128xf32, #tpu.memory_space<vmem>>, vector<1x128xf32>
    %200 = vector.broadcast %199 : vector<1x128xf32> to vector<2x128xf32>
    %201 = arith.addf %198, %200 : vector<2x128xf32>
    %202 = arith.negf %201 : vector<2x128xf32>
    %203 = math.exp %202 : vector<2x128xf32>
    %cst_66 = arith.constant 1.000000e+00 : f32
    %204 = vector.broadcast %cst_66 : f32 to vector<2x128xf32>
    %205 = arith.addf %204, %203 : vector<2x128xf32>
    %206 = arith.divf %204, %205 : vector<2x128xf32>
    %207 = math.tanh %201 : vector<2x128xf32>
    %208 = vector.extract_strided_slice %206 {offsets = [0, 0], sizes = [2, 32], strides = [1, 1]} : vector<2x128xf32> to vector<2x32xf32>
    %209 = vector.extract_strided_slice %206 {offsets = [0, 32], sizes = [2, 32], strides = [1, 1]} : vector<2x128xf32> to vector<2x32xf32>
    %210 = vector.extract_strided_slice %207 {offsets = [0, 64], sizes = [2, 32], strides = [1, 1]} : vector<2x128xf32> to vector<2x32xf32>
    %211 = vector.extract_strided_slice %206 {offsets = [0, 96], sizes = [2, 32], strides = [1, 1]} : vector<2x128xf32> to vector<2x32xf32>
    %212 = arith.mulf %209, %174 : vector<2x32xf32>
    %213 = arith.mulf %208, %210 : vector<2x32xf32>
    %214 = arith.addf %212, %213 : vector<2x32xf32>
    %215 = math.tanh %214 : vector<2x32xf32>
    %216 = arith.mulf %211, %215 : vector<2x32xf32>
    %217 = vector.extract_strided_slice %16 {offsets = [10, 0], sizes = [2, 128], strides = [1, 1]} : vector<16x128xf32> to vector<2x128xf32>
    %c0_67 = arith.constant 0 : index
    %c0_68 = arith.constant 0 : index
    %218 = vector.load %arg3[%c0_67, %c0_68] : memref<32x128xf32, #tpu.memory_space<vmem>>, vector<32x128xf32>
    %cst_69 = arith.constant dense<0.000000e+00> : vector<2x128xf32>
    %219 = tpu.matmul %195, %218, %cst_69 {dimension_numbers = #tpu.dot_dimension_numbers<[1], [0], [0], [1], [0, 0, 1, 1], [], []>, precision = #tpu.contract_precision<fp32>} : vector<2x32xf32>, vector<32x128xf32>, vector<2x128xf32> -> vector<2x128xf32>
    %220 = arith.addf %217, %219 : vector<2x128xf32>
    %221 = arith.negf %220 : vector<2x128xf32>
    %222 = math.exp %221 : vector<2x128xf32>
    %cst_70 = arith.constant 1.000000e+00 : f32
    %223 = vector.broadcast %cst_70 : f32 to vector<2x128xf32>
    %224 = arith.addf %223, %222 : vector<2x128xf32>
    %225 = arith.divf %223, %224 : vector<2x128xf32>
    %226 = math.tanh %220 : vector<2x128xf32>
    %227 = vector.extract_strided_slice %225 {offsets = [0, 0], sizes = [2, 32], strides = [1, 1]} : vector<2x128xf32> to vector<2x32xf32>
    %228 = vector.extract_strided_slice %225 {offsets = [0, 32], sizes = [2, 32], strides = [1, 1]} : vector<2x128xf32> to vector<2x32xf32>
    %229 = vector.extract_strided_slice %226 {offsets = [0, 64], sizes = [2, 32], strides = [1, 1]} : vector<2x128xf32> to vector<2x32xf32>
    %230 = vector.extract_strided_slice %225 {offsets = [0, 96], sizes = [2, 32], strides = [1, 1]} : vector<2x128xf32> to vector<2x32xf32>
    %231 = arith.mulf %228, %193 : vector<2x32xf32>
    %232 = arith.mulf %227, %229 : vector<2x32xf32>
    %233 = arith.addf %231, %232 : vector<2x32xf32>
    %234 = math.tanh %233 : vector<2x32xf32>
    %235 = arith.mulf %230, %234 : vector<2x32xf32>
    %236 = tpu.concatenate %235, %216 in 1 : vector<2x32xf32>, vector<2x32xf32> -> vector<2x64xf32>
    %c0_71 = arith.constant 0 : index
    %c0_72 = arith.constant 0 : index
    %237 = vector.load %arg5[%c0_71, %c0_72] : memref<64x128xf32, #tpu.memory_space<vmem>>, vector<64x128xf32>
    %cst_73 = arith.constant dense<0.000000e+00> : vector<2x128xf32>
    %238 = tpu.matmul %236, %237, %cst_73 {dimension_numbers = #tpu.dot_dimension_numbers<[1], [0], [0], [1], [0, 0, 1, 1], [], []>, precision = #tpu.contract_precision<fp32>} : vector<2x64xf32>, vector<64x128xf32>, vector<2x128xf32> -> vector<2x128xf32>
    %c0_74 = arith.constant 0 : index
    %c0_75 = arith.constant 0 : index
    %239 = vector.load %arg6[%c0_74, %c0_75] : memref<1x128xf32, #tpu.memory_space<vmem>>, vector<1x128xf32>
    %240 = vector.broadcast %239 : vector<1x128xf32> to vector<2x128xf32>
    %241 = arith.addf %238, %240 : vector<2x128xf32>
    %242 = arith.negf %241 : vector<2x128xf32>
    %243 = math.exp %242 : vector<2x128xf32>
    %cst_76 = arith.constant 1.000000e+00 : f32
    %244 = vector.broadcast %cst_76 : f32 to vector<2x128xf32>
    %245 = arith.addf %244, %243 : vector<2x128xf32>
    %246 = arith.divf %244, %245 : vector<2x128xf32>
    %247 = math.tanh %241 : vector<2x128xf32>
    %248 = vector.extract_strided_slice %246 {offsets = [0, 0], sizes = [2, 32], strides = [1, 1]} : vector<2x128xf32> to vector<2x32xf32>
    %249 = vector.extract_strided_slice %246 {offsets = [0, 32], sizes = [2, 32], strides = [1, 1]} : vector<2x128xf32> to vector<2x32xf32>
    %250 = vector.extract_strided_slice %247 {offsets = [0, 64], sizes = [2, 32], strides = [1, 1]} : vector<2x128xf32> to vector<2x32xf32>
    %251 = vector.extract_strided_slice %246 {offsets = [0, 96], sizes = [2, 32], strides = [1, 1]} : vector<2x128xf32> to vector<2x32xf32>
    %252 = arith.mulf %249, %214 : vector<2x32xf32>
    %253 = arith.mulf %248, %250 : vector<2x32xf32>
    %254 = arith.addf %252, %253 : vector<2x32xf32>
    %255 = math.tanh %254 : vector<2x32xf32>
    %256 = arith.mulf %251, %255 : vector<2x32xf32>
    %257 = vector.extract_strided_slice %16 {offsets = [12, 0], sizes = [2, 128], strides = [1, 1]} : vector<16x128xf32> to vector<2x128xf32>
    %c0_77 = arith.constant 0 : index
    %c0_78 = arith.constant 0 : index
    %258 = vector.load %arg3[%c0_77, %c0_78] : memref<32x128xf32, #tpu.memory_space<vmem>>, vector<32x128xf32>
    %cst_79 = arith.constant dense<0.000000e+00> : vector<2x128xf32>
    %259 = tpu.matmul %235, %258, %cst_79 {dimension_numbers = #tpu.dot_dimension_numbers<[1], [0], [0], [1], [0, 0, 1, 1], [], []>, precision = #tpu.contract_precision<fp32>} : vector<2x32xf32>, vector<32x128xf32>, vector<2x128xf32> -> vector<2x128xf32>
    %260 = arith.addf %257, %259 : vector<2x128xf32>
    %261 = arith.negf %260 : vector<2x128xf32>
    %262 = math.exp %261 : vector<2x128xf32>
    %cst_80 = arith.constant 1.000000e+00 : f32
    %263 = vector.broadcast %cst_80 : f32 to vector<2x128xf32>
    %264 = arith.addf %263, %262 : vector<2x128xf32>
    %265 = arith.divf %263, %264 : vector<2x128xf32>
    %266 = math.tanh %260 : vector<2x128xf32>
    %267 = vector.extract_strided_slice %265 {offsets = [0, 0], sizes = [2, 32], strides = [1, 1]} : vector<2x128xf32> to vector<2x32xf32>
    %268 = vector.extract_strided_slice %265 {offsets = [0, 32], sizes = [2, 32], strides = [1, 1]} : vector<2x128xf32> to vector<2x32xf32>
    %269 = vector.extract_strided_slice %266 {offsets = [0, 64], sizes = [2, 32], strides = [1, 1]} : vector<2x128xf32> to vector<2x32xf32>
    %270 = vector.extract_strided_slice %265 {offsets = [0, 96], sizes = [2, 32], strides = [1, 1]} : vector<2x128xf32> to vector<2x32xf32>
    %271 = arith.mulf %268, %233 : vector<2x32xf32>
    %272 = arith.mulf %267, %269 : vector<2x32xf32>
    %273 = arith.addf %271, %272 : vector<2x32xf32>
    %274 = math.tanh %273 : vector<2x32xf32>
    %275 = arith.mulf %270, %274 : vector<2x32xf32>
    %276 = tpu.concatenate %275, %256 in 1 : vector<2x32xf32>, vector<2x32xf32> -> vector<2x64xf32>
    %c0_81 = arith.constant 0 : index
    %c0_82 = arith.constant 0 : index
    %277 = vector.load %arg5[%c0_81, %c0_82] : memref<64x128xf32, #tpu.memory_space<vmem>>, vector<64x128xf32>
    %cst_83 = arith.constant dense<0.000000e+00> : vector<2x128xf32>
    %278 = tpu.matmul %276, %277, %cst_83 {dimension_numbers = #tpu.dot_dimension_numbers<[1], [0], [0], [1], [0, 0, 1, 1], [], []>, precision = #tpu.contract_precision<fp32>} : vector<2x64xf32>, vector<64x128xf32>, vector<2x128xf32> -> vector<2x128xf32>
    %c0_84 = arith.constant 0 : index
    %c0_85 = arith.constant 0 : index
    %279 = vector.load %arg6[%c0_84, %c0_85] : memref<1x128xf32, #tpu.memory_space<vmem>>, vector<1x128xf32>
    %280 = vector.broadcast %279 : vector<1x128xf32> to vector<2x128xf32>
    %281 = arith.addf %278, %280 : vector<2x128xf32>
    %282 = arith.negf %281 : vector<2x128xf32>
    %283 = math.exp %282 : vector<2x128xf32>
    %cst_86 = arith.constant 1.000000e+00 : f32
    %284 = vector.broadcast %cst_86 : f32 to vector<2x128xf32>
    %285 = arith.addf %284, %283 : vector<2x128xf32>
    %286 = arith.divf %284, %285 : vector<2x128xf32>
    %287 = math.tanh %281 : vector<2x128xf32>
    %288 = vector.extract_strided_slice %286 {offsets = [0, 0], sizes = [2, 32], strides = [1, 1]} : vector<2x128xf32> to vector<2x32xf32>
    %289 = vector.extract_strided_slice %286 {offsets = [0, 32], sizes = [2, 32], strides = [1, 1]} : vector<2x128xf32> to vector<2x32xf32>
    %290 = vector.extract_strided_slice %287 {offsets = [0, 64], sizes = [2, 32], strides = [1, 1]} : vector<2x128xf32> to vector<2x32xf32>
    %291 = vector.extract_strided_slice %286 {offsets = [0, 96], sizes = [2, 32], strides = [1, 1]} : vector<2x128xf32> to vector<2x32xf32>
    %292 = arith.mulf %289, %254 : vector<2x32xf32>
    %293 = arith.mulf %288, %290 : vector<2x32xf32>
    %294 = arith.addf %292, %293 : vector<2x32xf32>
    %295 = math.tanh %294 : vector<2x32xf32>
    %296 = arith.mulf %291, %295 : vector<2x32xf32>
    %297 = vector.extract_strided_slice %16 {offsets = [14, 0], sizes = [2, 128], strides = [1, 1]} : vector<16x128xf32> to vector<2x128xf32>
    %c0_87 = arith.constant 0 : index
    %c0_88 = arith.constant 0 : index
    %298 = vector.load %arg3[%c0_87, %c0_88] : memref<32x128xf32, #tpu.memory_space<vmem>>, vector<32x128xf32>
    %cst_89 = arith.constant dense<0.000000e+00> : vector<2x128xf32>
    %299 = tpu.matmul %275, %298, %cst_89 {dimension_numbers = #tpu.dot_dimension_numbers<[1], [0], [0], [1], [0, 0, 1, 1], [], []>, precision = #tpu.contract_precision<fp32>} : vector<2x32xf32>, vector<32x128xf32>, vector<2x128xf32> -> vector<2x128xf32>
    %300 = arith.addf %297, %299 : vector<2x128xf32>
    %301 = arith.negf %300 : vector<2x128xf32>
    %302 = math.exp %301 : vector<2x128xf32>
    %cst_90 = arith.constant 1.000000e+00 : f32
    %303 = vector.broadcast %cst_90 : f32 to vector<2x128xf32>
    %304 = arith.addf %303, %302 : vector<2x128xf32>
    %305 = arith.divf %303, %304 : vector<2x128xf32>
    %306 = math.tanh %300 : vector<2x128xf32>
    %307 = vector.extract_strided_slice %305 {offsets = [0, 0], sizes = [2, 32], strides = [1, 1]} : vector<2x128xf32> to vector<2x32xf32>
    %308 = vector.extract_strided_slice %305 {offsets = [0, 32], sizes = [2, 32], strides = [1, 1]} : vector<2x128xf32> to vector<2x32xf32>
    %309 = vector.extract_strided_slice %306 {offsets = [0, 64], sizes = [2, 32], strides = [1, 1]} : vector<2x128xf32> to vector<2x32xf32>
    %310 = vector.extract_strided_slice %305 {offsets = [0, 96], sizes = [2, 32], strides = [1, 1]} : vector<2x128xf32> to vector<2x32xf32>
    %311 = arith.mulf %308, %273 : vector<2x32xf32>
    %312 = arith.mulf %307, %309 : vector<2x32xf32>
    %313 = arith.addf %311, %312 : vector<2x32xf32>
    %314 = math.tanh %313 : vector<2x32xf32>
    %315 = arith.mulf %310, %314 : vector<2x32xf32>
    %316 = tpu.concatenate %315, %296 in 1 : vector<2x32xf32>, vector<2x32xf32> -> vector<2x64xf32>
    %c0_91 = arith.constant 0 : index
    %c0_92 = arith.constant 0 : index
    %317 = vector.load %arg5[%c0_91, %c0_92] : memref<64x128xf32, #tpu.memory_space<vmem>>, vector<64x128xf32>
    %cst_93 = arith.constant dense<0.000000e+00> : vector<2x128xf32>
    %318 = tpu.matmul %316, %317, %cst_93 {dimension_numbers = #tpu.dot_dimension_numbers<[1], [0], [0], [1], [0, 0, 1, 1], [], []>, precision = #tpu.contract_precision<fp32>} : vector<2x64xf32>, vector<64x128xf32>, vector<2x128xf32> -> vector<2x128xf32>
    %c0_94 = arith.constant 0 : index
    %c0_95 = arith.constant 0 : index
    %319 = vector.load %arg6[%c0_94, %c0_95] : memref<1x128xf32, #tpu.memory_space<vmem>>, vector<1x128xf32>
    %320 = vector.broadcast %319 : vector<1x128xf32> to vector<2x128xf32>
    %321 = arith.addf %318, %320 : vector<2x128xf32>
    %322 = arith.negf %321 : vector<2x128xf32>
    %323 = math.exp %322 : vector<2x128xf32>
    %cst_96 = arith.constant 1.000000e+00 : f32
    %324 = vector.broadcast %cst_96 : f32 to vector<2x128xf32>
    %325 = arith.addf %324, %323 : vector<2x128xf32>
    %326 = arith.divf %324, %325 : vector<2x128xf32>
    %327 = math.tanh %321 : vector<2x128xf32>
    %328 = vector.extract_strided_slice %326 {offsets = [0, 0], sizes = [2, 32], strides = [1, 1]} : vector<2x128xf32> to vector<2x32xf32>
    %329 = vector.extract_strided_slice %326 {offsets = [0, 32], sizes = [2, 32], strides = [1, 1]} : vector<2x128xf32> to vector<2x32xf32>
    %330 = vector.extract_strided_slice %327 {offsets = [0, 64], sizes = [2, 32], strides = [1, 1]} : vector<2x128xf32> to vector<2x32xf32>
    %331 = vector.extract_strided_slice %326 {offsets = [0, 96], sizes = [2, 32], strides = [1, 1]} : vector<2x128xf32> to vector<2x32xf32>
    %332 = arith.mulf %329, %294 : vector<2x32xf32>
    %333 = arith.mulf %328, %330 : vector<2x32xf32>
    %334 = arith.addf %332, %333 : vector<2x32xf32>
    %335 = math.tanh %334 : vector<2x32xf32>
    %336 = arith.mulf %331, %335 : vector<2x32xf32>
    %c0_97 = arith.constant 0 : index
    %c0_98 = arith.constant 0 : index
    %c0_99 = arith.constant 0 : index
    %337 = vector.load %arg16[%c0_97, %c0_98, %c0_99] : memref<2x2x32xf32, #tpu.memory_space<vmem>>, vector<1x2x32xf32>
    %338 = vector.shape_cast %337 : vector<1x2x32xf32> to vector<2x32xf32>
    %339 = vector.shape_cast %315 : vector<2x32xf32> to vector<1x2x32xf32>
    tpu.vector_store %arg16[%c0_97, %c0_98, %c0_99], %339 {strides = array<i32>} : memref<2x2x32xf32, #tpu.memory_space<vmem>>, vector<1x2x32xf32>,
    %c0_100 = arith.constant 0 : index
    %c0_101 = arith.constant 0 : index
    %c0_102 = arith.constant 0 : index
    %340 = vector.load %arg17[%c0_100, %c0_101, %c0_102] : memref<2x2x32xf32, #tpu.memory_space<vmem>>, vector<1x2x32xf32>
    %341 = vector.shape_cast %340 : vector<1x2x32xf32> to vector<2x32xf32>
    %342 = vector.shape_cast %313 : vector<2x32xf32> to vector<1x2x32xf32>
    tpu.vector_store %arg17[%c0_100, %c0_101, %c0_102], %342 {strides = array<i32>} : memref<2x2x32xf32, #tpu.memory_space<vmem>>, vector<1x2x32xf32>,
    %c1_103 = arith.constant 1 : index
    %c0_104 = arith.constant 0 : index
    %c0_105 = arith.constant 0 : index
    %343 = vector.load %arg16[%c1_103, %c0_104, %c0_105] : memref<2x2x32xf32, #tpu.memory_space<vmem>>, vector<1x2x32xf32>
    %344 = vector.shape_cast %343 : vector<1x2x32xf32> to vector<2x32xf32>
    %345 = vector.shape_cast %336 : vector<2x32xf32> to vector<1x2x32xf32>
    tpu.vector_store %arg16[%c1_103, %c0_104, %c0_105], %345 {strides = array<i32>} : memref<2x2x32xf32, #tpu.memory_space<vmem>>, vector<1x2x32xf32>,
    %c1_106 = arith.constant 1 : index
    %c0_107 = arith.constant 0 : index
    %c0_108 = arith.constant 0 : index
    %346 = vector.load %arg17[%c1_106, %c0_107, %c0_108] : memref<2x2x32xf32, #tpu.memory_space<vmem>>, vector<1x2x32xf32>
    %347 = vector.shape_cast %346 : vector<1x2x32xf32> to vector<2x32xf32>
    %348 = vector.shape_cast %334 : vector<2x32xf32> to vector<1x2x32xf32>
    tpu.vector_store %arg17[%c1_106, %c0_107, %c0_108], %348 {strides = array<i32>} : memref<2x2x32xf32, #tpu.memory_space<vmem>>, vector<1x2x32xf32>,
    %c0_i32_109 = arith.constant 0 : i32
    %349 = arith.cmpi eq, %arg0, %c0_i32_109 : i32
    %350 = arith.extui %349 : i1 to i32
    %c0_i32_110 = arith.constant 0 : i32
    %351 = arith.cmpi ne, %350, %c0_i32_110 : i32
    scf.if %351 {
      %c0_111 = arith.constant 0 : index
      %c0_112 = arith.constant 0 : index
      %352 = vector.load %arg14[%c0_111, %c0_112] : memref<2x2xf32, #tpu.memory_space<vmem>>, vector<2x2xf32>
      %c0_113 = arith.constant 0 : index
      %c0_114 = arith.constant 0 : index
      %353 = vector.load %arg7[%c0_113, %c0_114] : memref<2x128xf32, #tpu.memory_space<vmem>>, vector<2x128xf32>
      %cst_115 = arith.constant dense<0.000000e+00> : vector<2x128xf32>
      %354 = tpu.matmul %352, %353, %cst_115 {dimension_numbers = #tpu.dot_dimension_numbers<[1], [0], [0], [1], [0, 0, 1, 1], [], []>, precision = #tpu.contract_precision<fp32>} : vector<2x2xf32>, vector<2x128xf32>, vector<2x128xf32> -> vector<2x128xf32>
      %c0_116 = arith.constant 0 : index
      %c0_117 = arith.constant 0 : index
      %355 = vector.load %arg8[%c0_116, %c0_117] : memref<32x128xf32, #tpu.memory_space<vmem>>, vector<32x128xf32>
      %cst_118 = arith.constant dense<0.000000e+00> : vector<2x128xf32>
      %356 = tpu.matmul %315, %355, %cst_118 {dimension_numbers = #tpu.dot_dimension_numbers<[1], [0], [0], [1], [0, 0, 1, 1], [], []>, precision = #tpu.contract_precision<fp32>} : vector<2x32xf32>, vector<32x128xf32>, vector<2x128xf32> -> vector<2x128xf32>
      %357 = arith.addf %354, %356 : vector<2x128xf32>
      %c0_119 = arith.constant 0 : index
      %c0_120 = arith.constant 0 : index
      %358 = vector.load %arg9[%c0_119, %c0_120] : memref<1x128xf32, #tpu.memory_space<vmem>>, vector<1x128xf32>
      %359 = vector.broadcast %358 : vector<1x128xf32> to vector<2x128xf32>
      %360 = arith.addf %357, %359 : vector<2x128xf32>
      %361 = arith.negf %360 : vector<2x128xf32>
      %362 = math.exp %361 : vector<2x128xf32>
      %cst_121 = arith.constant 1.000000e+00 : f32
      %363 = vector.broadcast %cst_121 : f32 to vector<2x128xf32>
      %364 = arith.addf %363, %362 : vector<2x128xf32>
      %365 = arith.divf %363, %364 : vector<2x128xf32>
      %366 = math.tanh %360 : vector<2x128xf32>
      %367 = vector.extract_strided_slice %365 {offsets = [0, 0], sizes = [2, 32], strides = [1, 1]} : vector<2x128xf32> to vector<2x32xf32>
      %368 = vector.extract_strided_slice %365 {offsets = [0, 32], sizes = [2, 32], strides = [1, 1]} : vector<2x128xf32> to vector<2x32xf32>
      %369 = vector.extract_strided_slice %366 {offsets = [0, 64], sizes = [2, 32], strides = [1, 1]} : vector<2x128xf32> to vector<2x32xf32>
      %370 = vector.extract_strided_slice %365 {offsets = [0, 96], sizes = [2, 32], strides = [1, 1]} : vector<2x128xf32> to vector<2x32xf32>
      %371 = arith.mulf %368, %313 : vector<2x32xf32>
      %372 = arith.mulf %367, %369 : vector<2x32xf32>
      %373 = arith.addf %371, %372 : vector<2x32xf32>
      %374 = math.tanh %373 : vector<2x32xf32>
      %375 = arith.mulf %370, %374 : vector<2x32xf32>
      %376 = tpu.concatenate %375, %336 in 1 : vector<2x32xf32>, vector<2x32xf32> -> vector<2x64xf32>
      %c0_122 = arith.constant 0 : index
      %c0_123 = arith.constant 0 : index
      %377 = vector.load %arg10[%c0_122, %c0_123] : memref<64x128xf32, #tpu.memory_space<vmem>>, vector<64x128xf32>
      %cst_124 = arith.constant dense<0.000000e+00> : vector<2x128xf32>
      %378 = tpu.matmul %376, %377, %cst_124 {dimension_numbers = #tpu.dot_dimension_numbers<[1], [0], [0], [1], [0, 0, 1, 1], [], []>, precision = #tpu.contract_precision<fp32>} : vector<2x64xf32>, vector<64x128xf32>, vector<2x128xf32> -> vector<2x128xf32>
      %c0_125 = arith.constant 0 : index
      %c0_126 = arith.constant 0 : index
      %379 = vector.load %arg11[%c0_125, %c0_126] : memref<1x128xf32, #tpu.memory_space<vmem>>, vector<1x128xf32>
      %380 = vector.broadcast %379 : vector<1x128xf32> to vector<2x128xf32>
      %381 = arith.addf %378, %380 : vector<2x128xf32>
      %382 = arith.negf %381 : vector<2x128xf32>
      %383 = math.exp %382 : vector<2x128xf32>
      %cst_127 = arith.constant 1.000000e+00 : f32
      %384 = vector.broadcast %cst_127 : f32 to vector<2x128xf32>
      %385 = arith.addf %384, %383 : vector<2x128xf32>
      %386 = arith.divf %384, %385 : vector<2x128xf32>
      %387 = math.tanh %381 : vector<2x128xf32>
      %388 = vector.extract_strided_slice %386 {offsets = [0, 0], sizes = [2, 32], strides = [1, 1]} : vector<2x128xf32> to vector<2x32xf32>
      %389 = vector.extract_strided_slice %386 {offsets = [0, 32], sizes = [2, 32], strides = [1, 1]} : vector<2x128xf32> to vector<2x32xf32>
      %390 = vector.extract_strided_slice %387 {offsets = [0, 64], sizes = [2, 32], strides = [1, 1]} : vector<2x128xf32> to vector<2x32xf32>
      %391 = vector.extract_strided_slice %386 {offsets = [0, 96], sizes = [2, 32], strides = [1, 1]} : vector<2x128xf32> to vector<2x32xf32>
      %392 = arith.mulf %389, %334 : vector<2x32xf32>
      %393 = arith.mulf %388, %390 : vector<2x32xf32>
      %394 = arith.addf %392, %393 : vector<2x32xf32>
      %395 = math.tanh %394 : vector<2x32xf32>
      %396 = arith.mulf %391, %395 : vector<2x32xf32>
      %c0_128 = arith.constant 0 : index
      %c0_129 = arith.constant 0 : index
      %397 = vector.load %arg12[%c0_128, %c0_129] : memref<32x2xf32, #tpu.memory_space<vmem>>, vector<32x2xf32>
      %cst_130 = arith.constant dense<0.000000e+00> : vector<2x2xf32>
      %398 = tpu.matmul %396, %397, %cst_130 {dimension_numbers = #tpu.dot_dimension_numbers<[1], [0], [0], [1], [0, 0, 1, 1], [], []>, precision = #tpu.contract_precision<fp32>} : vector<2x32xf32>, vector<32x2xf32>, vector<2x2xf32> -> vector<2x2xf32>
      %c0_131 = arith.constant 0 : index
      %c0_132 = arith.constant 0 : index
      %399 = vector.load %arg13[%c0_131, %c0_132] : memref<1x2xf32, #tpu.memory_space<vmem>>, vector<1x2xf32>
      %400 = vector.broadcast %399 : vector<1x2xf32> to vector<2x2xf32>
      %401 = arith.addf %398, %400 : vector<2x2xf32>
      %c0_133 = arith.constant 0 : index
      %c0_134 = arith.constant 0 : index
      %c0_135 = arith.constant 0 : index
      %402 = vector.load %arg15[%c0_133, %c0_134, %c0_135] : memref<4x2x2xf32, #tpu.memory_space<vmem>>, vector<1x2x2xf32>
      %403 = vector.shape_cast %402 : vector<1x2x2xf32> to vector<2x2xf32>
      %404 = vector.shape_cast %401 : vector<2x2xf32> to vector<1x2x2xf32>
      tpu.vector_store %arg15[%c0_133, %c0_134, %c0_135], %404 {strides = array<i32>} : memref<4x2x2xf32, #tpu.memory_space<vmem>>, vector<1x2x2xf32>,
      %c0_136 = arith.constant 0 : index
      %c0_137 = arith.constant 0 : index
      %405 = vector.load %arg7[%c0_136, %c0_137] : memref<2x128xf32, #tpu.memory_space<vmem>>, vector<2x128xf32>
      %cst_138 = arith.constant dense<0.000000e+00> : vector<2x128xf32>
      %406 = tpu.matmul %401, %405, %cst_138 {dimension_numbers = #tpu.dot_dimension_numbers<[1], [0], [0], [1], [0, 0, 1, 1], [], []>, precision = #tpu.contract_precision<fp32>} : vector<2x2xf32>, vector<2x128xf32>, vector<2x128xf32> -> vector<2x128xf32>
      %c0_139 = arith.constant 0 : index
      %c0_140 = arith.constant 0 : index
      %407 = vector.load %arg8[%c0_139, %c0_140] : memref<32x128xf32, #tpu.memory_space<vmem>>, vector<32x128xf32>
      %cst_141 = arith.constant dense<0.000000e+00> : vector<2x128xf32>
      %408 = tpu.matmul %375, %407, %cst_141 {dimension_numbers = #tpu.dot_dimension_numbers<[1], [0], [0], [1], [0, 0, 1, 1], [], []>, precision = #tpu.contract_precision<fp32>} : vector<2x32xf32>, vector<32x128xf32>, vector<2x128xf32> -> vector<2x128xf32>
      %409 = arith.addf %406, %408 : vector<2x128xf32>
      %c0_142 = arith.constant 0 : index
      %c0_143 = arith.constant 0 : index
      %410 = vector.load %arg9[%c0_142, %c0_143] : memref<1x128xf32, #tpu.memory_space<vmem>>, vector<1x128xf32>
      %411 = vector.broadcast %410 : vector<1x128xf32> to vector<2x128xf32>
      %412 = arith.addf %409, %411 : vector<2x128xf32>
      %413 = arith.negf %412 : vector<2x128xf32>
      %414 = math.exp %413 : vector<2x128xf32>
      %cst_144 = arith.constant 1.000000e+00 : f32
      %415 = vector.broadcast %cst_144 : f32 to vector<2x128xf32>
      %416 = arith.addf %415, %414 : vector<2x128xf32>
      %417 = arith.divf %415, %416 : vector<2x128xf32>
      %418 = math.tanh %412 : vector<2x128xf32>
      %419 = vector.extract_strided_slice %417 {offsets = [0, 0], sizes = [2, 32], strides = [1, 1]} : vector<2x128xf32> to vector<2x32xf32>
      %420 = vector.extract_strided_slice %417 {offsets = [0, 32], sizes = [2, 32], strides = [1, 1]} : vector<2x128xf32> to vector<2x32xf32>
      %421 = vector.extract_strided_slice %418 {offsets = [0, 64], sizes = [2, 32], strides = [1, 1]} : vector<2x128xf32> to vector<2x32xf32>
      %422 = vector.extract_strided_slice %417 {offsets = [0, 96], sizes = [2, 32], strides = [1, 1]} : vector<2x128xf32> to vector<2x32xf32>
      %423 = arith.mulf %420, %373 : vector<2x32xf32>
      %424 = arith.mulf %419, %421 : vector<2x32xf32>
      %425 = arith.addf %423, %424 : vector<2x32xf32>
      %426 = math.tanh %425 : vector<2x32xf32>
      %427 = arith.mulf %422, %426 : vector<2x32xf32>
      %428 = tpu.concatenate %427, %396 in 1 : vector<2x32xf32>, vector<2x32xf32> -> vector<2x64xf32>
      %c0_145 = arith.constant 0 : index
      %c0_146 = arith.constant 0 : index
      %429 = vector.load %arg10[%c0_145, %c0_146] : memref<64x128xf32, #tpu.memory_space<vmem>>, vector<64x128xf32>
      %cst_147 = arith.constant dense<0.000000e+00> : vector<2x128xf32>
      %430 = tpu.matmul %428, %429, %cst_147 {dimension_numbers = #tpu.dot_dimension_numbers<[1], [0], [0], [1], [0, 0, 1, 1], [], []>, precision = #tpu.contract_precision<fp32>} : vector<2x64xf32>, vector<64x128xf32>, vector<2x128xf32> -> vector<2x128xf32>
      %c0_148 = arith.constant 0 : index
      %c0_149 = arith.constant 0 : index
      %431 = vector.load %arg11[%c0_148, %c0_149] : memref<1x128xf32, #tpu.memory_space<vmem>>, vector<1x128xf32>
      %432 = vector.broadcast %431 : vector<1x128xf32> to vector<2x128xf32>
      %433 = arith.addf %430, %432 : vector<2x128xf32>
      %434 = arith.negf %433 : vector<2x128xf32>
      %435 = math.exp %434 : vector<2x128xf32>
      %cst_150 = arith.constant 1.000000e+00 : f32
      %436 = vector.broadcast %cst_150 : f32 to vector<2x128xf32>
      %437 = arith.addf %436, %435 : vector<2x128xf32>
      %438 = arith.divf %436, %437 : vector<2x128xf32>
      %439 = math.tanh %433 : vector<2x128xf32>
      %440 = vector.extract_strided_slice %438 {offsets = [0, 0], sizes = [2, 32], strides = [1, 1]} : vector<2x128xf32> to vector<2x32xf32>
      %441 = vector.extract_strided_slice %438 {offsets = [0, 32], sizes = [2, 32], strides = [1, 1]} : vector<2x128xf32> to vector<2x32xf32>
      %442 = vector.extract_strided_slice %439 {offsets = [0, 64], sizes = [2, 32], strides = [1, 1]} : vector<2x128xf32> to vector<2x32xf32>
      %443 = vector.extract_strided_slice %438 {offsets = [0, 96], sizes = [2, 32], strides = [1, 1]} : vector<2x128xf32> to vector<2x32xf32>
      %444 = arith.mulf %441, %394 : vector<2x32xf32>
      %445 = arith.mulf %440, %442 : vector<2x32xf32>
      %446 = arith.addf %444, %445 : vector<2x32xf32>
      %447 = math.tanh %446 : vector<2x32xf32>
      %448 = arith.mulf %443, %447 : vector<2x32xf32>
      %c0_151 = arith.constant 0 : index
      %c0_152 = arith.constant 0 : index
      %449 = vector.load %arg12[%c0_151, %c0_152] : memref<32x2xf32, #tpu.memory_space<vmem>>, vector<32x2xf32>
      %cst_153 = arith.constant dense<0.000000e+00> : vector<2x2xf32>
      %450 = tpu.matmul %448, %449, %cst_153 {dimension_numbers = #tpu.dot_dimension_numbers<[1], [0], [0], [1], [0, 0, 1, 1], [], []>, precision = #tpu.contract_precision<fp32>} : vector<2x32xf32>, vector<32x2xf32>, vector<2x2xf32> -> vector<2x2xf32>
      %c0_154 = arith.constant 0 : index
      %c0_155 = arith.constant 0 : index
      %451 = vector.load %arg13[%c0_154, %c0_155] : memref<1x2xf32, #tpu.memory_space<vmem>>, vector<1x2xf32>
      %452 = vector.broadcast %451 : vector<1x2xf32> to vector<2x2xf32>
      %453 = arith.addf %450, %452 : vector<2x2xf32>
      %c1_156 = arith.constant 1 : index
      %c0_157 = arith.constant 0 : index
      %c0_158 = arith.constant 0 : index
      %454 = vector.load %arg15[%c1_156, %c0_157, %c0_158] : memref<4x2x2xf32, #tpu.memory_space<vmem>>, vector<1x2x2xf32>
      %455 = vector.shape_cast %454 : vector<1x2x2xf32> to vector<2x2xf32>
      %456 = vector.shape_cast %453 : vector<2x2xf32> to vector<1x2x2xf32>
      tpu.vector_store %arg15[%c1_156, %c0_157, %c0_158], %456 {strides = array<i32>} : memref<4x2x2xf32, #tpu.memory_space<vmem>>, vector<1x2x2xf32>,
      %c0_159 = arith.constant 0 : index
      %c0_160 = arith.constant 0 : index
      %457 = vector.load %arg7[%c0_159, %c0_160] : memref<2x128xf32, #tpu.memory_space<vmem>>, vector<2x128xf32>
      %cst_161 = arith.constant dense<0.000000e+00> : vector<2x128xf32>
      %458 = tpu.matmul %453, %457, %cst_161 {dimension_numbers = #tpu.dot_dimension_numbers<[1], [0], [0], [1], [0, 0, 1, 1], [], []>, precision = #tpu.contract_precision<fp32>} : vector<2x2xf32>, vector<2x128xf32>, vector<2x128xf32> -> vector<2x128xf32>
      %c0_162 = arith.constant 0 : index
      %c0_163 = arith.constant 0 : index
      %459 = vector.load %arg8[%c0_162, %c0_163] : memref<32x128xf32, #tpu.memory_space<vmem>>, vector<32x128xf32>
      %cst_164 = arith.constant dense<0.000000e+00> : vector<2x128xf32>
      %460 = tpu.matmul %427, %459, %cst_164 {dimension_numbers = #tpu.dot_dimension_numbers<[1], [0], [0], [1], [0, 0, 1, 1], [], []>, precision = #tpu.contract_precision<fp32>} : vector<2x32xf32>, vector<32x128xf32>, vector<2x128xf32> -> vector<2x128xf32>
      %461 = arith.addf %458, %460 : vector<2x128xf32>
      %c0_165 = arith.constant 0 : index
      %c0_166 = arith.constant 0 : index
      %462 = vector.load %arg9[%c0_165, %c0_166] : memref<1x128xf32, #tpu.memory_space<vmem>>, vector<1x128xf32>
      %463 = vector.broadcast %462 : vector<1x128xf32> to vector<2x128xf32>
      %464 = arith.addf %461, %463 : vector<2x128xf32>
      %465 = arith.negf %464 : vector<2x128xf32>
      %466 = math.exp %465 : vector<2x128xf32>
      %cst_167 = arith.constant 1.000000e+00 : f32
      %467 = vector.broadcast %cst_167 : f32 to vector<2x128xf32>
      %468 = arith.addf %467, %466 : vector<2x128xf32>
      %469 = arith.divf %467, %468 : vector<2x128xf32>
      %470 = math.tanh %464 : vector<2x128xf32>
      %471 = vector.extract_strided_slice %469 {offsets = [0, 0], sizes = [2, 32], strides = [1, 1]} : vector<2x128xf32> to vector<2x32xf32>
      %472 = vector.extract_strided_slice %469 {offsets = [0, 32], sizes = [2, 32], strides = [1, 1]} : vector<2x128xf32> to vector<2x32xf32>
      %473 = vector.extract_strided_slice %470 {offsets = [0, 64], sizes = [2, 32], strides = [1, 1]} : vector<2x128xf32> to vector<2x32xf32>
      %474 = vector.extract_strided_slice %469 {offsets = [0, 96], sizes = [2, 32], strides = [1, 1]} : vector<2x128xf32> to vector<2x32xf32>
      %475 = arith.mulf %472, %425 : vector<2x32xf32>
      %476 = arith.mulf %471, %473 : vector<2x32xf32>
      %477 = arith.addf %475, %476 : vector<2x32xf32>
      %478 = math.tanh %477 : vector<2x32xf32>
      %479 = arith.mulf %474, %478 : vector<2x32xf32>
      %480 = tpu.concatenate %479, %448 in 1 : vector<2x32xf32>, vector<2x32xf32> -> vector<2x64xf32>
      %c0_168 = arith.constant 0 : index
      %c0_169 = arith.constant 0 : index
      %481 = vector.load %arg10[%c0_168, %c0_169] : memref<64x128xf32, #tpu.memory_space<vmem>>, vector<64x128xf32>
      %cst_170 = arith.constant dense<0.000000e+00> : vector<2x128xf32>
      %482 = tpu.matmul %480, %481, %cst_170 {dimension_numbers = #tpu.dot_dimension_numbers<[1], [0], [0], [1], [0, 0, 1, 1], [], []>, precision = #tpu.contract_precision<fp32>} : vector<2x64xf32>, vector<64x128xf32>, vector<2x128xf32> -> vector<2x128xf32>
      %c0_171 = arith.constant 0 : index
      %c0_172 = arith.constant 0 : index
      %483 = vector.load %arg11[%c0_171, %c0_172] : memref<1x128xf32, #tpu.memory_space<vmem>>, vector<1x128xf32>
      %484 = vector.broadcast %483 : vector<1x128xf32> to vector<2x128xf32>
      %485 = arith.addf %482, %484 : vector<2x128xf32>
      %486 = arith.negf %485 : vector<2x128xf32>
      %487 = math.exp %486 : vector<2x128xf32>
      %cst_173 = arith.constant 1.000000e+00 : f32
      %488 = vector.broadcast %cst_173 : f32 to vector<2x128xf32>
      %489 = arith.addf %488, %487 : vector<2x128xf32>
      %490 = arith.divf %488, %489 : vector<2x128xf32>
      %491 = math.tanh %485 : vector<2x128xf32>
      %492 = vector.extract_strided_slice %490 {offsets = [0, 0], sizes = [2, 32], strides = [1, 1]} : vector<2x128xf32> to vector<2x32xf32>
      %493 = vector.extract_strided_slice %490 {offsets = [0, 32], sizes = [2, 32], strides = [1, 1]} : vector<2x128xf32> to vector<2x32xf32>
      %494 = vector.extract_strided_slice %491 {offsets = [0, 64], sizes = [2, 32], strides = [1, 1]} : vector<2x128xf32> to vector<2x32xf32>
      %495 = vector.extract_strided_slice %490 {offsets = [0, 96], sizes = [2, 32], strides = [1, 1]} : vector<2x128xf32> to vector<2x32xf32>
      %496 = arith.mulf %493, %446 : vector<2x32xf32>
      %497 = arith.mulf %492, %494 : vector<2x32xf32>
      %498 = arith.addf %496, %497 : vector<2x32xf32>
      %499 = math.tanh %498 : vector<2x32xf32>
      %500 = arith.mulf %495, %499 : vector<2x32xf32>
      %c0_174 = arith.constant 0 : index
      %c0_175 = arith.constant 0 : index
      %501 = vector.load %arg12[%c0_174, %c0_175] : memref<32x2xf32, #tpu.memory_space<vmem>>, vector<32x2xf32>
      %cst_176 = arith.constant dense<0.000000e+00> : vector<2x2xf32>
      %502 = tpu.matmul %500, %501, %cst_176 {dimension_numbers = #tpu.dot_dimension_numbers<[1], [0], [0], [1], [0, 0, 1, 1], [], []>, precision = #tpu.contract_precision<fp32>} : vector<2x32xf32>, vector<32x2xf32>, vector<2x2xf32> -> vector<2x2xf32>
      %c0_177 = arith.constant 0 : index
      %c0_178 = arith.constant 0 : index
      %503 = vector.load %arg13[%c0_177, %c0_178] : memref<1x2xf32, #tpu.memory_space<vmem>>, vector<1x2xf32>
      %504 = vector.broadcast %503 : vector<1x2xf32> to vector<2x2xf32>
      %505 = arith.addf %502, %504 : vector<2x2xf32>
      %c2 = arith.constant 2 : index
      %c0_179 = arith.constant 0 : index
      %c0_180 = arith.constant 0 : index
      %506 = vector.load %arg15[%c2, %c0_179, %c0_180] : memref<4x2x2xf32, #tpu.memory_space<vmem>>, vector<1x2x2xf32>
      %507 = vector.shape_cast %506 : vector<1x2x2xf32> to vector<2x2xf32>
      %508 = vector.shape_cast %505 : vector<2x2xf32> to vector<1x2x2xf32>
      tpu.vector_store %arg15[%c2, %c0_179, %c0_180], %508 {strides = array<i32>} : memref<4x2x2xf32, #tpu.memory_space<vmem>>, vector<1x2x2xf32>,
      %c0_181 = arith.constant 0 : index
      %c0_182 = arith.constant 0 : index
      %509 = vector.load %arg7[%c0_181, %c0_182] : memref<2x128xf32, #tpu.memory_space<vmem>>, vector<2x128xf32>
      %cst_183 = arith.constant dense<0.000000e+00> : vector<2x128xf32>
      %510 = tpu.matmul %505, %509, %cst_183 {dimension_numbers = #tpu.dot_dimension_numbers<[1], [0], [0], [1], [0, 0, 1, 1], [], []>, precision = #tpu.contract_precision<fp32>} : vector<2x2xf32>, vector<2x128xf32>, vector<2x128xf32> -> vector<2x128xf32>
      %c0_184 = arith.constant 0 : index
      %c0_185 = arith.constant 0 : index
      %511 = vector.load %arg8[%c0_184, %c0_185] : memref<32x128xf32, #tpu.memory_space<vmem>>, vector<32x128xf32>
      %cst_186 = arith.constant dense<0.000000e+00> : vector<2x128xf32>
      %512 = tpu.matmul %479, %511, %cst_186 {dimension_numbers = #tpu.dot_dimension_numbers<[1], [0], [0], [1], [0, 0, 1, 1], [], []>, precision = #tpu.contract_precision<fp32>} : vector<2x32xf32>, vector<32x128xf32>, vector<2x128xf32> -> vector<2x128xf32>
      %513 = arith.addf %510, %512 : vector<2x128xf32>
      %c0_187 = arith.constant 0 : index
      %c0_188 = arith.constant 0 : index
      %514 = vector.load %arg9[%c0_187, %c0_188] : memref<1x128xf32, #tpu.memory_space<vmem>>, vector<1x128xf32>
      %515 = vector.broadcast %514 : vector<1x128xf32> to vector<2x128xf32>
      %516 = arith.addf %513, %515 : vector<2x128xf32>
      %517 = arith.negf %516 : vector<2x128xf32>
      %518 = math.exp %517 : vector<2x128xf32>
      %cst_189 = arith.constant 1.000000e+00 : f32
      %519 = vector.broadcast %cst_189 : f32 to vector<2x128xf32>
      %520 = arith.addf %519, %518 : vector<2x128xf32>
      %521 = arith.divf %519, %520 : vector<2x128xf32>
      %522 = math.tanh %516 : vector<2x128xf32>
      %523 = vector.extract_strided_slice %521 {offsets = [0, 0], sizes = [2, 32], strides = [1, 1]} : vector<2x128xf32> to vector<2x32xf32>
      %524 = vector.extract_strided_slice %521 {offsets = [0, 32], sizes = [2, 32], strides = [1, 1]} : vector<2x128xf32> to vector<2x32xf32>
      %525 = vector.extract_strided_slice %522 {offsets = [0, 64], sizes = [2, 32], strides = [1, 1]} : vector<2x128xf32> to vector<2x32xf32>
      %526 = vector.extract_strided_slice %521 {offsets = [0, 96], sizes = [2, 32], strides = [1, 1]} : vector<2x128xf32> to vector<2x32xf32>
      %527 = arith.mulf %524, %477 : vector<2x32xf32>
      %528 = arith.mulf %523, %525 : vector<2x32xf32>
      %529 = arith.addf %527, %528 : vector<2x32xf32>
      %530 = math.tanh %529 : vector<2x32xf32>
      %531 = arith.mulf %526, %530 : vector<2x32xf32>
      %532 = tpu.concatenate %531, %500 in 1 : vector<2x32xf32>, vector<2x32xf32> -> vector<2x64xf32>
      %c0_190 = arith.constant 0 : index
      %c0_191 = arith.constant 0 : index
      %533 = vector.load %arg10[%c0_190, %c0_191] : memref<64x128xf32, #tpu.memory_space<vmem>>, vector<64x128xf32>
      %cst_192 = arith.constant dense<0.000000e+00> : vector<2x128xf32>
      %534 = tpu.matmul %532, %533, %cst_192 {dimension_numbers = #tpu.dot_dimension_numbers<[1], [0], [0], [1], [0, 0, 1, 1], [], []>, precision = #tpu.contract_precision<fp32>} : vector<2x64xf32>, vector<64x128xf32>, vector<2x128xf32> -> vector<2x128xf32>
      %c0_193 = arith.constant 0 : index
      %c0_194 = arith.constant 0 : index
      %535 = vector.load %arg11[%c0_193, %c0_194] : memref<1x128xf32, #tpu.memory_space<vmem>>, vector<1x128xf32>
      %536 = vector.broadcast %535 : vector<1x128xf32> to vector<2x128xf32>
      %537 = arith.addf %534, %536 : vector<2x128xf32>
      %538 = arith.negf %537 : vector<2x128xf32>
      %539 = math.exp %538 : vector<2x128xf32>
      %cst_195 = arith.constant 1.000000e+00 : f32
      %540 = vector.broadcast %cst_195 : f32 to vector<2x128xf32>
      %541 = arith.addf %540, %539 : vector<2x128xf32>
      %542 = arith.divf %540, %541 : vector<2x128xf32>
      %543 = math.tanh %537 : vector<2x128xf32>
      %544 = vector.extract_strided_slice %542 {offsets = [0, 0], sizes = [2, 32], strides = [1, 1]} : vector<2x128xf32> to vector<2x32xf32>
      %545 = vector.extract_strided_slice %542 {offsets = [0, 32], sizes = [2, 32], strides = [1, 1]} : vector<2x128xf32> to vector<2x32xf32>
      %546 = vector.extract_strided_slice %543 {offsets = [0, 64], sizes = [2, 32], strides = [1, 1]} : vector<2x128xf32> to vector<2x32xf32>
      %547 = vector.extract_strided_slice %542 {offsets = [0, 96], sizes = [2, 32], strides = [1, 1]} : vector<2x128xf32> to vector<2x32xf32>
      %548 = arith.mulf %545, %498 : vector<2x32xf32>
      %549 = arith.mulf %544, %546 : vector<2x32xf32>
      %550 = arith.addf %548, %549 : vector<2x32xf32>
      %551 = math.tanh %550 : vector<2x32xf32>
      %552 = arith.mulf %547, %551 : vector<2x32xf32>
      %c0_196 = arith.constant 0 : index
      %c0_197 = arith.constant 0 : index
      %553 = vector.load %arg12[%c0_196, %c0_197] : memref<32x2xf32, #tpu.memory_space<vmem>>, vector<32x2xf32>
      %cst_198 = arith.constant dense<0.000000e+00> : vector<2x2xf32>
      %554 = tpu.matmul %552, %553, %cst_198 {dimension_numbers = #tpu.dot_dimension_numbers<[1], [0], [0], [1], [0, 0, 1, 1], [], []>, precision = #tpu.contract_precision<fp32>} : vector<2x32xf32>, vector<32x2xf32>, vector<2x2xf32> -> vector<2x2xf32>
      %c0_199 = arith.constant 0 : index
      %c0_200 = arith.constant 0 : index
      %555 = vector.load %arg13[%c0_199, %c0_200] : memref<1x2xf32, #tpu.memory_space<vmem>>, vector<1x2xf32>
      %556 = vector.broadcast %555 : vector<1x2xf32> to vector<2x2xf32>
      %557 = arith.addf %554, %556 : vector<2x2xf32>
      %c3 = arith.constant 3 : index
      %c0_201 = arith.constant 0 : index
      %c0_202 = arith.constant 0 : index
      %558 = vector.load %arg15[%c3, %c0_201, %c0_202] : memref<4x2x2xf32, #tpu.memory_space<vmem>>, vector<1x2x2xf32>
      %559 = vector.shape_cast %558 : vector<1x2x2xf32> to vector<2x2xf32>
      %560 = vector.shape_cast %557 : vector<2x2xf32> to vector<1x2x2xf32>
      tpu.vector_store %arg15[%c3, %c0_201, %c0_202], %560 {strides = array<i32>} : memref<4x2x2xf32, #tpu.memory_space<vmem>>, vector<1x2x2xf32>,
    } else {
    }
    return
  }
  func.func @transform_0(%arg0: i32) -> (i32, i32) {
    %c0_i32 = arith.constant 0 : i32
    %c0_i32_0 = arith.constant 0 : i32
    return %arg0, %c0_i32 : i32, i32
  }
  func.func @transform_1(%arg0: i32) -> (i32, i32) {
    %c0_i32 = arith.constant 0 : i32
    %c0_i32_0 = arith.constant 0 : i32
    %c0_i32_1 = arith.constant 0 : i32
    return %c0_i32, %c0_i32_0 : i32, i32
  }
  func.func @transform_2(%arg0: i32) -> (i32, i32) {
    %c0_i32 = arith.constant 0 : i32
    %c0_i32_0 = arith.constant 0 : i32
    %c0_i32_1 = arith.constant 0 : i32
    return %c0_i32, %c0_i32_0 : i32, i32
  }
  func.func @transform_3(%arg0: i32) -> (i32, i32) {
    %c0_i32 = arith.constant 0 : i32
    %c0_i32_0 = arith.constant 0 : i32
    %c0_i32_1 = arith.constant 0 : i32
    return %c0_i32, %c0_i32_0 : i32, i32
  }
  func.func @transform_4(%arg0: i32) -> (i32, i32) {
    %c0_i32 = arith.constant 0 : i32
    %c0_i32_0 = arith.constant 0 : i32
    %c0_i32_1 = arith.constant 0 : i32
    return %c0_i32, %c0_i32_0 : i32, i32
  }
  func.func @transform_5(%arg0: i32) -> (i32, i32) {
    %c0_i32 = arith.constant 0 : i32
    %c0_i32_0 = arith.constant 0 : i32
    %c0_i32_1 = arith.constant 0 : i32
    return %c0_i32, %c0_i32_0 : i32, i32
  }
  func.func @transform_6(%arg0: i32) -> (i32, i32) {
    %c0_i32 = arith.constant 0 : i32
    %c0_i32_0 = arith.constant 0 : i32
    %c0_i32_1 = arith.constant 0 : i32
    return %c0_i32, %c0_i32_0 : i32, i32
  }
  func.func @transform_7(%arg0: i32) -> (i32, i32) {
    %c0_i32 = arith.constant 0 : i32
    %c0_i32_0 = arith.constant 0 : i32
    %c0_i32_1 = arith.constant 0 : i32
    return %c0_i32, %c0_i32_0 : i32, i32
  }
  func.func @transform_8(%arg0: i32) -> (i32, i32) {
    %c0_i32 = arith.constant 0 : i32
    %c0_i32_0 = arith.constant 0 : i32
    %c0_i32_1 = arith.constant 0 : i32
    return %c0_i32, %c0_i32_0 : i32, i32
  }
  func.func @transform_9(%arg0: i32) -> (i32, i32) {
    %c0_i32 = arith.constant 0 : i32
    %c0_i32_0 = arith.constant 0 : i32
    %c0_i32_1 = arith.constant 0 : i32
    return %c0_i32, %c0_i32_0 : i32, i32
  }
  func.func @transform_10(%arg0: i32) -> (i32, i32) {
    %c0_i32 = arith.constant 0 : i32
    %c0_i32_0 = arith.constant 0 : i32
    %c0_i32_1 = arith.constant 0 : i32
    return %c0_i32, %c0_i32_0 : i32, i32
  }
  func.func @transform_11(%arg0: i32) -> (i32, i32) {
    %c0_i32 = arith.constant 0 : i32
    %c0_i32_0 = arith.constant 0 : i32
    %c0_i32_1 = arith.constant 0 : i32
    return %c0_i32, %c0_i32_0 : i32, i32
  }
  func.func @transform_12(%arg0: i32) -> (i32, i32) {
    %c0_i32 = arith.constant 0 : i32
    %c0_i32_0 = arith.constant 0 : i32
    %c0_i32_1 = arith.constant 0 : i32
    return %c0_i32, %c0_i32_0 : i32, i32
  }
  func.func @transform_13(%arg0: i32) -> (i32, i32) {
    %c0_i32 = arith.constant 0 : i32
    %c0_i32_0 = arith.constant 0 : i32
    %c0_i32_1 = arith.constant 0 : i32
    return %c0_i32, %c0_i32_0 : i32, i32
  }
  func.func @transform_14(%arg0: i32) -> (i32, i32, i32) {
    %c0_i32 = arith.constant 0 : i32
    %c0_i32_0 = arith.constant 0 : i32
    %c0_i32_1 = arith.constant 0 : i32
    %c0_i32_2 = arith.constant 0 : i32
    return %c0_i32, %c0_i32_0, %c0_i32_1 : i32, i32, i32
  }
}

</mosaic_0001>

<bundles_post_ra>
// kernel: forecast_net_forward.1
= control target key start
LH: loop header
LB: loop body
LE: loop exit
PB: predicated region body
PF: predicated region fallthrough
CT: control target
= control target key end

     0   :  { %19 = vsyncpa [#allocation5], 0  ;;  %s10467_s0 = inlined_call_operand.vmem [shape: f32[16,4], index: 0, kind: input, shape index: {}]   ;;  %s10468_s1 = inlined_call_operand.vmem [shape: f32[4,128], index: 1, kind: input, shape index: {}]   ;;  %s10469_s2 = inlined_call_operand.hbm [shape: f32[32,128], index: 2, kind: input, shape index: {}]   ;;  %s10470_s3 = inlined_call_operand.vmem [shape: f32[1,128], index: 3, kind: input, shape index: {}]   ;;  %s10471_s4 = inlined_call_operand.vmem [shape: f32[64,128], index: 4, kind: input, shape index: {}]   ;;  %s10472_s5 = inlined_call_operand.vmem [shape: f32[1,128], index: 5, kind: input, shape index: {}]   ;;  %s10473_s6 = inlined_call_operand.vmem [shape: f32[2,128], index: 6, kind: input, shape index: {}]   ;;  %s10474_s7 = inlined_call_operand.hbm [shape: f32[32,128], index: 7, kind: input, shape index: {}]   ;;  %s10475_s8 = inlined_call_operand.vmem [shape: f32[1,128], index: 8, kind: input, shape index: {}]   ;;  %s10476_s9 = inlined_call_operand.hbm [shape: f32[64,128], index: 9, kind: input, shape index: {}]   ;;  %s10477_s10 = inlined_call_operand.vmem [shape: f32[1,128], index: 10, kind: input, shape index: {}]   ;;  %s10478_s11 = inlined_call_operand.hbm [shape: f32[32,2], index: 11, kind: input, shape index: {}]   ;;  %s10479_s12 = inlined_call_operand.vmem [shape: f32[1,2], index: 12, kind: input, shape index: {}]   ;;  %s10480_s13 = inlined_call_operand.vmem [shape: f32[2,2], index: 13, kind: input, shape index: {}]   ;;  %s10481_s14 = inlined_call_operand.vmem [shape: f32[4,2,2], index: 14, kind: output, shape index: {}]  }
   0x1   :  { %20 = vsyncpa [#allocation7], 0 }
   0x2   :  { %21 = vsyncpa [#allocation10], 0  ;;  %s51_s15 = sshll.u32 %s10474_s7, 4  ;;  %s8417_s16 = smov [#allocation6]   ;;  %s52_s15 = int_to_ptr.hbm [resolvable:$true] %s51_s15 }
   0x3   :  { %s53_s17 = sshll.u32 %s8417_s16, 4  ;;  %s30_s20 = sshll.u32 %s10469_s2, 4  ;;  %s54_s17 = int_to_ptr.vmem [resolvable:$true] %s53_s17  ;;  %s31_s20 = int_to_ptr.hbm [resolvable:$true] %s30_s20 }
   0x4   :  { %s8418_s21 = smov 128   ;;  %s8419_s22 = smov 8  }
   0x5   :  { %59 = dma.hbm_to_vmem [thread:$0]  %s52_s15, 512, %s54_s17, [#allocation7], %s8418_s21, %s8418_s21, %s8419_s22  }
   0x6   :  { %s8420_s23 = smov [#allocation4]   ;;  %s66_s27 = sshll.u32 %s10476_s9, 4  ;;  %s67_s27 = int_to_ptr.hbm [resolvable:$true] %s66_s27 }
   0x7   :  { %s32_s24 = sshll.u32 %s8420_s23, 4  ;;  %s81_s29 = sshll.u32 %s10478_s11, 4  ;;  %s33_s24 = int_to_ptr.vmem [resolvable:$true] %s32_s24  ;;  %s82_s29 = int_to_ptr.hbm [resolvable:$true] %s81_s29 }
   0x8   :  { %38 = dma.hbm_to_vmem [thread:$0]  %s31_s20, 512, %s33_s24, [#allocation5], %s8418_s21, %s8418_s21, %s8419_s22  }
   0x9   :  { %s8421_s30 = smov [#allocation8]   ;;  %s8422_s2 = smov [#allocation9]  }
   0xa   :  { %s68_s16 = sshll.u32 %s8421_s30, 4  ;;  %s83_s15 = sshll.u32 %s8422_s2, 4  ;;  %s69_s16 = int_to_ptr.vmem [resolvable:$true] %s68_s16  ;;  %s84_s15 = int_to_ptr.vmem [resolvable:$true] %s83_s15 }
   0xb   :  { %74 = dma.hbm_to_vmem [thread:$0]  %s67_s27, 1024, %s69_s16, [#allocation7], %s8418_s21, %s8418_s21, %s8419_s22  }
   0xc   :  { %89 = dma.hbm_to_vmem [thread:$0]  %s82_s29, 512, %s84_s15, [#allocation10], %s8418_s21, %s8418_s21, %s8419_s22  }
   0xd   :  { %8411 = dma.done.wait [#allocation5], 512  }
   0xe   :  { %8412 = vsyncadd [#allocation5], 4294966784 }
   0xf   :  { %8413 = dma.done.wait [#allocation7], 1536  }
  0x10   :  { %8414 = vsyncadd [#allocation7], 4294965760 }
  0x11   :  { %8415 = dma.done.wait [#allocation10], 512  }
  0x12   :  { %8416 = vsyncadd [#allocation10], 4294966784  ;;  %vm114_vm0 = vcmask 254976   ;;  %v8423_v0 = vmov 0.0   ;;  %vm139_vm1 = vcmask 1043456   ;;  %vm132_vm2 = vcmask 31744  }
  0x13   :  { %115 = vst.msk [vmem:[#allocation2] sm:$0x3] %vm114_vm0, %v8423_v0  ;;  %v127_v1 = vld [vmem:[%s10468_s1] sm:$0xf]  ;;  %vm324_vm3 = vcmask 261120   ;;  %v322_v7 = vld [vmem:[#allocation4 + $0x10] sm:$0xff] }
  0x14   :  { %116 = vst.msk [vmem:[#allocation2 + $0x2] sm:$0x3] %vm114_vm0, %v8423_v0  ;;  %v125_v2 = vld [vmem:[%s10467_s0] sm:$0xff]  ;;  %v141_v4 = vsel %vm139_vm1, %v127_v1, 0  ;;  %v126_v8 = vld [vmem:[%s10467_s0 + $0x8] sm:$0xff]  ;;  %v321_v9 = vld [vmem:[#allocation4 + $0x8] sm:$0xff] }
  0x15   :  { %117 = vst.msk [vmem:[#allocation3] sm:$0x3] %vm114_vm0, %v8423_v0  ;;  %v323_v3 = vld [vmem:[#allocation4 + $0x18] sm:$0xff]  ;;  %v134_v5 = vsel %vm132_vm2, %v125_v2, 0  ;;  %v158_v10 = vand.u32 4294901760, %v141_v4  ;;  %v8531_v12 = vand.u32 4294901760, %v322_v7 }
  0x16   :  { %118 = vst.msk [vmem:[#allocation3 + $0x2] sm:$0x3] %vm114_vm0, %v8423_v0  ;;  %v8524_v6 = vand.u32 4294901760, %v323_v3  ;;  %v8529_v11 = vand.u32 4294901760, %v134_v5  ;;  %v137_v13 = vsel %vm132_vm2, %v126_v8, 0  ;;  %v320_v14 = vld [vmem:[#allocation4] sm:$0xff] }
  0x17   :  { %v8536_v16 = vand.u32 4294901760, %v137_v13  ;;  %v8538_v17 = vand.u32 4294901760, %v321_v9  ;;  %v8540_v18 = vand.u32 4294901760, %v320_v14  ;;  %v193_v20 = vsub.f32 %v141_v4, %v158_v10  ;;  %252 = vmatpush.msra.mxu3 %v158_v10  ;;  %159 = vmatpush.msra.mxu0 %v158_v10  ;;  %v8106_v61 = vld [vmem:[%s10470_s3] ss:$0 sm:$0xff]  ;;  %s8424_s21 = smov 64  }
  0x18   :  { %v8534_v15 = vsub.f32 %v323_v3, %v8524_v6  ;;  %v161_v21 = vsub.f32 %v134_v5, %v8529_v11  ;;  %v8544_v22 = vsub.f32 %v322_v7, %v8531_v12  ;;  %s8425_s22 = smov 32   ;;  %vm576_vm8 = vcmask 523264  }
  0x19   :  { %v169_v25 = vsub.f32 %v137_v13, %v8536_v16  ;;  %v8552_v26 = vsub.f32 %v321_v9, %v8538_v17  ;;  %224 = vmatpush.msra.mxu2 %v193_v20  ;;  %v194_v29 = vand.u32 4294901760, %v193_v20  ;;  %v8560_v31 = vsub.f32 %v320_v14, %v8540_v18 }
  0x1a   :  { %v119_v19 = vld [vmem:[#allocation2] sm:$0x3]  ;;  %v8548_v24 = vand.u32 4294901760, %v8534_v15  ;;  %v162_v28 = vand.u32 4294901760, %v161_v21  ;;  %v8557_v30 = vand.u32 4294901760, %v8544_v22  ;;  %227 = vmatmul.f32.vlgmr.msra.gmra.mxu2 %v161_v21 }
  0x1b   :  { %v326_v23 = vsel %vm324_vm3, %v119_v19, 0  ;;  %v170_v33 = vand.u32 4294901760, %v169_v25  ;;  %v8565_v34 = vand.u32 4294901760, %v8552_v26  ;;  %341 = vmatpush.msrb.mxu2 %v8524_v6  ;;  %v195_v37 = vsub.f32 %v193_v20, %v194_v29  ;;  %284 = vmatpush.msrb.mxu0 %v194_v29 }
  0x1c   :  { %v8554_v27 = vand.u32 4294901760, %v326_v23  ;;  %v372_v32 = vsub.f32 %v8534_v15, %v8548_v24  ;;  %256 = vmatmul.f32.vlgmr.msra.gmra.mxu3 %v162_v28  ;;  %v163_v36 = vsub.f32 %v161_v21, %v162_v28  ;;  %v378_v38 = vsub.f32 %v8544_v22, %v8557_v30  ;;  %v122_v29 = vld [vmem:[#allocation3] sm:$0x3] }
  0x1d   :  { %v8572_v39 = vand.u32 4294901760, %v8560_v31  ;;  %v384_v41 = vsub.f32 %v8552_v26, %v8565_v34  ;;  %v196_v43 = vand.u32 4294901760, %v195_v37  ;;  %343 = vmatpush.msrb.mxu2 %v8531_v12  ;;  %v171_v48 = vsub.f32 %v169_v25, %v170_v33 }
  0x1e   :  { %v349_v35 = vsub.f32 %v326_v23, %v8554_v27  ;;  %v8574_v40 = vand.u32 4294901760, %v372_v32  ;;  %v164_v42 = vand.u32 4294901760, %v163_v36  ;;  %v8579_v44 = vand.u32 4294901760, %v378_v38 }
  0x1f   :  { %v390_v45 = vsub.f32 %v8560_v31, %v8572_v39  ;;  %v8584_v46 = vand.u32 4294901760, %v384_v41  ;;  %197 = vmatpush.msra.mxu1 %v196_v43  ;;  %345 = vmatpush.msrb.mxu2 %v8538_v17  ;;  %v172_v51 = vand.u32 4294901760, %v171_v48 }
  0x20   :  { %10535 = vst [vmem:[#allocation14_spill] sm:$0xff] %v8574_v40  ;;  %374 = vmatpush.msrb.mxu3 %v8574_v40  ;;  %v350_v47 = vand.u32 4294901760, %v349_v35  ;;  %165 = vmatmul.f32.vlgmr.msra.gmra.mxu0 %v164_v42 }
  0x21   :  { %10536 = vst [vmem:[#allocation15_spill] sm:$0xff] %v8579_v44  ;;  %199 = vmatmul.f32.vlgmr.msra.gmra.mxu1 %v8529_v11  ;;  %v8588_v49 = vand.u32 4294901760, %v390_v45  ;;  %347 = vmatpush.msrb.mxu2 %v8540_v18 }
  0x22   :  { %10537 = vst [vmem:[#allocation16_spill] sm:$0xff] %v8584_v46  ;;  %380 = vmatpush.msrb.mxu3 %v8579_v44  ;;  %310 = vmatpush.msrb.mxu1 %v158_v10  ;;  %v351_v50 = vsub.f32 %v349_v35, %v350_v47 }
  0x23   :  { %10538 = vst [vmem:[#allocation17_spill] sm:$0xff] %v8588_v49  ;;  %232 = vmatmul.f32.gmra.mxu2 %v169_v25  ;;  %470 = vmatpush.msra.mxu0 %v8548_v24 }
  0x24   :  { %386 = vmatpush.msrb.mxu3 %v8584_v46  ;;  %412 = vmatpush.msra.mxu2 %v8534_v15  ;;  %v352_v52 = vand.u32 4294901760, %v351_v50 }
  0x25   :  { %262 = vmatmul.f32.gmra.mxu3 %v170_v33  ;;  %501 = vmatpush.msra.mxu1 %v8524_v6 }
  0x26   :  { %392 = vmatpush.msrb.mxu3 %v8588_v49  ;;  %415 = vmatpush.msra.mxu2 %v8544_v22 }
  0x27   :  { %474 = vmatpush.msra.mxu0 %v8557_v30  ;;  %503 = vmatpush.msra.mxu1 %v8531_v12 }
  0x28   :  { %441 = vmatpush.msra.mxu3 %v8524_v6  ;;  %173 = vmatmul.f32.gmra.mxu0 %v172_v51 }
  0x29   :  { %203 = vmatmul.f32.gmra.mxu1 %v8536_v16  ;;  %418 = vmatpush.msra.mxu2 %v8552_v26 }
  0x2a   :  { %443 = vmatpush.msra.mxu3 %v8531_v12  ;;  %478 = vmatpush.msra.mxu0 %v8565_v34 }
  0x2b   :  { %353 = vmatmul.f32.vlgmr.msrb.gmra.mxu2 %v352_v52  ;;  %505 = vmatpush.msra.mxu1 %v8538_v17 }
  0x2c   :  { %445 = vmatpush.msra.mxu3 %v8538_v17  ;;  %421 = vmatpush.msra.mxu2 %v8560_v31 }
  0x2d   :  { %394 = vmatmul.f32.vlgmr.msrb.gmra.mxu3 %v8554_v27  ;;  %482 = vmatpush.msra.mxu0 %v8572_v39 }
  0x2e   :  { %447 = vmatpush.msra.mxu3 %v8540_v18  ;;  %507 = vmatpush.msra.mxu1 %v8540_v18 }
  0x30   :  { %286 = vmatmul.f32.vlgmr.msrb.gmra.mxu0 %v8529_v11 }
  0x31   :  { %312 = vmatmul.f32.vlgmr.msrb.gmra.mxu1 %v8529_v11 }
  0x33   :  { %424 = vmatmul.f32.vlgmr.msra.gmra.mxu2 %v349_v35 }
  0x35   :  { %451 = vmatmul.f32.vlgmr.msra.gmra.mxu3 %v350_v47 }
  0x38   :  { %290 = vmatmul.f32.gmra.mxu0 %v8536_v16 }
  0x39   :  { %316 = vmatmul.f32.gmra.mxu1 %v8536_v16 }
  0x40   :  { %484 = vmatmul.f32.vlgmr.msra.gmra.mxu0 %v8554_v27 }
  0x41   :  { %509 = vmatmul.f32.vlgmr.msra.gmra.mxu1 %v8554_v27 }
  0x9d   :  { %v166_v53 = vpop.f32.mrf.mxu0  ;;  %v228_v54 = vpop.f32.mrf.mxu2 }
  0x9e   :  { %v200_v55 = vpop.f32.mrf.mxu1  ;;  %v167_v63 = vadd.f32 %v8106_v61, %v166_v53 }
  0x9f   :  { %v257_v56 = vpop.f32.mrf.mxu3 }
  0xa0   :  { %v201_v3 = vadd.f32 %v200_v55, %v167_v63  ;;  %v570_v63 = vld [vmem:[%s10471_s4 + $0x30] sm:$0xff] }
  0xa2   :  { %v229_v5 = vadd.f32 %v228_v54, %v201_v3 }
  0xa4   :  { %v258_v13 = vadd.f32 %v257_v56, %v229_v5  ;;  %v568_v5 = vld [vmem:[%s10471_s4 + $0x20] sm:$0xff] }
  0xa5   :  { %v8618_v57 = vpop.f32.mrf.mxu0 }
  0xa6   :  { %10539 = vst [vmem:[#allocation18_spill] sm:$0xff] %v8618_v57  ;;  %v8620_v58 = vpop.f32.mrf.mxu2  ;;  %v8622_v59 = vpop.f32.mrf.mxu1 }
  0xa7   :  { %10540 = vst [vmem:[#allocation19_spill] sm:$0xff] %v8620_v58 }
  0xa8   :  { %10541 = vst [vmem:[#allocation20_spill] sm:$0xff] %v8622_v59  ;;  %v8624_v60 = vpop.f32.mrf.mxu3 }
  0xa9   :  { %10542 = vst [vmem:[#allocation21_spill] sm:$0xff] %v8624_v60 }
  0xad   :  { %v287_v62 = vpop.f32.mrf.mxu0 }
  0xae   :  { %v354_v0 = vpop.f32.mrf.mxu2  ;;  %v313_v1 = vpop.f32.mrf.mxu1  ;;  %v288_v14 = vadd.f32 %v287_v62, %v258_v13  ;;  %v571_v62 = vld [vmem:[%s10471_s4 + $0x38] sm:$0xff] }
  0xb0   :  { %v395_v2 = vpop.f32.mrf.mxu3  ;;  %v8633_v23 = vadd.f32 %v313_v1, %v288_v14  ;;  %v8652_v1 = vand.u32 4294901760, %v571_v62 }
  0xb1   :  { %v396_v7 = vadd.f32 %v395_v2, %v354_v0  ;;  %v569_v0 = vld [vmem:[%s10471_s4 + $0x28] sm:$0xff]  ;;  %v8654_v2 = vand.u32 4294901760, %v570_v63 }
  0xb2   :  { %v8656_v3 = vand.u32 4294901760, %v569_v0  ;;  %589 = vmatpush.msrb.mxu2 %v8652_v1  ;;  %721 = vmatpush.msrb.mxu1 %v8652_v1 }
  0xb3   :  { %v8672_v13 = vsub.f32 %v570_v63, %v8654_v2 }
  0xb4   :  { %v8675_v14 = vsub.f32 %v569_v0, %v8656_v3  ;;  %591 = vmatpush.msrb.mxu2 %v8654_v2  ;;  %723 = vmatpush.msrb.mxu1 %v8654_v2 }
  0xb5   :  { %v8629_v4 = vpop.f32.mrf.mxu0 }
  0xb6   :  { %10543 = vst [vmem:[#allocation22_spill] sm:$0xff] %v8629_v4  ;;  %v425_v8 = vpop.f32.mrf.mxu2  ;;  %v8631_v9 = vpop.f32.mrf.mxu1  ;;  %593 = vmatpush.msrb.mxu2 %v8656_v3  ;;  %725 = vmatpush.msrb.mxu1 %v8656_v3 }
  0xb7   :  { %10544 = vst [vmem:[#allocation23_spill] sm:$0xff] %v8631_v9  ;;  %v426_v10 = vadd.f32 %v425_v8, %v396_v7  ;;  %v567_v7 = vld [vmem:[%s10471_s4 + $0x18] sm:$0xff]  ;;  %v8664_v8 = vand.u32 4294901760, %v568_v5 }
  0xb8   :  { %v452_v11 = vpop.f32.mrf.mxu3 }
  0xb9   :  { %v453_v16 = vadd.f32 %v452_v11, %v426_v10  ;;  %v8666_v10 = vand.u32 4294901760, %v567_v7  ;;  %v8669_v11 = vsub.f32 %v571_v62, %v8652_v1  ;;  %595 = vmatpush.msrb.mxu2 %v8664_v8  ;;  %727 = vmatpush.msrb.mxu1 %v8664_v8 }
  0xbb   :  { %684 = vmatpush.msrb.mxu0 %v8669_v11  ;;  %597 = vmatpush.msrb.mxu2 %v8666_v10 }
  0xbc   :  { %729 = vmatpush.msrb.mxu1 %v8666_v10 }
  0xbd   :  { %v485_v19 = vpop.f32.mrf.mxu0  ;;  %687 = vmatpush.msrb.mxu0 %v8672_v13 }
  0xbe   :  { %v486_v20 = vadd.f32 %v485_v19, %v453_v16  ;;  %v510_v21 = vpop.f32.mrf.mxu1  ;;  %v8680_v16 = vsub.f32 %v568_v5, %v8664_v8  ;;  %v8683_v19 = vsub.f32 %v567_v7, %v8666_v10 }
  0xbf   :  { %690 = vmatpush.msrb.mxu0 %v8675_v14 }
  0xc0   :  { %v511_v25 = vadd.f32 %v510_v21, %v486_v20  ;;  %v8686_v20 = vand.u32 4294901760, %v8669_v11  ;;  %v8689_v21 = vand.u32 4294901760, %v8672_v13 }
  0xc1   :  { %693 = vmatpush.msrb.mxu0 %v8680_v16 }
  0xc2   :  { %v513_v27 = vadd.f32 %v511_v25, %v8633_v23  ;;  %10545 = vst [vmem:[#allocation24_spill] sm:$0xff] %v8689_v21  ;;  %v8692_v25 = vand.u32 4294901760, %v8675_v14 }
  0xc3   :  { %696 = vmatpush.msrb.mxu0 %v8683_v19 }
  0xc4   :  { %8120 = vtanh.f32 %v513_v27  ;;  %v8069_v32 = vmul.f32 -1.442695, %v513_v27  ;;  %10546 = vst [vmem:[#allocation25_spill] sm:$0xff] %v8692_v25  ;;  %v8697_v27 = vand.u32 4294901760, %v8680_v16 }
  0xc6   :  { %8122 = vpow2.f32 %v8069_v32  ;;  %10547 = vst [vmem:[#allocation26_spill] sm:$0xff] %v8697_v27  ;;  %v636_v32 = vsub.f32 %v8675_v14, %v8692_v25 }
  0xca   :  { %v8121_v28 = vpop.eup %8120 }
  0xcb   :  { %540 = vrot.lane.b32.xlu0 %v8121_v28, %s8424_s21  ;;  %v624_v28 = vsub.f32 %v8669_v11, %v8686_v20 }
  0xcc   :  { %v8123_v33 = vpop.eup %8122 }
  0xcd   :  { %v517_v35 = vadd.f32 1.0, %v8123_v33  ;;  %v8707_v33 = vand.u32 4294901760, %v8683_v19 }
  0xcf   :  { %8124 = vrcp.f32 %v517_v35  ;;  %v529_v43 = vand.u32 2147483648, %v517_v35  ;;  %vm523_vm5 = vweird.f32 %v517_v35  ;;  %v527_v45 = vand.u32 2147483647, %v517_v35  ;;  %10548 = vst [vmem:[#allocation27_spill] sm:$0xff] %v8707_v33 }
  0xd1   :  { %v530_v48 = vor.u32 1.1754944e-38, %v529_v43  ;;  %vm528_vm7 = vcmp.eq.f32.partialorder %v527_v45, 8.507059e+37 }
  0xd3   :  { %535 = vrot.lane.b32.xlu0 %v122_v29, %s8425_s22  ;;  %v630_v29 = vsub.f32 %v8672_v13, %v8689_v21 }
  0xd5   :  { %v8125_v36 = vpop.eup %8124 }
  0xd6   :  { %v519_v37 = vmul.f32 %v8125_v36, %v517_v35  ;;  %vm524_vm4 = vweird.f32 %v8125_v36  ;;  %v8712_v35 = vand.u32 4294901760, %v624_v28 }
  0xd7   :  { %vm525_vm6 = vmor %vm523_vm5, %vm524_vm4 }
  0xd8   :  { %v520_v38 = vsub.f32 1.0, %v519_v37  ;;  %v642_v37 = vsub.f32 %v8680_v16, %v8697_v27  ;;  %626 = vmatpush.msrb.mxu3 %v8712_v35 }
  0xda   :  { %v521_v41 = vmul.f32 %v8125_v36, %v520_v38  ;;  %v8722_v38 = vand.u32 4294901760, %v636_v32 }
  0xdc   :  { %v522_v42 = vadd.f32 %v8125_v36, %v521_v41  ;;  %v648_v41 = vsub.f32 %v8683_v19, %v8707_v33 }
  0xde   :  { %v526_v47 = vsel %vm525_vm6, %v8125_v36, %v522_v42  ;;  %v8714_v36 = vand.u32 4294901760, %v630_v29  ;;  %v8730_v42 = vand.u32 4294901760, %v642_v37  ;;  %v8734_v43 = vand.u32 4294901760, %v648_v41 }
  0xdf   :  { %v531_v51 = vsel %vm528_vm7, %v530_v48, %v526_v47  ;;  %v121_v48 = vld [vmem:[#allocation2 + $0x2] sm:$0x3] }
  0xe0   :  { %632 = vmatpush.msrb.mxu3 %v8714_v36 }
  0xe2   :  { %638 = vmatpush.msrb.mxu3 %v8722_v38 }
  0xe4   :  { %644 = vmatpush.msrb.mxu3 %v8730_v42 }
  0xe6   :  { %650 = vmatpush.msrb.mxu3 %v8734_v43 }
 0x13d   :  { %v541_v50 = vpop.permute.xlu0 %540 }
 0x13e   :  { %v543_v52 = vmul.f32 %v541_v50, %v531_v51  ;;  %v566_v50 = vld [vmem:[%s10471_s4 + $0x10] sm:$0xff] }
 0x140   :  { %545 = vrot.lane.b32.xlu1 %v543_v52, %s8425_s22  ;;  %v8743_v52 = vand.u32 4294901760, %v566_v50 }
 0x142   :  { %599 = vmatpush.msrb.mxu2 %v8743_v52  ;;  %731 = vmatpush.msrb.mxu1 %v8743_v52 }
 0x145   :  { %v536_v53 = vpop.permute.xlu0 %535 }
 0x146   :  { %v538_v54 = vmul.f32 %v536_v53, %v531_v51  ;;  %v565_v53 = vld [vmem:[%s10471_s4 + $0x8] sm:$0xff] }
 0x1b2   :  { %v546_v55 = vpop.permute.xlu1 %545 }
 0x1b3   :  { %v8639_v56 = vadd.f32 %v546_v55, %v538_v54  ;;  %v8749_v54 = vsub.f32 %v566_v50, %v8743_v52  ;;  %v8751_v55 = vand.u32 4294901760, %v565_v53 }
 0x1b5   :  { %8126 = vtanh.f32 %v8639_v56  ;;  %v8762_v62 = vsub.f32 %v565_v53, %v8751_v55  ;;  %699 = vmatpush.msrb.mxu0 %v8749_v54  ;;  %601 = vmatpush.msrb.mxu2 %v8751_v55  ;;  %v124_v53 = vld [vmem:[#allocation3 + $0x2] sm:$0x3] }
 0x1b6   :  { %733 = vmatpush.msrb.mxu1 %v8751_v55 }
 0x1b7   :  { %v8772_v5 = vand.u32 4294901760, %v8762_v62  ;;  %702 = vmatpush.msrb.mxu0 %v8762_v62 }
 0x1b9   :  { %10550 = vst [vmem:[#allocation29_spill] sm:$0xff] %v8772_v5  ;;  %v660_v29 = vsub.f32 %v8762_v62, %v8772_v5 }
 0x1bb   :  { %v8127_v61 = vpop.eup %8126  ;;  %v8793_v37 = vand.u32 4294901760, %v660_v29 }
 0x1bc   :  { %551 = vrot.lane.b32.xlu1 %v8127_v61, %s8424_s21  ;;  %v8759_v61 = vand.u32 4294901760, %v8749_v54 }
 0x1be   :  { %10549 = vst [vmem:[#allocation28_spill] sm:$0xff] %v8759_v61  ;;  %v654_v0 = vsub.f32 %v8749_v54, %v8759_v61 }
 0x1c0   :  { %v8781_v28 = vand.u32 4294901760, %v654_v0 }
 0x1c2   :  { %656 = vmatpush.msrb.mxu3 %v8781_v28 }
 0x1c4   :  { %662 = vmatpush.msrb.mxu3 %v8793_v37 }
 0x22e   :  { %v552_v45 = vpop.permute.xlu1 %551 }
 0x22f   :  { %v554_v47 = vmul.f32 %v552_v45, %v531_v51  ;;  %v564_v51 = vld [vmem:[%s10471_s4] sm:$0xff] }
 0x230   :  { %v8764_v63 = vand.u32 4294901760, %v564_v51 }
 0x231   :  { %556 = vrot.lane.b32.xlu2 %v554_v47, %s8425_s22 }
 0x232   :  { %v8775_v7 = vsub.f32 %v564_v51, %v8764_v63  ;;  %603 = vmatpush.msrb.mxu2 %v8764_v63  ;;  %735 = vmatpush.msrb.mxu1 %v8764_v63 }
 0x234   :  { %10551 = vst [vmem:[#allocation30_spill] sm:$0xff] %v8775_v7  ;;  %754 = vmatpush.msra.mxu2 %v8686_v20  ;;  %v8786_v32 = vand.u32 4294901760, %v8775_v7  ;;  %705 = vmatpush.msrb.mxu0 %v8775_v7 }
 0x235   :  { %906 = vmatpush.msra.mxu1 %v8574_v40 }
 0x236   :  { %10552 = vst [vmem:[#allocation31_spill] sm:$0xff] %v8786_v32  ;;  %758 = vmatpush.msra.mxu2 %v8689_v21  ;;  %873 = vmatpush.msra.mxu0 %v8524_v6  ;;  %v666_v41 = vsub.f32 %v8775_v7, %v8786_v32 }
 0x237   :  { %912 = vmatpush.msra.mxu1 %v8579_v44 }
 0x238   :  { %762 = vmatpush.msra.mxu2 %v8692_v25  ;;  %875 = vmatpush.msra.mxu0 %v8531_v12  ;;  %v8801_v45 = vand.u32 4294901760, %v666_v41 }
 0x239   :  { %560 = vrot.lane.b32.xlu2 %v121_v48, %s8425_s22  ;;  %918 = vmatpush.msra.mxu1 %v8584_v46 }
 0x23a   :  { %766 = vmatpush.msra.mxu2 %v8697_v27  ;;  %877 = vmatpush.msra.mxu0 %v8538_v17 }
 0x23b   :  { %668 = vmatpush.msrb.mxu3 %v8801_v45  ;;  %924 = vmatpush.msra.mxu1 %v8588_v49 }
 0x23c   :  { %770 = vmatpush.msra.mxu2 %v8707_v33  ;;  %879 = vmatpush.msra.mxu0 %v8540_v18 }
 0x23d   :  { %797 = vmatpush.msra.mxu3 %v8652_v1 }
 0x23e   :  { %774 = vmatpush.msra.mxu2 %v8759_v61 }
 0x23f   :  { %799 = vmatpush.msra.mxu3 %v8654_v2 }
 0x240   :  { %778 = vmatpush.msra.mxu2 %v8772_v5 }
 0x241   :  { %801 = vmatpush.msra.mxu3 %v8656_v3  ;;  %838 = vrot.lane.b32.xlu2 %v124_v53, %s8425_s22 }
 0x242   :  { %782 = vmatpush.msra.mxu2 %v8786_v32 }
 0x243   :  { %803 = vmatpush.msra.mxu3 %v8664_v8 }
 0x245   :  { %805 = vmatpush.msra.mxu3 %v8666_v10 }
 0x247   :  { %807 = vmatpush.msra.mxu3 %v8743_v52 }
 0x249   :  { %809 = vmatpush.msra.mxu3 %v8751_v55 }
 0x24b   :  { %811 = vmatpush.msra.mxu3 %v8764_v63 }
 0x28b   :  { %v557_v47 = vpop.permute.xlu2 %556 }
 0x28c   :  { %v858_v48 = vsel %vm324_vm3, %v557_v47, 0 }
 0x28d   :  { %v880_v50 = vand.u32 4294901760, %v858_v48 }
 0x28f   :  { %v881_v0 = vsub.f32 %v858_v48, %v880_v50 }
 0x291   :  { %v882_v4 = vand.u32 4294901760, %v881_v0 }
 0x293   :  { %v561_v51 = vpop.permute.xlu2 %560  ;;  %v883_v53 = vsub.f32 %v881_v0, %v882_v4 }
 0x294   :  { %v563_v29 = vsel %vm324_vm3, %v557_v47, %v561_v51 }
 0x295   :  { %v578_v41 = vsel %vm576_vm8, %v563_v29, 0  ;;  %v884_v48 = vand.u32 4294901760, %v883_v53 }
 0x296   :  { %v604_v9 = vand.u32 4294901760, %v578_v41 }
 0x298   :  { %v605_v60 = vsub.f32 %v578_v41, %v604_v9  ;;  %670 = vmatmul.f32.vlgmr.msrb.gmra.mxu3 %v604_v9 }
 0x299   :  { %1033 = vmatpush.msrb.mxu3 %v8524_v6 }
 0x29a   :  { %708 = vmatmul.f32.vlgmr.msrb.gmra.mxu0 %v605_v60  ;;  %v606_v58 = vand.u32 4294901760, %v605_v60 }
 0x29b   :  { %944 = vmatpush.msrb.mxu0 %v8534_v15  ;;  %1035 = vmatpush.msrb.mxu3 %v8531_v12 }
 0x29c   :  { %739 = vmatmul.f32.vlgmr.msrb.gmra.mxu1 %v606_v58  ;;  %v607_v59 = vsub.f32 %v605_v60, %v606_v58 }
 0x29d   :  { %947 = vmatpush.msrb.mxu0 %v8544_v22  ;;  %973 = vmatpush.msrb.mxu1 %v8524_v6 }
 0x29e   :  { %v608_v47 = vand.u32 4294901760, %v607_v59  ;;  %1037 = vmatpush.msrb.mxu3 %v8538_v17 }
 0x29f   :  { %950 = vmatpush.msrb.mxu0 %v8552_v26  ;;  %975 = vmatpush.msrb.mxu1 %v8531_v12 }
 0x2a0   :  { %609 = vmatmul.f32.vlgmr.msrb.gmra.mxu2 %v608_v47  ;;  %813 = vmatmul.f32.vlgmr.msra.gmra.mxu3 %v604_v9 }
 0x2a1   :  { %1039 = vmatpush.msrb.mxu3 %v8540_v18  ;;  %1002 = vmatpush.msrb.mxu2 %v8548_v24 }
 0x2a2   :  { %885 = vmatmul.f32.vlgmr.msra.gmra.mxu0 %v884_v48  ;;  %977 = vmatpush.msrb.mxu1 %v8538_v17 }
 0x2a3   :  { %953 = vmatpush.msrb.mxu0 %v8560_v31  ;;  %1006 = vmatpush.msrb.mxu2 %v8557_v30 }
 0x2a4   :  { %926 = vmatmul.f32.vlgmr.msra.gmra.mxu1 %v880_v50  ;;  %1244 = vmatpush.msra.mxu3 %v8652_v1 }
 0x2a5   :  { %1112 = vmatpush.msra.mxu0 %v8652_v1  ;;  %979 = vmatpush.msrb.mxu1 %v8540_v18 }
 0x2a6   :  { %1010 = vmatpush.msrb.mxu2 %v8565_v34  ;;  %1246 = vmatpush.msra.mxu3 %v8654_v2 }
 0x2a7   :  { %1149 = vmatpush.msra.mxu1 %v8712_v35  ;;  %1114 = vmatpush.msra.mxu0 %v8654_v2 }
 0x2a8   :  { %1014 = vmatpush.msrb.mxu2 %v8572_v39  ;;  %1041 = vmatmul.f32.vlgmr.msrb.gmra.mxu3 %v880_v50 }
 0x2a9   :  { %784 = vmatmul.f32.vlgmr.msra.gmra.mxu2 %v604_v9  ;;  %1155 = vmatpush.msra.mxu1 %v8714_v36 }
 0x2aa   :  { %1207 = vmatpush.msra.mxu2 %v8669_v11  ;;  %956 = vmatmul.f32.vlgmr.msrb.gmra.mxu0 %v881_v0 }
 0x2ab   :  { %1161 = vmatpush.msra.mxu1 %v8722_v38  ;;  %1116 = vmatpush.msra.mxu0 %v8656_v3 }
 0x2ac   :  { %1210 = vmatpush.msra.mxu2 %v8672_v13  ;;  %983 = vmatmul.f32.vlgmr.msrb.gmra.mxu1 %v882_v4  ;;  %v8900_v4 = vld [vmem:[%s10472_s5] ss:$0 sm:$0xff] }
 0x2ad   :  { %1167 = vmatpush.msra.mxu1 %v8730_v42  ;;  %1118 = vmatpush.msra.mxu0 %v8664_v8 }
 0x2ae   :  { %1213 = vmatpush.msra.mxu2 %v8675_v14  ;;  %1248 = vmatpush.msra.mxu3 %v8656_v3 }
 0x2af   :  { %1173 = vmatpush.msra.mxu1 %v8734_v43  ;;  %1120 = vmatpush.msra.mxu0 %v8666_v10 }
 0x2b0   :  { %1216 = vmatpush.msra.mxu2 %v8680_v16  ;;  %1250 = vmatpush.msra.mxu3 %v8664_v8 }
 0x2b1   :  { %1016 = vmatmul.f32.vlgmr.msrb.gmra.mxu2 %v880_v50  ;;  %1179 = vmatpush.msra.mxu1 %v8781_v28 }
 0x2b2   :  { %1219 = vmatpush.msra.mxu2 %v8683_v19  ;;  %1122 = vmatpush.msra.mxu0 %v8743_v52 }
 0x2b3   :  { %1185 = vmatpush.msra.mxu1 %v8793_v37  ;;  %1252 = vmatpush.msra.mxu3 %v8666_v10 }
 0x2b4   :  { %1222 = vmatpush.msra.mxu2 %v8749_v54  ;;  %1124 = vmatpush.msra.mxu0 %v8751_v55 }
 0x2b5   :  { %1191 = vmatpush.msra.mxu1 %v8801_v45  ;;  %1254 = vmatpush.msra.mxu3 %v8743_v52 }
 0x2b6   :  { %1225 = vmatpush.msra.mxu2 %v8762_v62  ;;  %1126 = vmatpush.msra.mxu0 %v8764_v63 }
 0x2b7   :  { %1320 = vmatpush.msrb.mxu1 %v8652_v1  ;;  %1256 = vmatpush.msra.mxu3 %v8751_v55 }
 0x2b8   :  { %1228 = vmatpush.msra.mxu2 %v8775_v7  ;;  %1277 = vmatpush.msrb.mxu0 %v8686_v20 }
 0x2b9   :  { %1322 = vmatpush.msrb.mxu1 %v8654_v2  ;;  %1258 = vmatpush.msra.mxu3 %v8764_v63 }
 0x2ba   :  { %1395 = vmatpush.msrb.mxu2 %v8524_v6  ;;  %1281 = vmatpush.msrb.mxu0 %v8689_v21 }
 0x2bb   :  { %1324 = vmatpush.msrb.mxu1 %v8656_v3  ;;  %1428 = vmatpush.msrb.mxu3 %v8574_v40 }
 0x2bc   :  { %1397 = vmatpush.msrb.mxu2 %v8531_v12  ;;  %1285 = vmatpush.msrb.mxu0 %v8692_v25 }
 0x2bd   :  { %1326 = vmatpush.msrb.mxu1 %v8664_v8  ;;  %1434 = vmatpush.msrb.mxu3 %v8579_v44 }
 0x2be   :  { %1399 = vmatpush.msrb.mxu2 %v8538_v17  ;;  %1289 = vmatpush.msrb.mxu0 %v8697_v27 }
 0x2bf   :  { %1328 = vmatpush.msrb.mxu1 %v8666_v10  ;;  %1440 = vmatpush.msrb.mxu3 %v8584_v46 }
 0x2c0   :  { %1401 = vmatpush.msrb.mxu2 %v8540_v18  ;;  %1293 = vmatpush.msrb.mxu0 %v8707_v33 }
 0x2c1   :  { %1330 = vmatpush.msrb.mxu1 %v8743_v52  ;;  %1446 = vmatpush.msrb.mxu3 %v8588_v49 }
 0x2c2   :  { %1297 = vmatpush.msrb.mxu0 %v8759_v61 }
 0x2c3   :  { %1332 = vmatpush.msrb.mxu1 %v8751_v55 }
 0x2c4   :  { %1301 = vmatpush.msrb.mxu0 %v8772_v5 }
 0x2c5   :  { %1334 = vmatpush.msrb.mxu1 %v8764_v63 }
 0x2c6   :  { %1305 = vmatpush.msrb.mxu0 %v8786_v32 }
 0x317   :  { %v709_v58 = vpop.f32.mrf.mxu0 }
 0x319   :  { %v740_v59 = vpop.f32.mrf.mxu1 }
 0x31b   :  { %v671_v60 = vpop.f32.mrf.mxu3 }
 0x31f   :  { %v886_v9 = vpop.f32.mrf.mxu0 }
 0x321   :  { %v927_v0 = vpop.f32.mrf.mxu1 }
 0x322   :  { %v928_v32 = vadd.f32 %v927_v0, %v886_v9 }
 0x323   :  { %v610_v50 = vpop.f32.mrf.mxu2  ;;  %v814_v53 = vpop.f32.mrf.mxu3 }
 0x324   :  { %v611_v51 = vadd.f32 %v8900_v4, %v610_v50 }
 0x326   :  { %v672_v29 = vadd.f32 %v671_v60, %v611_v51 }
 0x327   :  { %v957_v48 = vpop.f32.mrf.mxu0 }
 0x328   :  { %v710_v41 = vadd.f32 %v709_v58, %v672_v29  ;;  %v958_v61 = vadd.f32 %v957_v48, %v928_v32 }
 0x329   :  { %v984_v33 = vpop.f32.mrf.mxu1 }
 0x32a   :  { %v741_v47 = vadd.f32 %v740_v59, %v710_v41  ;;  %v985_v46 = vadd.f32 %v984_v33, %v958_v61 }
 0x32b   :  { %v1042_v25 = vpop.f32.mrf.mxu3 }
 0x32c   :  { %v785_v57 = vpop.f32.mrf.mxu2 }
 0x32d   :  { %v786_v5 = vadd.f32 %v785_v57, %v741_v47 }
 0x32f   :  { %v815_v49 = vadd.f32 %v814_v53, %v786_v5 }
 0x331   :  { %8128 = vtanh.f32 %v815_v49  ;;  %v8070_v57 = vmul.f32 -1.442695, %v815_v49 }
 0x334   :  { %v1017_v27 = vpop.f32.mrf.mxu2 }
 0x335   :  { %v1018_v44 = vadd.f32 %v1017_v27, %v985_v46 }
 0x337   :  { %v8129_v40 = vpop.eup %8128  ;;  %v1043_v21 = vadd.f32 %v1042_v25, %v1018_v44 }
 0x338   :  { %843 = vrot.lane.b32.xlu0 %v8129_v40, %s8424_s21 }
 0x339   :  { %v1046_v60 = vrot.slane %v1043_v21, 6 }
 0x33b   :  { %v1048_v58 = vadd.f32 %v1046_v60, %v8633_v23 }
 0x33d   :  { %8130 = vtanh.f32 %v1048_v58  ;;  %v8071_v32 = vmul.f32 -1.442695, %v1048_v58 }
 0x33e   :  { %8132 = vpow2.f32 %v8070_v57 }
 0x33f   :  { %8134 = vpow2.f32 %v8071_v32 }
 0x343   :  { %v8131_v59 = vpop.eup %8130 }
 0x344   :  { %1074 = vrot.lane.b32.xlu1 %v8131_v59, %s8424_s21  ;;  %v8133_v5 = vpop.eup %8132 }
 0x345   :  { %v820_v9 = vadd.f32 1.0, %v8133_v5  ;;  %v8135_v46 = vpop.eup %8134 }
 0x346   :  { %v1052_v33 = vadd.f32 1.0, %v8135_v46 }
 0x347   :  { %8136 = vrcp.f32 %v820_v9  ;;  %v832_v51 = vand.u32 2147483648, %v820_v9  ;;  %vm826_vm10 = vweird.f32 %v820_v9  ;;  %v830_v49 = vand.u32 2147483647, %v820_v9 }
 0x348   :  { %8138 = vrcp.f32 %v1052_v33  ;;  %v1064_v59 = vand.u32 2147483648, %v1052_v33  ;;  %vm1058_vm14 = vweird.f32 %v1052_v33  ;;  %v1062_v57 = vand.u32 2147483647, %v1052_v33 }
 0x349   :  { %v833_v41 = vor.u32 1.1754944e-38, %v832_v51  ;;  %vm831_vm12 = vcmp.eq.f32.partialorder %v830_v49, 8.507059e+37  ;;  %v1070_v51 = vrot.slane %v8639_v56, 6 }
 0x34a   :  { %v1065_v32 = vor.u32 1.1754944e-38, %v1064_v59  ;;  %vm1063_vm1 = vcmp.eq.f32.partialorder %v1062_v57, 8.507059e+37 }
 0x34d   :  { %v8137_v27 = vpop.eup %8136 }
 0x34e   :  { %v822_v44 = vmul.f32 %v8137_v27, %v820_v9  ;;  %v8139_v25 = vpop.eup %8138  ;;  %vm827_vm9 = vweird.f32 %v8137_v27 }
 0x34f   :  { %v1054_v50 = vmul.f32 %v8139_v25, %v1052_v33  ;;  %vm828_vm11 = vmor %vm826_vm10, %vm827_vm9  ;;  %vm1059_vm13 = vweird.f32 %v8139_v25 }
 0x350   :  { %v823_v40 = vsub.f32 1.0, %v822_v44  ;;  %vm1060_vm15 = vmor %vm1058_vm14, %vm1059_vm13  ;;  %v839_v44 = vpop.permute.xlu2 %838 }
 0x351   :  { %v1055_v29 = vsub.f32 1.0, %v1054_v50 }
 0x352   :  { %v824_v21 = vmul.f32 %v8137_v27, %v823_v40 }
 0x353   :  { %v1056_v60 = vmul.f32 %v8139_v25, %v1055_v29 }
 0x354   :  { %v825_v61 = vadd.f32 %v8137_v27, %v824_v21 }
 0x355   :  { %v1057_v58 = vadd.f32 %v8139_v25, %v1056_v60 }
 0x356   :  { %v829_v0 = vsel %vm828_vm11, %v8137_v27, %v825_v61 }
 0x357   :  { %v834_v53 = vsel %vm831_vm12, %v833_v41, %v829_v0  ;;  %v1061_v5 = vsel %vm1060_vm15, %v8139_v25, %v1057_v58 }
 0x358   :  { %v1066_v46 = vsel %vm1063_vm1, %v1065_v32, %v1061_v5  ;;  %v841_v40 = vmul.f32 %v839_v44, %v834_v53 }
 0x359   :  { %v1072_v33 = vmul.f32 %v1070_v51, %v1066_v46 }
 0x3aa   :  { %v844_v47 = vpop.permute.xlu0 %843 }
 0x3ab   :  { %v846_v48 = vmul.f32 %v844_v47, %v834_v53 }
 0x3ad   :  { %848 = vrot.lane.b32.xlu0 %v846_v48, %s8425_s22 }
 0x3b6   :  { %v1075_v9 = vpop.permute.xlu1 %1074 }
 0x3b7   :  { %v1077_v27 = vmul.f32 %v1075_v9, %v1066_v46 }
 0x3b9   :  { %1079 = vrot.lane.b32.xlu1 %v1077_v27, %s8425_s22 }
 0x41f   :  { %v849_v21 = vpop.permute.xlu0 %848 }
 0x420   :  { %v8908_v61 = vadd.f32 %v849_v21, %v841_v40 }
 0x422   :  { %8140 = vtanh.f32 %v8908_v61 }
 0x428   :  { %v8141_v50 = vpop.eup %8140 }
 0x429   :  { %854 = vrot.lane.b32.xlu2 %v8141_v50, %s8424_s21 }
 0x42b   :  { %v1080_v25 = vpop.permute.xlu1 %1079 }
 0x42c   :  { %v8913_v49 = vadd.f32 %v1080_v25, %v1072_v33 }
 0x42e   :  { %8142 = vtanh.f32 %v8913_v49 }
 0x434   :  { %v8143_v0 = vpop.eup %8142 }
 0x435   :  { %1085 = vrot.lane.b32.xlu0 %v8143_v0, %s8424_s21 }
 0x483   :  { %v855_v29 = vpop.permute.xlu2 %854 }
 0x484   :  { %v857_v41 = vmul.f32 %v855_v29, %v834_v53  ;;  %v10553_v29 = vld [vmem:[#allocation24_spill] sm:$0xff] }
 0x486   :  { %v1094_v47 = vrot.slane %v857_v41, 6  ;;  %v10554_v41 = vld [vmem:[#allocation14_spill] sm:$0xff] }
 0x488   :  { %1095 = vrot.lane.b32.xlu2 %v1094_v47, %s8424_s21  ;;  %v10555_v47 = vld [vmem:[#allocation25_spill] sm:$0xff] }
 0x4a7   :  { %v1086_v48 = vpop.permute.xlu0 %1085 }
 0x4a8   :  { %v1088_v60 = vmul.f32 %v1086_v48, %v1066_v46  ;;  %v10556_v48 = vld [vmem:[#allocation15_spill] sm:$0xff] }
 0x4aa   :  { %v1377_v58 = vrot.slane %v1088_v60, 2  ;;  %1090 = vrot.lane.b32.xlu1 %v1088_v60, %s8425_s22  ;;  %v10557_v60 = vld [vmem:[#allocation26_spill] sm:$0xff] }
 0x4ac   :  { %1378 = vrot.lane.b32.xlu0 %v1377_v58, %s8425_s22  ;;  %v10558_v58 = vld [vmem:[#allocation16_spill] sm:$0xff] }
 0x4e2   :  { %v1096_v56 = vpop.permute.xlu2 %1095 }
 0x51c   :  { %v1091_v59 = vpop.permute.xlu1 %1090 }
 0x51d   :  { %v1098_v57 = vsel %vm324_vm3, %v1091_v59, %v1096_v56  ;;  %v10559_v56 = vld [vmem:[#allocation27_spill] sm:$0xff]  ;;  %v10560_v59 = vld [vmem:[#allocation17_spill] sm:$0xff] }
 0x51e   :  { %v1100_v5 = vrot.slane %v1098_v57, 2  ;;  %v1379_v32 = vpop.permute.xlu0 %1378  ;;  %v10561_v57 = vld [vmem:[#allocation28_spill] sm:$0xff] }
 0x51f   :  { %v1380_v9 = vsel %vm324_vm3, %v1379_v32, 0  ;;  %v10563_v32 = vld [vmem:[#allocation31_spill] sm:$0xff] }
 0x520   :  { %v1101_v53 = vsel %vm576_vm8, %v1100_v5, 0  ;;  %v1402_v27 = vand.u32 4294901760, %v1380_v9  ;;  %v10562_v5 = vld [vmem:[#allocation29_spill] sm:$0xff] }
 0x521   :  { %v1127_v44 = vand.u32 4294901760, %v1101_v53 }
 0x522   :  { %v1403_v40 = vsub.f32 %v1380_v9, %v1402_v27 }
 0x523   :  { %v1128_v21 = vsub.f32 %v1101_v53, %v1127_v44  ;;  %1193 = vmatmul.f32.vlgmr.msra.gmra.mxu1 %v1127_v44 }
 0x524   :  { %v1404_v46 = vand.u32 4294901760, %v1403_v40  ;;  %1555 = vmatpush.msra.mxu1 %v8524_v6 }
 0x525   :  { %1231 = vmatmul.f32.vlgmr.msra.gmra.mxu2 %v1128_v21  ;;  %v1129_v50 = vand.u32 4294901760, %v1128_v21 }
 0x526   :  { %1466 = vmatpush.msra.mxu2 %v8534_v15  ;;  %1557 = vmatpush.msra.mxu1 %v8531_v12  ;;  %v1405_v51 = vsub.f32 %v1403_v40, %v1404_v46 }
 0x527   :  { %1262 = vmatmul.f32.vlgmr.msra.gmra.mxu3 %v1129_v50  ;;  %v1130_v33 = vsub.f32 %v1128_v21, %v1129_v50 }
 0x528   :  { %1469 = vmatpush.msra.mxu2 %v8544_v22  ;;  %1495 = vmatpush.msra.mxu3 %v8524_v6  ;;  %v1406_v0 = vand.u32 4294901760, %v1405_v51 }
 0x529   :  { %v1131_v25 = vand.u32 4294901760, %v1130_v33  ;;  %1559 = vmatpush.msra.mxu1 %v8538_v17 }
 0x52a   :  { %1472 = vmatpush.msra.mxu2 %v8552_v26  ;;  %1497 = vmatpush.msra.mxu3 %v8531_v12 }
 0x52b   :  { %1132 = vmatmul.f32.vlgmr.msra.gmra.mxu0 %v1131_v25  ;;  %1336 = vmatmul.f32.vlgmr.msrb.gmra.mxu1 %v1127_v44 }
 0x52c   :  { %1561 = vmatpush.msra.mxu1 %v8540_v18  ;;  %1475 = vmatpush.msra.mxu2 %v8560_v31 }
 0x52d   :  { %1407 = vmatmul.f32.vlgmr.msrb.gmra.mxu2 %v1406_v0  ;;  %1499 = vmatpush.msra.mxu3 %v8538_v17 }
 0x52e   :  { %1524 = vmatpush.msra.mxu0 %v8548_v24  ;;  %1634 = vmatpush.msrb.mxu2 %v8652_v1 }
 0x52f   :  { %1448 = vmatmul.f32.vlgmr.msrb.gmra.mxu3 %v1402_v27  ;;  %1766 = vmatpush.msrb.mxu1 %v8652_v1 }
 0x530   :  { %1501 = vmatpush.msra.mxu3 %v8540_v18  ;;  %1528 = vmatpush.msra.mxu0 %v8557_v30 }
 0x531   :  { %1636 = vmatpush.msrb.mxu2 %v8654_v2  ;;  %1768 = vmatpush.msrb.mxu1 %v8654_v2 }
 0x532   :  { %1671 = vmatpush.msrb.mxu3 %v8712_v35  ;;  %1532 = vmatpush.msra.mxu0 %v8565_v34 }
 0x533   :  { %1307 = vmatmul.f32.vlgmr.msrb.gmra.mxu0 %v1127_v44  ;;  %1563 = vmatmul.f32.vlgmr.msra.gmra.mxu1 %v1402_v27 }
 0x534   :  { %1536 = vmatpush.msra.mxu0 %v8572_v39  ;;  %1677 = vmatpush.msrb.mxu3 %v8714_v36 }
 0x535   :  { %1478 = vmatmul.f32.vlgmr.msra.gmra.mxu2 %v1403_v40  ;;  %1770 = vmatpush.msrb.mxu1 %v8656_v3 }
 0x536   :  { %1729 = vmatpush.msrb.mxu0 %v8669_v11  ;;  %1683 = vmatpush.msrb.mxu3 %v8722_v38 }
 0x537   :  { %1638 = vmatpush.msrb.mxu2 %v8656_v3  ;;  %1505 = vmatmul.f32.vlgmr.msra.gmra.mxu3 %v1404_v46 }
 0x538   :  { %1732 = vmatpush.msrb.mxu0 %v8672_v13  ;;  %1689 = vmatpush.msrb.mxu3 %v8730_v42 }
 0x539   :  { %1640 = vmatpush.msrb.mxu2 %v8664_v8  ;;  %1772 = vmatpush.msrb.mxu1 %v8664_v8 }
 0x53a   :  { %1735 = vmatpush.msrb.mxu0 %v8675_v14  ;;  %1695 = vmatpush.msrb.mxu3 %v8734_v43 }
 0x53b   :  { %1642 = vmatpush.msrb.mxu2 %v8666_v10  ;;  %1538 = vmatmul.f32.vlgmr.msra.gmra.mxu0 %v1402_v27 }
 0x53c   :  { %1701 = vmatpush.msrb.mxu3 %v8781_v28  ;;  %1738 = vmatpush.msrb.mxu0 %v8680_v16 }
 0x53d   :  { %1644 = vmatpush.msrb.mxu2 %v8743_v52  ;;  %1774 = vmatpush.msrb.mxu1 %v8666_v10 }
 0x53e   :  { %1707 = vmatpush.msrb.mxu3 %v8793_v37  ;;  %1741 = vmatpush.msrb.mxu0 %v8683_v19 }
 0x53f   :  { %1646 = vmatpush.msrb.mxu2 %v8751_v55  ;;  %1776 = vmatpush.msrb.mxu1 %v8743_v52 }
 0x540   :  { %1713 = vmatpush.msrb.mxu3 %v8801_v45  ;;  %1744 = vmatpush.msrb.mxu0 %v8749_v54 }
 0x541   :  { %1648 = vmatpush.msrb.mxu2 %v8764_v63  ;;  %1778 = vmatpush.msrb.mxu1 %v8751_v55 }
 0x542   :  { %1842 = vmatpush.msra.mxu3 %v8652_v1  ;;  %1747 = vmatpush.msrb.mxu0 %v8762_v62 }
 0x543   :  { %1799 = vmatpush.msra.mxu2 %v8686_v20  ;;  %1780 = vmatpush.msrb.mxu1 %v8764_v63 }
 0x544   :  { %1844 = vmatpush.msra.mxu3 %v8654_v2  ;;  %1750 = vmatpush.msrb.mxu0 %v8775_v7 }
 0x545   :  { %1803 = vmatpush.msra.mxu2 %v10553_v29  ;;  %1950 = vmatpush.msra.mxu1 %v10554_v41 }
 0x546   :  { %1846 = vmatpush.msra.mxu3 %v8656_v3  ;;  %1917 = vmatpush.msra.mxu0 %v8524_v6 }
 0x547   :  { %1807 = vmatpush.msra.mxu2 %v10555_v47  ;;  %1956 = vmatpush.msra.mxu1 %v10556_v48 }
 0x548   :  { %1848 = vmatpush.msra.mxu3 %v8664_v8  ;;  %1919 = vmatpush.msra.mxu0 %v8531_v12 }
 0x549   :  { %1811 = vmatpush.msra.mxu2 %v10557_v60  ;;  %1962 = vmatpush.msra.mxu1 %v10558_v58 }
 0x54a   :  { %1850 = vmatpush.msra.mxu3 %v8666_v10  ;;  %1921 = vmatpush.msra.mxu0 %v8538_v17 }
 0x54b   :  { %1815 = vmatpush.msra.mxu2 %v10559_v56  ;;  %1968 = vmatpush.msra.mxu1 %v10560_v59 }
 0x54c   :  { %1852 = vmatpush.msra.mxu3 %v8743_v52  ;;  %1923 = vmatpush.msra.mxu0 %v8540_v18 }
 0x54d   :  { %1819 = vmatpush.msra.mxu2 %v10561_v57 }
 0x54e   :  { %1854 = vmatpush.msra.mxu3 %v8751_v55 }
 0x54f   :  { %1823 = vmatpush.msra.mxu2 %v10562_v5 }
 0x550   :  { %1856 = vmatpush.msra.mxu3 %v8764_v63 }
 0x551   :  { %1827 = vmatpush.msra.mxu2 %v10563_v32 }
 0x5a0   :  { %v1194_v9 = vpop.f32.mrf.mxu1 }
 0x5a8   :  { %v1133_v53 = vpop.f32.mrf.mxu0  ;;  %v1232_v27 = vpop.f32.mrf.mxu2 }
 0x5a9   :  { %v1134_v44 = vadd.f32 %v8900_v4, %v1133_v53  ;;  %v1337_v0 = vpop.f32.mrf.mxu1 }
 0x5aa   :  { %v1263_v40 = vpop.f32.mrf.mxu3 }
 0x5ab   :  { %v1195_v21 = vadd.f32 %v1194_v9, %v1134_v44 }
 0x5ad   :  { %v1233_v46 = vadd.f32 %v1232_v27, %v1195_v21 }
 0x5af   :  { %v1264_v50 = vadd.f32 %v1263_v40, %v1233_v46 }
 0x5b0   :  { %v1308_v51 = vpop.f32.mrf.mxu0  ;;  %v1408_v33 = vpop.f32.mrf.mxu2 }
 0x5b1   :  { %v1309_v25 = vadd.f32 %v1308_v51, %v1264_v50  ;;  %v1564_v9 = vpop.f32.mrf.mxu1 }
 0x5b2   :  { %v1449_v57 = vpop.f32.mrf.mxu3 }
 0x5b3   :  { %v1338_v59 = vadd.f32 %v1337_v0, %v1309_v25  ;;  %v1450_v56 = vadd.f32 %v1449_v57, %v1408_v33 }
 0x5b5   :  { %8144 = vtanh.f32 %v1338_v59  ;;  %v8072_v57 = vmul.f32 -1.442695, %v1338_v59 }
 0x5b8   :  { %v1479_v5 = vpop.f32.mrf.mxu2  ;;  %v1539_v47 = vpop.f32.mrf.mxu0 }
 0x5b9   :  { %v1480_v58 = vadd.f32 %v1479_v5, %v1450_v56 }
 0x5ba   :  { %v1506_v32 = vpop.f32.mrf.mxu3 }
 0x5bb   :  { %v8145_v60 = vpop.eup %8144  ;;  %v1507_v48 = vadd.f32 %v1506_v32, %v1480_v58 }
 0x5bc   :  { %1362 = vrot.lane.b32.xlu1 %v8145_v60, %s8424_s21 }
 0x5bd   :  { %v1540_v53 = vadd.f32 %v1539_v47, %v1507_v48 }
 0x5bf   :  { %v1565_v27 = vadd.f32 %v1564_v9, %v1540_v53 }
 0x5c1   :  { %v1568_v44 = vrot.slane %v1565_v27, 4 }
 0x5c3   :  { %v1570_v40 = vadd.f32 %v1568_v44, %v8633_v23 }
 0x5c5   :  { %8146 = vtanh.f32 %v1570_v40  ;;  %v8073_v46 = vmul.f32 -1.442695, %v1570_v40 }
 0x5c7   :  { %8148 = vpow2.f32 %v8073_v46 }
 0x5c8   :  { %8150 = vpow2.f32 %v8072_v57 }
 0x5cb   :  { %v8147_v21 = vpop.eup %8146 }
 0x5cc   :  { %1596 = vrot.lane.b32.xlu2 %v8147_v21, %s8424_s21 }
 0x5cd   :  { %v8149_v56 = vpop.eup %8148 }
 0x5ce   :  { %v1574_v5 = vadd.f32 1.0, %v8149_v56  ;;  %v8151_v58 = vpop.eup %8150 }
 0x5cf   :  { %v1343_v32 = vadd.f32 1.0, %v8151_v58 }
 0x5d0   :  { %8152 = vrcp.f32 %v1574_v5  ;;  %v1586_v53 = vand.u32 2147483648, %v1574_v5  ;;  %vm1580_vm4 = vweird.f32 %v1574_v5  ;;  %v1584_v9 = vand.u32 2147483647, %v1574_v5 }
 0x5d1   :  { %8154 = vrcp.f32 %v1343_v32  ;;  %v1355_v56 = vand.u32 2147483648, %v1343_v32  ;;  %vm1349_vm9 = vweird.f32 %v1343_v32  ;;  %v1353_v58 = vand.u32 2147483647, %v1343_v32 }
 0x5d2   :  { %v1587_v44 = vor.u32 1.1754944e-38, %v1586_v53  ;;  %vm1585_vm6 = vcmp.eq.f32.partialorder %v1584_v9, 8.507059e+37 }
 0x5d3   :  { %vm1354_vm11 = vcmp.eq.f32.partialorder %v1353_v58, 8.507059e+37 }
 0x5d6   :  { %v8153_v60 = vpop.eup %8152 }
 0x5d7   :  { %v1576_v47 = vmul.f32 %v8153_v60, %v1574_v5  ;;  %v8155_v50 = vpop.eup %8154  ;;  %vm1581_vm2 = vweird.f32 %v8153_v60 }
 0x5d8   :  { %v1345_v33 = vmul.f32 %v8155_v50, %v1343_v32  ;;  %vm1582_vm5 = vmor %vm1580_vm4, %vm1581_vm2  ;;  %vm1350_vm7 = vweird.f32 %v8155_v50 }
 0x5d9   :  { %v1577_v48 = vsub.f32 1.0, %v1576_v47  ;;  %vm1351_vm10 = vmor %vm1349_vm9, %vm1350_vm7 }
 0x5da   :  { %v1346_v0 = vsub.f32 1.0, %v1345_v33  ;;  %v1592_v33 = vrot.slane %v8913_v49, 6 }
 0x5db   :  { %v1578_v51 = vmul.f32 %v8153_v60, %v1577_v48  ;;  %v1356_v48 = vor.u32 1.1754944e-38, %v1355_v56 }
 0x5dc   :  { %v1347_v27 = vmul.f32 %v8155_v50, %v1346_v0 }
 0x5dd   :  { %v1579_v25 = vadd.f32 %v8153_v60, %v1578_v51 }
 0x5de   :  { %v1348_v57 = vadd.f32 %v8155_v50, %v1347_v27 }
 0x5df   :  { %v1583_v59 = vsel %vm1582_vm5, %v8153_v60, %v1579_v25 }
 0x5e0   :  { %v1588_v21 = vsel %vm1585_vm6, %v1587_v44, %v1583_v59  ;;  %v1352_v47 = vsel %vm1351_vm10, %v8155_v50, %v1348_v57 }
 0x5e1   :  { %v1357_v51 = vsel %vm1354_vm11, %v1356_v48, %v1352_v47  ;;  %v1594_v25 = vmul.f32 %v1592_v33, %v1588_v21 }
 0x5e2   :  { %v1360_v9 = vmul.f32 %v1357_v51, %v8908_v61 }
 0x626   :  { %v1597_v40 = vpop.permute.xlu2 %1596 }
 0x627   :  { %v1599_v46 = vmul.f32 %v1597_v40, %v1588_v21 }
 0x629   :  { %1601 = vrot.lane.b32.xlu1 %v1599_v46, %s8425_s22 }
 0x62e   :  { %v1363_v5 = vpop.permute.xlu1 %1362 }
 0x62f   :  { %v1365_v60 = vmul.f32 %v1363_v5, %v1357_v51 }
 0x631   :  { %1367 = vrot.lane.b32.xlu0 %v1365_v60, %s8425_s22 }
 0x69b   :  { %v1602_v0 = vpop.permute.xlu1 %1601 }
 0x69c   :  { %v9002_v53 = vadd.f32 %v1602_v0, %v1594_v25 }
 0x69e   :  { %8156 = vtanh.f32 %v9002_v53 }
 0x6a3   :  { %v1368_v32 = vpop.permute.xlu0 %1367 }
 0x6a4   :  { %v8157_v59 = vpop.eup %8156  ;;  %v9006_v50 = vadd.f32 %v1368_v32, %v1360_v9 }
 0x6a5   :  { %1607 = vrot.lane.b32.xlu0 %v8157_v59, %s8424_s21 }
 0x6a6   :  { %8158 = vtanh.f32 %v9006_v50 }
 0x6ac   :  { %v8159_v27 = vpop.eup %8158 }
 0x6ad   :  { %1373 = vrot.lane.b32.xlu2 %v8159_v27, %s8424_s21 }
 0x707   :  { %v1374_v49 = vpop.permute.xlu2 %1373 }
 0x708   :  { %v1376_v44 = vmul.f32 %v1374_v49, %v1357_v51 }
 0x70a   :  { %v1616_v40 = vrot.slane %v1376_v44, 4 }
 0x70c   :  { %1617 = vrot.lane.b32.xlu2 %v1616_v40, %s8424_s21  ;;  %v10564_v40 = vld [vmem:[#allocation25_spill] sm:$0xff] }
 0x717   :  { %v1608_v46 = vpop.permute.xlu0 %1607 }
 0x718   :  { %v1610_v57 = vmul.f32 %v1608_v46, %v1588_v21  ;;  %v10565_v46 = vld [vmem:[#allocation15_spill] sm:$0xff] }
 0x71a   :  { %v1899_v56 = vrot.slane %v1610_v57, 4  ;;  %1612 = vrot.lane.b32.xlu1 %v1610_v57, %s8425_s22  ;;  %v10566_v57 = vld [vmem:[#allocation26_spill] sm:$0xff] }
 0x71c   :  { %1900 = vrot.lane.b32.xlu0 %v1899_v56, %s8425_s22  ;;  %v10567_v56 = vld [vmem:[#allocation16_spill] sm:$0xff] }
 0x766   :  { %v1618_v61 = vpop.permute.xlu2 %1617 }
 0x78c   :  { %v1613_v58 = vpop.permute.xlu1 %1612 }
 0x78d   :  { %v1620_v47 = vsel %vm324_vm3, %v1613_v58, %v1618_v61  ;;  %v10568_v61 = vld [vmem:[#allocation27_spill] sm:$0xff]  ;;  %v10569_v58 = vld [vmem:[#allocation17_spill] sm:$0xff] }
 0x78e   :  { %v1622_v48 = vrot.slane %v1620_v47, 4  ;;  %v1901_v5 = vpop.permute.xlu0 %1900  ;;  %v10570_v47 = vld [vmem:[#allocation28_spill] sm:$0xff] }
 0x78f   :  { %v1902_v60 = vsel %vm324_vm3, %v1901_v5, 0  ;;  %v10572_v5 = vld [vmem:[#allocation31_spill] sm:$0xff] }
 0x790   :  { %v1623_v51 = vsel %vm576_vm8, %v1622_v48, 0  ;;  %v1924_v33 = vand.u32 4294901760, %v1902_v60  ;;  %v10571_v48 = vld [vmem:[#allocation29_spill] sm:$0xff] }
 0x791   :  { %v1649_v25 = vand.u32 4294901760, %v1623_v51 }
 0x792   :  { %v1925_v0 = vsub.f32 %v1902_v60, %v1924_v33 }
 0x793   :  { %v1650_v9 = vsub.f32 %v1623_v51, %v1649_v25  ;;  %1715 = vmatmul.f32.vlgmr.msrb.gmra.mxu3 %v1649_v25 }
 0x794   :  { %v1926_v21 = vand.u32 4294901760, %v1925_v0  ;;  %2077 = vmatpush.msrb.mxu3 %v8524_v6 }
 0x795   :  { %1753 = vmatmul.f32.vlgmr.msrb.gmra.mxu0 %v1650_v9  ;;  %v1651_v32 = vand.u32 4294901760, %v1650_v9 }
 0x796   :  { %1988 = vmatpush.msrb.mxu0 %v8534_v15  ;;  %2079 = vmatpush.msrb.mxu3 %v8531_v12  ;;  %v1927_v59 = vsub.f32 %v1925_v0, %v1926_v21 }
 0x797   :  { %1784 = vmatmul.f32.vlgmr.msrb.gmra.mxu1 %v1651_v32  ;;  %v1652_v27 = vsub.f32 %v1650_v9, %v1651_v32 }
 0x798   :  { %1991 = vmatpush.msrb.mxu0 %v8544_v22  ;;  %2017 = vmatpush.msrb.mxu1 %v8524_v6  ;;  %v1928_v44 = vand.u32 4294901760, %v1927_v59 }
 0x799   :  { %v1653_v49 = vand.u32 4294901760, %v1652_v27  ;;  %2081 = vmatpush.msrb.mxu3 %v8538_v17 }
 0x79a   :  { %1994 = vmatpush.msrb.mxu0 %v8552_v26  ;;  %2019 = vmatpush.msrb.mxu1 %v8531_v12 }
 0x79b   :  { %1654 = vmatmul.f32.vlgmr.msrb.gmra.mxu2 %v1653_v49  ;;  %1858 = vmatmul.f32.vlgmr.msra.gmra.mxu3 %v1649_v25 }
 0x79c   :  { %2083 = vmatpush.msrb.mxu3 %v8540_v18  ;;  %2046 = vmatpush.msrb.mxu2 %v8548_v24 }
 0x79d   :  { %1929 = vmatmul.f32.vlgmr.msra.gmra.mxu0 %v1928_v44  ;;  %2021 = vmatpush.msrb.mxu1 %v8538_v17 }
 0x79e   :  { %1997 = vmatpush.msrb.mxu0 %v8560_v31  ;;  %2050 = vmatpush.msrb.mxu2 %v8557_v30 }
 0x79f   :  { %1970 = vmatmul.f32.vlgmr.msra.gmra.mxu1 %v1924_v33  ;;  %2288 = vmatpush.msra.mxu3 %v8652_v1 }
 0x7a0   :  { %2156 = vmatpush.msra.mxu0 %v8652_v1  ;;  %2023 = vmatpush.msrb.mxu1 %v8540_v18 }
 0x7a1   :  { %2054 = vmatpush.msrb.mxu2 %v8565_v34  ;;  %2290 = vmatpush.msra.mxu3 %v8654_v2 }
 0x7a2   :  { %2193 = vmatpush.msra.mxu1 %v8712_v35  ;;  %2158 = vmatpush.msra.mxu0 %v8654_v2 }
 0x7a3   :  { %2058 = vmatpush.msrb.mxu2 %v8572_v39  ;;  %2085 = vmatmul.f32.vlgmr.msrb.gmra.mxu3 %v1924_v33 }
 0x7a4   :  { %1829 = vmatmul.f32.vlgmr.msra.gmra.mxu2 %v1649_v25  ;;  %2199 = vmatpush.msra.mxu1 %v8714_v36 }
 0x7a5   :  { %2251 = vmatpush.msra.mxu2 %v8669_v11  ;;  %2000 = vmatmul.f32.vlgmr.msrb.gmra.mxu0 %v1925_v0 }
 0x7a6   :  { %2205 = vmatpush.msra.mxu1 %v8722_v38  ;;  %2160 = vmatpush.msra.mxu0 %v8656_v3 }
 0x7a7   :  { %2254 = vmatpush.msra.mxu2 %v8672_v13  ;;  %2027 = vmatmul.f32.vlgmr.msrb.gmra.mxu1 %v1926_v21 }
 0x7a8   :  { %2211 = vmatpush.msra.mxu1 %v8730_v42  ;;  %2162 = vmatpush.msra.mxu0 %v8664_v8 }
 0x7a9   :  { %2257 = vmatpush.msra.mxu2 %v8675_v14  ;;  %2292 = vmatpush.msra.mxu3 %v8656_v3 }
 0x7aa   :  { %2217 = vmatpush.msra.mxu1 %v8734_v43  ;;  %2164 = vmatpush.msra.mxu0 %v8666_v10 }
 0x7ab   :  { %2260 = vmatpush.msra.mxu2 %v8680_v16  ;;  %2294 = vmatpush.msra.mxu3 %v8664_v8 }
 0x7ac   :  { %2060 = vmatmul.f32.vlgmr.msrb.gmra.mxu2 %v1924_v33  ;;  %2223 = vmatpush.msra.mxu1 %v8781_v28 }
 0x7ad   :  { %2263 = vmatpush.msra.mxu2 %v8683_v19  ;;  %2166 = vmatpush.msra.mxu0 %v8743_v52 }
 0x7ae   :  { %2229 = vmatpush.msra.mxu1 %v8793_v37  ;;  %2296 = vmatpush.msra.mxu3 %v8666_v10 }
 0x7af   :  { %2266 = vmatpush.msra.mxu2 %v8749_v54  ;;  %2168 = vmatpush.msra.mxu0 %v8751_v55 }
 0x7b0   :  { %2235 = vmatpush.msra.mxu1 %v8801_v45  ;;  %2298 = vmatpush.msra.mxu3 %v8743_v52 }
 0x7b1   :  { %2269 = vmatpush.msra.mxu2 %v8762_v62  ;;  %2170 = vmatpush.msra.mxu0 %v8764_v63 }
 0x7b2   :  { %2364 = vmatpush.msrb.mxu1 %v8652_v1  ;;  %2300 = vmatpush.msra.mxu3 %v8751_v55 }
 0x7b3   :  { %2272 = vmatpush.msra.mxu2 %v8775_v7  ;;  %2321 = vmatpush.msrb.mxu0 %v8686_v20 }
 0x7b4   :  { %2366 = vmatpush.msrb.mxu1 %v8654_v2  ;;  %2302 = vmatpush.msra.mxu3 %v8764_v63 }
 0x7b5   :  { %2439 = vmatpush.msrb.mxu2 %v8524_v6  ;;  %2325 = vmatpush.msrb.mxu0 %v10553_v29 }
 0x7b6   :  { %2368 = vmatpush.msrb.mxu1 %v8656_v3  ;;  %2472 = vmatpush.msrb.mxu3 %v10554_v41 }
 0x7b7   :  { %2441 = vmatpush.msrb.mxu2 %v8531_v12  ;;  %2329 = vmatpush.msrb.mxu0 %v10564_v40 }
 0x7b8   :  { %2370 = vmatpush.msrb.mxu1 %v8664_v8  ;;  %2478 = vmatpush.msrb.mxu3 %v10565_v46 }
 0x7b9   :  { %2443 = vmatpush.msrb.mxu2 %v8538_v17  ;;  %2333 = vmatpush.msrb.mxu0 %v10566_v57 }
 0x7ba   :  { %2372 = vmatpush.msrb.mxu1 %v8666_v10  ;;  %2484 = vmatpush.msrb.mxu3 %v10567_v56 }
 0x7bb   :  { %2445 = vmatpush.msrb.mxu2 %v8540_v18  ;;  %2337 = vmatpush.msrb.mxu0 %v10568_v61 }
 0x7bc   :  { %2374 = vmatpush.msrb.mxu1 %v8743_v52  ;;  %2490 = vmatpush.msrb.mxu3 %v10569_v58 }
 0x7bd   :  { %2341 = vmatpush.msrb.mxu0 %v10570_v47 }
 0x7be   :  { %2376 = vmatpush.msrb.mxu1 %v8751_v55 }
 0x7bf   :  { %2345 = vmatpush.msrb.mxu0 %v10571_v48 }
 0x7c0   :  { %2378 = vmatpush.msrb.mxu1 %v8764_v63 }
 0x7c1   :  { %2349 = vmatpush.msrb.mxu0 %v10572_v5 }
 0x812   :  { %v1754_v60 = vpop.f32.mrf.mxu0 }
 0x814   :  { %v1785_v51 = vpop.f32.mrf.mxu1 }
 0x816   :  { %v1716_v33 = vpop.f32.mrf.mxu3 }
 0x81a   :  { %v1930_v25 = vpop.f32.mrf.mxu0 }
 0x81c   :  { %v1971_v21 = vpop.f32.mrf.mxu1 }
 0x81d   :  { %v1972_v58 = vadd.f32 %v1971_v21, %v1930_v25 }
 0x81e   :  { %v1655_v0 = vpop.f32.mrf.mxu2  ;;  %v1859_v27 = vpop.f32.mrf.mxu3 }
 0x81f   :  { %v1656_v9 = vadd.f32 %v8900_v4, %v1655_v0 }
 0x821   :  { %v1717_v32 = vadd.f32 %v1716_v33, %v1656_v9 }
 0x822   :  { %v2001_v44 = vpop.f32.mrf.mxu0 }
 0x823   :  { %v1755_v59 = vadd.f32 %v1754_v60, %v1717_v32  ;;  %v2002_v56 = vadd.f32 %v2001_v44, %v1972_v58 }
 0x824   :  { %v2028_v57 = vpop.f32.mrf.mxu1 }
 0x825   :  { %v1786_v49 = vadd.f32 %v1785_v51, %v1755_v59  ;;  %v2029_v5 = vadd.f32 %v2028_v57, %v2002_v56 }
 0x826   :  { %v2086_v41 = vpop.f32.mrf.mxu3 }
 0x827   :  { %v1830_v47 = vpop.f32.mrf.mxu2 }
 0x828   :  { %v1831_v61 = vadd.f32 %v1830_v47, %v1786_v49 }
 0x82a   :  { %v1860_v48 = vadd.f32 %v1859_v27, %v1831_v61 }
 0x82c   :  { %8160 = vtanh.f32 %v1860_v48  ;;  %v8074_v58 = vmul.f32 -1.442695, %v1860_v48 }
 0x82f   :  { %v2061_v46 = vpop.f32.mrf.mxu2 }
 0x830   :  { %v2062_v40 = vadd.f32 %v2061_v46, %v2029_v5 }
 0x832   :  { %v8161_v29 = vpop.eup %8160  ;;  %v2087_v7 = vadd.f32 %v2086_v41, %v2062_v40 }
 0x833   :  { %1884 = vrot.lane.b32.xlu1 %v8161_v29, %s8424_s21 }
 0x834   :  { %v2090_v4 = vrot.slane %v2087_v7, 2 }
 0x836   :  { %v2092_v60 = vadd.f32 %v2090_v4, %v8633_v23 }
 0x838   :  { %8162 = vtanh.f32 %v2092_v60  ;;  %v8075_v47 = vmul.f32 -1.442695, %v2092_v60 }
 0x83a   :  { %8164 = vpow2.f32 %v8075_v47 }
 0x83b   :  { %8166 = vpow2.f32 %v8074_v58 }
 0x83e   :  { %v8163_v51 = vpop.eup %8162 }
 0x83f   :  { %2118 = vrot.lane.b32.xlu2 %v8163_v51, %s8424_s21 }
 0x840   :  { %v8165_v61 = vpop.eup %8164 }
 0x841   :  { %v2096_v33 = vadd.f32 1.0, %v8165_v61  ;;  %v8167_v46 = vpop.eup %8166 }
 0x842   :  { %v1865_v56 = vadd.f32 1.0, %v8167_v46  ;;  %v2114_v46 = vrot.slane %v9002_v53, 6 }
 0x843   :  { %8168 = vrcp.f32 %v2096_v33  ;;  %v2108_v25 = vand.u32 2147483648, %v2096_v33  ;;  %vm2102_vm13 = vweird.f32 %v2096_v33  ;;  %v2106_v0 = vand.u32 2147483647, %v2096_v33 }
 0x844   :  { %8170 = vrcp.f32 %v1865_v56  ;;  %v1877_v4 = vand.u32 2147483648, %v1865_v56  ;;  %vm1871_vm2 = vweird.f32 %v1865_v56  ;;  %v1875_v60 = vand.u32 2147483647, %v1865_v56 }
 0x845   :  { %v2109_v21 = vor.u32 1.1754944e-38, %v2108_v25  ;;  %vm2107_vm15 = vcmp.eq.f32.partialorder %v2106_v0, 8.507059e+37 }
 0x846   :  { %v1878_v47 = vor.u32 1.1754944e-38, %v1877_v4  ;;  %vm1876_vm5 = vcmp.eq.f32.partialorder %v1875_v60, 8.507059e+37 }
 0x849   :  { %v8169_v57 = vpop.eup %8168 }
 0x84a   :  { %v2098_v41 = vmul.f32 %v8169_v57, %v2096_v33  ;;  %v8171_v40 = vpop.eup %8170  ;;  %vm2103_vm12 = vweird.f32 %v8169_v57 }
 0x84b   :  { %v1867_v5 = vmul.f32 %v8171_v40, %v1865_v56  ;;  %vm2104_vm14 = vmor %vm2102_vm13, %vm2103_vm12  ;;  %vm1872_vm1 = vweird.f32 %v8171_v40 }
 0x84c   :  { %v2099_v29 = vsub.f32 1.0, %v2098_v41  ;;  %vm1873_vm4 = vmor %vm1871_vm2, %vm1872_vm1 }
 0x84d   :  { %v1868_v48 = vsub.f32 1.0, %v1867_v5 }
 0x84e   :  { %v2100_v7 = vmul.f32 %v8169_v57, %v2099_v29 }
 0x84f   :  { %v1869_v49 = vmul.f32 %v8171_v40, %v1868_v48 }
 0x850   :  { %v2101_v23 = vadd.f32 %v8169_v57, %v2100_v7 }
 0x851   :  { %v1870_v44 = vadd.f32 %v8171_v40, %v1869_v49 }
 0x852   :  { %v2105_v9 = vsel %vm2104_vm14, %v8169_v57, %v2101_v23 }
 0x853   :  { %v2110_v59 = vsel %vm2107_vm15, %v2109_v21, %v2105_v9  ;;  %v1874_v51 = vsel %vm1873_vm4, %v8171_v40, %v1870_v44 }
 0x854   :  { %v1879_v58 = vsel %vm1876_vm5, %v1878_v47, %v1874_v51  ;;  %v2116_v57 = vmul.f32 %v2114_v46, %v2110_v59 }
 0x855   :  { %v1882_v56 = vmul.f32 %v1879_v58, %v9006_v50 }
 0x899   :  { %v2119_v32 = vpop.permute.xlu2 %2118 }
 0x89a   :  { %v2121_v27 = vmul.f32 %v2119_v32, %v2110_v59 }
 0x89c   :  { %2123 = vrot.lane.b32.xlu1 %v2121_v27, %s8425_s22 }
 0x8a5   :  { %v1885_v61 = vpop.permute.xlu1 %1884 }
 0x8a6   :  { %v1887_v33 = vmul.f32 %v1885_v61, %v1879_v58 }
 0x8a8   :  { %1889 = vrot.lane.b32.xlu0 %v1887_v33, %s8425_s22 }
 0x90e   :  { %v2124_v41 = vpop.permute.xlu1 %2123 }
 0x90f   :  { %v9096_v29 = vadd.f32 %v2124_v41, %v2116_v57 }
 0x911   :  { %8172 = vtanh.f32 %v9096_v29 }
 0x917   :  { %v8173_v7 = vpop.eup %8172 }
 0x918   :  { %2129 = vrot.lane.b32.xlu0 %v8173_v7, %s8424_s21 }
 0x91a   :  { %v1890_v40 = vpop.permute.xlu0 %1889 }
 0x91b   :  { %v9101_v23 = vadd.f32 %v1890_v40, %v1882_v56  ;;  %v10573_v56 = vld [vmem:[#allocation30_spill] sm:$0xff]  ;;  %v10574_v40 = vld [vmem:[#allocation24_spill] sm:$0xff] }
 0x91d   :  { %8174 = vtanh.f32 %v9101_v23 }
 0x923   :  { %v8175_v5 = vpop.eup %8174 }
 0x924   :  { %1895 = vrot.lane.b32.xlu2 %v8175_v5, %s8424_s21  ;;  %v10575_v5 = vld [vmem:[#allocation14_spill] sm:$0xff] }
 0x97e   :  { %v1896_v53 = vpop.permute.xlu2 %1895 }
 0x97f   :  { %v1898_v25 = vmul.f32 %v1896_v53, %v1879_v58  ;;  %v10576_v53 = vld [vmem:[#allocation25_spill] sm:$0xff] }
 0x981   :  { %v2138_v0 = vrot.slane %v1898_v25, 2  ;;  %v10577_v25 = vld [vmem:[#allocation15_spill] sm:$0xff] }
 0x983   :  { %2139 = vrot.lane.b32.xlu2 %v2138_v0, %s8424_s21  ;;  %v10578_v0 = vld [vmem:[#allocation26_spill] sm:$0xff] }
 0x98a   :  { %v2130_v9 = vpop.permute.xlu0 %2129 }
 0x98b   :  { %v2132_v48 = vmul.f32 %v2130_v9, %v2110_v59  ;;  %v10579_v9 = vld [vmem:[#allocation16_spill] sm:$0xff] }
 0x98d   :  { %v2421_v21 = vrot.slane %v2132_v48, 6  ;;  %2134 = vrot.lane.b32.xlu1 %v2132_v48, %s8425_s22  ;;  %v10580_v48 = vld [vmem:[#allocation27_spill] sm:$0xff] }
 0x98f   :  { %2422 = vrot.lane.b32.xlu0 %v2421_v21, %s8425_s22  ;;  %v10581_v21 = vld [vmem:[#allocation17_spill] sm:$0xff] }
 0x9dd   :  { %v2140_v50 = vpop.permute.xlu2 %2139 }
 0x9ff   :  { %v2135_v32 = vpop.permute.xlu1 %2134 }
 0xa00   :  { %v2142_v27 = vsel %vm324_vm3, %v2135_v32, %v2140_v50  ;;  %v10582_v50 = vld [vmem:[#allocation28_spill] sm:$0xff]  ;;  %v10583_v32 = vld [vmem:[#allocation29_spill] sm:$0xff] }
 0xa01   :  { %v2144_v49 = vrot.slane %v2142_v27, 6  ;;  %v2423_v44 = vpop.permute.xlu0 %2422  ;;  %v10584_v27 = vld [vmem:[#allocation31_spill] sm:$0xff] }
 0xa02   :  { %v2424_v4 = vsel %vm324_vm3, %v2423_v44, 0 }
 0xa03   :  { %v2145_v60 = vsel %vm576_vm8, %v2144_v49, 0  ;;  %v2446_v51 = vand.u32 4294901760, %v2424_v4 }
 0xa04   :  { %v2171_v47 = vand.u32 4294901760, %v2145_v60 }
 0xa05   :  { %v2447_v61 = vsub.f32 %v2424_v4, %v2446_v51 }
 0xa06   :  { %v2172_v58 = vsub.f32 %v2145_v60, %v2171_v47  ;;  %2237 = vmatmul.f32.vlgmr.msra.gmra.mxu1 %v2171_v47  ;;  %v9186_v60 = vld [vmem:[%s10472_s5] ss:$0 sm:$0xff] }
 0xa07   :  { %v2448_v59 = vand.u32 4294901760, %v2447_v61  ;;  %2599 = vmatpush.msra.mxu1 %v8524_v6  ;;  %10585 = vst [vmem:[#allocation32_spill] sm:$0xff] %v9186_v60 }
 0xa08   :  { %2275 = vmatmul.f32.vlgmr.msra.gmra.mxu2 %v2172_v58  ;;  %v2173_v33 = vand.u32 4294901760, %v2172_v58 }
 0xa09   :  { %2510 = vmatpush.msra.mxu2 %v8534_v15  ;;  %2601 = vmatpush.msra.mxu1 %v8531_v12  ;;  %v2449_v46 = vsub.f32 %v2447_v61, %v2448_v59 }
 0xa0a   :  { %2306 = vmatmul.f32.vlgmr.msra.gmra.mxu3 %v2173_v33  ;;  %v2174_v57 = vsub.f32 %v2172_v58, %v2173_v33  ;;  %v8313_v58 = vld [vmem:[%s10470_s3] ss:$0 sm:$0xff] }
 0xa0b   :  { %2513 = vmatpush.msra.mxu2 %v8544_v22  ;;  %2539 = vmatpush.msra.mxu3 %v8524_v6  ;;  %v2450_v7 = vand.u32 4294901760, %v2449_v46 }
 0xa0c   :  { %v2175_v41 = vand.u32 4294901760, %v2174_v57  ;;  %2603 = vmatpush.msra.mxu1 %v8538_v17 }
 0xa0d   :  { %2516 = vmatpush.msra.mxu2 %v8552_v26  ;;  %2541 = vmatpush.msra.mxu3 %v8531_v12 }
 0xa0e   :  { %2176 = vmatmul.f32.vlgmr.msra.gmra.mxu0 %v2175_v41  ;;  %2380 = vmatmul.f32.vlgmr.msrb.gmra.mxu1 %v2171_v47 }
 0xa0f   :  { %2605 = vmatpush.msra.mxu1 %v8540_v18  ;;  %2519 = vmatpush.msra.mxu2 %v8560_v31 }
 0xa10   :  { %2451 = vmatmul.f32.vlgmr.msrb.gmra.mxu2 %v2450_v7  ;;  %2543 = vmatpush.msra.mxu3 %v8538_v17 }
 0xa11   :  { %2568 = vmatpush.msra.mxu0 %v8548_v24  ;;  %2673 = vmatpush.msrb.mxu2 %v8652_v1 }
 0xa12   :  { %2492 = vmatmul.f32.vlgmr.msrb.gmra.mxu3 %v2446_v51  ;;  %2805 = vmatpush.msrb.mxu1 %v8652_v1 }
 0xa13   :  { %2545 = vmatpush.msra.mxu3 %v8540_v18  ;;  %2572 = vmatpush.msra.mxu0 %v8557_v30 }
 0xa14   :  { %2675 = vmatpush.msrb.mxu2 %v8654_v2  ;;  %2807 = vmatpush.msrb.mxu1 %v8654_v2 }
 0xa15   :  { %2710 = vmatpush.msrb.mxu3 %v8712_v35  ;;  %2576 = vmatpush.msra.mxu0 %v8565_v34 }
 0xa16   :  { %2351 = vmatmul.f32.vlgmr.msrb.gmra.mxu0 %v2171_v47  ;;  %2607 = vmatmul.f32.vlgmr.msra.gmra.mxu1 %v2446_v51 }
 0xa17   :  { %2580 = vmatpush.msra.mxu0 %v8572_v39  ;;  %2716 = vmatpush.msrb.mxu3 %v8714_v36 }
 0xa18   :  { %2522 = vmatmul.f32.vlgmr.msra.gmra.mxu2 %v2447_v61  ;;  %2809 = vmatpush.msrb.mxu1 %v8656_v3 }
 0xa19   :  { %2768 = vmatpush.msrb.mxu0 %v8669_v11  ;;  %2722 = vmatpush.msrb.mxu3 %v8722_v38 }
 0xa1a   :  { %2677 = vmatpush.msrb.mxu2 %v8656_v3  ;;  %2549 = vmatmul.f32.vlgmr.msra.gmra.mxu3 %v2448_v59  ;;  %v10586_v59 = vld [vmem:[#allocation18_spill] sm:$0xff] }
 0xa1b   :  { %2771 = vmatpush.msrb.mxu0 %v8672_v13  ;;  %2728 = vmatpush.msrb.mxu3 %v8730_v42  ;;  %v175_v33 = vadd.f32 %v8313_v58, %v10586_v59 }
 0xa1c   :  { %2679 = vmatpush.msrb.mxu2 %v8664_v8  ;;  %2811 = vmatpush.msrb.mxu1 %v8664_v8 }
 0xa1d   :  { %2774 = vmatpush.msrb.mxu0 %v8675_v14  ;;  %2734 = vmatpush.msrb.mxu3 %v8734_v43 }
 0xa1e   :  { %2681 = vmatpush.msrb.mxu2 %v8666_v10  ;;  %2582 = vmatmul.f32.vlgmr.msra.gmra.mxu0 %v2446_v51 }
 0xa1f   :  { %2740 = vmatpush.msrb.mxu3 %v8781_v28  ;;  %2777 = vmatpush.msrb.mxu0 %v8680_v16 }
 0xa20   :  { %2683 = vmatpush.msrb.mxu2 %v8743_v52  ;;  %2813 = vmatpush.msrb.mxu1 %v8666_v10 }
 0xa21   :  { %2746 = vmatpush.msrb.mxu3 %v8793_v37  ;;  %2780 = vmatpush.msrb.mxu0 %v8683_v19 }
 0xa22   :  { %2685 = vmatpush.msrb.mxu2 %v8751_v55  ;;  %2815 = vmatpush.msrb.mxu1 %v8743_v52 }
 0xa23   :  { %2752 = vmatpush.msrb.mxu3 %v8801_v45  ;;  %2783 = vmatpush.msrb.mxu0 %v8749_v54 }
 0xa24   :  { %2687 = vmatpush.msrb.mxu2 %v8764_v63  ;;  %2817 = vmatpush.msrb.mxu1 %v8751_v55 }
 0xa25   :  { %2881 = vmatpush.msra.mxu3 %v8652_v1  ;;  %2786 = vmatpush.msrb.mxu0 %v8762_v62 }
 0xa26   :  { %2838 = vmatpush.msra.mxu2 %v8686_v20  ;;  %2819 = vmatpush.msrb.mxu1 %v8764_v63 }
 0xa27   :  { %2883 = vmatpush.msra.mxu3 %v8654_v2  ;;  %2789 = vmatpush.msrb.mxu0 %v10573_v56 }
 0xa28   :  { %2842 = vmatpush.msra.mxu2 %v10574_v40  ;;  %2986 = vmatpush.msra.mxu1 %v10575_v5 }
 0xa29   :  { %2885 = vmatpush.msra.mxu3 %v8656_v3  ;;  %2953 = vmatpush.msra.mxu0 %v8524_v6 }
 0xa2a   :  { %2846 = vmatpush.msra.mxu2 %v10576_v53  ;;  %2992 = vmatpush.msra.mxu1 %v10577_v25 }
 0xa2b   :  { %2887 = vmatpush.msra.mxu3 %v8664_v8  ;;  %2955 = vmatpush.msra.mxu0 %v8531_v12 }
 0xa2c   :  { %2850 = vmatpush.msra.mxu2 %v10578_v0  ;;  %2998 = vmatpush.msra.mxu1 %v10579_v9  ;;  %v10588_v0 = vld [vmem:[#allocation19_spill] sm:$0xff] }
 0xa2d   :  { %2889 = vmatpush.msra.mxu3 %v8666_v10  ;;  %2957 = vmatpush.msra.mxu0 %v8538_v17 }
 0xa2e   :  { %2854 = vmatpush.msra.mxu2 %v10580_v48  ;;  %3004 = vmatpush.msra.mxu1 %v10581_v21 }
 0xa2f   :  { %2891 = vmatpush.msra.mxu3 %v8743_v52  ;;  %2959 = vmatpush.msra.mxu0 %v8540_v18 }
 0xa30   :  { %2858 = vmatpush.msra.mxu2 %v10582_v50 }
 0xa31   :  { %2893 = vmatpush.msra.mxu3 %v8751_v55 }
 0xa32   :  { %2862 = vmatpush.msra.mxu2 %v10583_v32 }
 0xa33   :  { %2895 = vmatpush.msra.mxu3 %v8764_v63 }
 0xa34   :  { %2866 = vmatpush.msra.mxu2 %v10584_v27  ;;  %v10587_v27 = vld [vmem:[#allocation20_spill] sm:$0xff] }
 0xa35   :  { %v205_v32 = vadd.f32 %v10587_v27, %v175_v33 }
 0xa83   :  { %v2238_v49 = vpop.f32.mrf.mxu1 }
 0xa8b   :  { %v2177_v44 = vpop.f32.mrf.mxu0  ;;  %v2276_v4 = vpop.f32.mrf.mxu2 }
 0xa8c   :  { %v2178_v51 = vadd.f32 %v9186_v60, %v2177_v44  ;;  %v2381_v21 = vpop.f32.mrf.mxu1  ;;  %v234_v44 = vadd.f32 %v10588_v0, %v205_v32  ;;  %v10589_v60 = vld [vmem:[#allocation21_spill] sm:$0xff] }
 0xa8d   :  { %v2307_v47 = vpop.f32.mrf.mxu3 }
 0xa8e   :  { %v2239_v61 = vadd.f32 %v2238_v49, %v2178_v51  ;;  %v264_v25 = vadd.f32 %v10589_v60, %v234_v44 }
 0xa90   :  { %v2277_v46 = vadd.f32 %v2276_v4, %v2239_v61  ;;  %v10590_v4 = vld [vmem:[#allocation22_spill] sm:$0xff] }
 0xa92   :  { %v2308_v57 = vadd.f32 %v2307_v47, %v2277_v46  ;;  %v292_v47 = vadd.f32 %v10590_v4, %v264_v25  ;;  %v10591_v46 = vld [vmem:[#allocation23_spill] sm:$0xff] }
 0xa93   :  { %v2352_v41 = vpop.f32.mrf.mxu0  ;;  %v2452_v7 = vpop.f32.mrf.mxu2 }
 0xa94   :  { %v2353_v50 = vadd.f32 %v2352_v41, %v2308_v57  ;;  %v2608_v33 = vpop.f32.mrf.mxu1 }
 0xa95   :  { %v2493_v48 = vpop.f32.mrf.mxu3 }
 0xa96   :  { %v2382_v9 = vadd.f32 %v2381_v21, %v2353_v50  ;;  %v2494_v49 = vadd.f32 %v2493_v48, %v2452_v7  ;;  %v9199_v21 = vadd.f32 %v10591_v46, %v292_v47 }
 0xa98   :  { %8176 = vtanh.f32 %v2382_v9  ;;  %v8076_v25 = vmul.f32 -1.442695, %v2382_v9 }
 0xa9b   :  { %v2523_v51 = vpop.f32.mrf.mxu2  ;;  %v2583_v59 = vpop.f32.mrf.mxu0 }
 0xa9c   :  { %v2524_v53 = vadd.f32 %v2523_v51, %v2494_v49 }
 0xa9d   :  { %v2550_v5 = vpop.f32.mrf.mxu3 }
 0xa9e   :  { %v8177_v58 = vpop.eup %8176  ;;  %v2551_v61 = vadd.f32 %v2550_v5, %v2524_v53 }
 0xa9f   :  { %2406 = vrot.lane.b32.xlu1 %v8177_v58, %s8424_s21 }
 0xaa0   :  { %v2584_v27 = vadd.f32 %v2583_v59, %v2551_v61 }
 0xaa2   :  { %v2609_v0 = vadd.f32 %v2608_v33, %v2584_v27 }
 0xaa4   :  { %v2611_v48 = vadd.f32 %v2609_v0, %v9199_v21 }
 0xaa6   :  { %8178 = vtanh.f32 %v2611_v48  ;;  %v8077_v32 = vmul.f32 -1.442695, %v2611_v48 }
 0xaa8   :  { %8180 = vpow2.f32 %v8077_v32 }
 0xaa9   :  { %8182 = vpow2.f32 %v8076_v25 }
 0xaac   :  { %v8179_v50 = vpop.eup %8178 }
 0xaad   :  { %2637 = vrot.lane.b32.xlu2 %v8179_v50, %s8424_s21 }
 0xaae   :  { %v8181_v60 = vpop.eup %8180 }
 0xaaf   :  { %v2615_v5 = vadd.f32 1.0, %v8181_v60  ;;  %v8183_v53 = vpop.eup %8182 }
 0xab0   :  { %v2387_v41 = vadd.f32 1.0, %v8183_v53 }
 0xab1   :  { %8184 = vrcp.f32 %v2615_v5  ;;  %v2627_v47 = vand.u32 2147483648, %v2615_v5  ;;  %vm2621_vm7 = vweird.f32 %v2615_v5  ;;  %v2625_v61 = vand.u32 2147483647, %v2615_v5 }
 0xab2   :  { %8186 = vrcp.f32 %v2387_v41  ;;  %v2399_v32 = vand.u32 2147483648, %v2387_v41  ;;  %vm2393_vm12 = vweird.f32 %v2387_v41  ;;  %v2397_v60 = vand.u32 2147483647, %v2387_v41 }
 0xab3   :  { %v2628_v27 = vor.u32 1.1754944e-38, %v2627_v47  ;;  %vm2626_vm10 = vcmp.eq.f32.partialorder %v2625_v61, 8.507059e+37 }
 0xab4   :  { %v2400_v53 = vor.u32 1.1754944e-38, %v2399_v32  ;;  %vm2398_vm14 = vcmp.eq.f32.partialorder %v2397_v60, 8.507059e+37 }
 0xab7   :  { %v8185_v57 = vpop.eup %8184 }
 0xab8   :  { %v2617_v7 = vmul.f32 %v8185_v57, %v2615_v5  ;;  %v8187_v49 = vpop.eup %8186  ;;  %vm2622_vm6 = vweird.f32 %v8185_v57 }
 0xab9   :  { %v2389_v58 = vmul.f32 %v8187_v49, %v2387_v41  ;;  %vm2623_vm9 = vmor %vm2621_vm7, %vm2622_vm6  ;;  %vm2394_vm11 = vweird.f32 %v8187_v49 }
 0xaba   :  { %v2618_v44 = vsub.f32 1.0, %v2617_v7  ;;  %vm2395_vm13 = vmor %vm2393_vm12, %vm2394_vm11 }
 0xabb   :  { %v2390_v59 = vsub.f32 1.0, %v2389_v58 }
 0xabc   :  { %v2619_v51 = vmul.f32 %v8185_v57, %v2618_v44  ;;  %v2633_v44 = vrot.slane %v9096_v29, 6 }
 0xabd   :  { %v2391_v33 = vmul.f32 %v8187_v49, %v2390_v59 }
 0xabe   :  { %v2620_v4 = vadd.f32 %v8185_v57, %v2619_v51 }
 0xabf   :  { %v2392_v50 = vadd.f32 %v8187_v49, %v2391_v33 }
 0xac0   :  { %v2624_v9 = vsel %vm2623_vm9, %v8185_v57, %v2620_v4 }
 0xac1   :  { %v2629_v0 = vsel %vm2626_vm10, %v2628_v27, %v2624_v9  ;;  %v2396_v25 = vsel %vm2395_vm13, %v8187_v49, %v2392_v50 }
 0xac2   :  { %v2401_v7 = vsel %vm2398_vm14, %v2400_v53, %v2396_v25  ;;  %v2635_v51 = vmul.f32 %v2633_v44, %v2629_v0 }
 0xac3   :  { %v2404_v41 = vmul.f32 %v2401_v7, %v9101_v23 }
 0xb07   :  { %v2638_v46 = vpop.permute.xlu2 %2637 }
 0xb08   :  { %v2640_v48 = vmul.f32 %v2638_v46, %v2629_v0 }
 0xb0a   :  { %2642 = vrot.lane.b32.xlu1 %v2640_v48, %s8425_s22 }
 0xb11   :  { %v2407_v5 = vpop.permute.xlu1 %2406 }
 0xb12   :  { %v2409_v57 = vmul.f32 %v2407_v5, %v2401_v7 }
 0xb14   :  { %2411 = vrot.lane.b32.xlu0 %v2409_v57, %s8425_s22 }
 0xb7c   :  { %v2643_v58 = vpop.permute.xlu1 %2642 }
 0xb7d   :  { %v9206_v4 = vadd.f32 %v2643_v58, %v2635_v51 }
 0xb7f   :  { %8188 = vtanh.f32 %v9206_v4 }
 0xb85   :  { %v8189_v47 = vpop.eup %8188 }
 0xb86   :  { %2648 = vrot.lane.b32.xlu0 %v8189_v47, %s8424_s21  ;;  %v2412_v49 = vpop.permute.xlu0 %2411  ;;  %v10592_v47 = vld [vmem:[#allocation14_spill] sm:$0xff] }
 0xb87   :  { %v9211_v61 = vadd.f32 %v2412_v49, %v2404_v41  ;;  %v10593_v41 = vld [vmem:[#allocation25_spill] sm:$0xff]  ;;  %v10594_v49 = vld [vmem:[#allocation15_spill] sm:$0xff] }
 0xb89   :  { %8190 = vtanh.f32 %v9211_v61 }
 0xb8f   :  { %v8191_v59 = vpop.eup %8190 }
 0xb90   :  { %2417 = vrot.lane.b32.xlu2 %v8191_v59, %s8424_s21  ;;  %v10595_v59 = vld [vmem:[#allocation26_spill] sm:$0xff] }
 0xbea   :  { %v2418_v29 = vpop.permute.xlu2 %2417 }
 0xbeb   :  { %v2420_v9 = vmul.f32 %v2418_v29, %v2401_v7  ;;  %v10596_v29 = vld [vmem:[#allocation16_spill] sm:$0xff] }
 0xbed   :  { %2657 = vrot.lane.b32.xlu2 %v2420_v9, %s8424_s21  ;;  %v10597_v9 = vld [vmem:[#allocation27_spill] sm:$0xff] }
 0xbf8   :  { %v2649_v27 = vpop.permute.xlu0 %2648 }
 0xbf9   :  { %v2651_v33 = vmul.f32 %v2649_v27, %v2629_v0  ;;  %v10598_v27 = vld [vmem:[#allocation17_spill] sm:$0xff] }
 0xbfb   :  { %2653 = vrot.lane.b32.xlu1 %v2651_v33, %s8425_s22  ;;  %v10599_v33 = vld [vmem:[#allocation28_spill] sm:$0xff] }
 0xc47   :  { %v2658_v46 = vpop.permute.xlu2 %2657 }
 0xc6d   :  { %v2654_v23 = vpop.permute.xlu1 %2653 }
 0xc6e   :  { %v2660_v48 = vsel %vm324_vm3, %v2654_v23, %v2658_v46  ;;  %v2938_v50 = vsel %vm324_vm3, %v2654_v23, 0  ;;  %v10600_v46 = vld [vmem:[#allocation29_spill] sm:$0xff]  ;;  %v10601_v23 = vld [vmem:[#allocation31_spill] sm:$0xff] }
 0xc6f   :  { %v2662_v32 = vsel %vm576_vm8, %v2660_v48, 0  ;;  %v2960_v60 = vand.u32 4294901760, %v2938_v50 }
 0xc70   :  { %v2688_v25 = vand.u32 4294901760, %v2662_v32 }
 0xc71   :  { %v2961_v53 = vsub.f32 %v2938_v50, %v2960_v60 }
 0xc72   :  { %v2689_v5 = vsub.f32 %v2662_v32, %v2688_v25  ;;  %2754 = vmatmul.f32.vlgmr.msrb.gmra.mxu3 %v2688_v25 }
 0xc73   :  { %v2962_v7 = vand.u32 4294901760, %v2961_v53  ;;  %3113 = vmatpush.msrb.mxu3 %v8524_v6 }
 0xc74   :  { %2792 = vmatmul.f32.vlgmr.msrb.gmra.mxu0 %v2689_v5  ;;  %v2690_v0 = vand.u32 4294901760, %v2689_v5 }
 0xc75   :  { %3024 = vmatpush.msrb.mxu0 %v8534_v15  ;;  %3115 = vmatpush.msrb.mxu3 %v8531_v12  ;;  %v2963_v57 = vsub.f32 %v2961_v53, %v2962_v7 }
 0xc76   :  { %2823 = vmatmul.f32.vlgmr.msrb.gmra.mxu1 %v2690_v0  ;;  %v2691_v44 = vsub.f32 %v2689_v5, %v2690_v0 }
 0xc77   :  { %3027 = vmatpush.msrb.mxu0 %v8544_v22  ;;  %3053 = vmatpush.msrb.mxu1 %v8524_v6  ;;  %v2964_v58 = vand.u32 4294901760, %v2963_v57 }
 0xc78   :  { %v2692_v51 = vand.u32 4294901760, %v2691_v44  ;;  %3117 = vmatpush.msrb.mxu3 %v8538_v17 }
 0xc79   :  { %3030 = vmatpush.msrb.mxu0 %v8552_v26  ;;  %3055 = vmatpush.msrb.mxu1 %v8531_v12 }
 0xc7a   :  { %2693 = vmatmul.f32.vlgmr.msrb.gmra.mxu2 %v2692_v51  ;;  %2897 = vmatmul.f32.vlgmr.msra.gmra.mxu3 %v2688_v25 }
 0xc7b   :  { %3119 = vmatpush.msrb.mxu3 %v8540_v18  ;;  %3082 = vmatpush.msrb.mxu2 %v8548_v24 }
 0xc7c   :  { %2965 = vmatmul.f32.vlgmr.msra.gmra.mxu0 %v2964_v58  ;;  %3057 = vmatpush.msrb.mxu1 %v8538_v17 }
 0xc7d   :  { %3033 = vmatpush.msrb.mxu0 %v8560_v31  ;;  %3086 = vmatpush.msrb.mxu2 %v8557_v30 }
 0xc7e   :  { %3006 = vmatmul.f32.vlgmr.msra.gmra.mxu1 %v2960_v60  ;;  %3324 = vmatpush.msra.mxu3 %v8652_v1 }
 0xc7f   :  { %3192 = vmatpush.msra.mxu0 %v8652_v1  ;;  %3059 = vmatpush.msrb.mxu1 %v8540_v18 }
 0xc80   :  { %3090 = vmatpush.msrb.mxu2 %v8565_v34  ;;  %3326 = vmatpush.msra.mxu3 %v8654_v2 }
 0xc81   :  { %3229 = vmatpush.msra.mxu1 %v8712_v35  ;;  %3194 = vmatpush.msra.mxu0 %v8654_v2 }
 0xc82   :  { %3094 = vmatpush.msrb.mxu2 %v8572_v39  ;;  %3121 = vmatmul.f32.vlgmr.msrb.gmra.mxu3 %v2960_v60 }
 0xc83   :  { %2868 = vmatmul.f32.vlgmr.msra.gmra.mxu2 %v2688_v25  ;;  %3235 = vmatpush.msra.mxu1 %v8714_v36 }
 0xc84   :  { %3287 = vmatpush.msra.mxu2 %v8669_v11  ;;  %3036 = vmatmul.f32.vlgmr.msrb.gmra.mxu0 %v2961_v53  ;;  %v10602_v53 = vld [vmem:[#allocation32_spill] sm:$0xff] }
 0xc85   :  { %3241 = vmatpush.msra.mxu1 %v8722_v38  ;;  %3196 = vmatpush.msra.mxu0 %v8656_v3 }
 0xc86   :  { %3290 = vmatpush.msra.mxu2 %v8672_v13  ;;  %3063 = vmatmul.f32.vlgmr.msrb.gmra.mxu1 %v2962_v7 }
 0xc87   :  { %3247 = vmatpush.msra.mxu1 %v8730_v42  ;;  %3198 = vmatpush.msra.mxu0 %v8664_v8 }
 0xc88   :  { %3293 = vmatpush.msra.mxu2 %v8675_v14  ;;  %3328 = vmatpush.msra.mxu3 %v8656_v3 }
 0xc89   :  { %3253 = vmatpush.msra.mxu1 %v8734_v43  ;;  %3200 = vmatpush.msra.mxu0 %v8666_v10 }
 0xc8a   :  { %3296 = vmatpush.msra.mxu2 %v8680_v16  ;;  %3330 = vmatpush.msra.mxu3 %v8664_v8 }
 0xc8b   :  { %3096 = vmatmul.f32.vlgmr.msrb.gmra.mxu2 %v2960_v60  ;;  %3259 = vmatpush.msra.mxu1 %v8781_v28 }
 0xc8c   :  { %3299 = vmatpush.msra.mxu2 %v8683_v19  ;;  %3202 = vmatpush.msra.mxu0 %v8743_v52 }
 0xc8d   :  { %3265 = vmatpush.msra.mxu1 %v8793_v37  ;;  %3332 = vmatpush.msra.mxu3 %v8666_v10 }
 0xc8e   :  { %3302 = vmatpush.msra.mxu2 %v8749_v54  ;;  %3204 = vmatpush.msra.mxu0 %v8751_v55 }
 0xc8f   :  { %3271 = vmatpush.msra.mxu1 %v8801_v45  ;;  %3334 = vmatpush.msra.mxu3 %v8743_v52 }
 0xc90   :  { %3305 = vmatpush.msra.mxu2 %v8762_v62  ;;  %3206 = vmatpush.msra.mxu0 %v8764_v63 }
 0xc91   :  { %3400 = vmatpush.msrb.mxu1 %v8652_v1  ;;  %3336 = vmatpush.msra.mxu3 %v8751_v55 }
 0xc92   :  { %3308 = vmatpush.msra.mxu2 %v10573_v56  ;;  %3357 = vmatpush.msrb.mxu0 %v8686_v20 }
 0xc93   :  { %3402 = vmatpush.msrb.mxu1 %v8654_v2  ;;  %3338 = vmatpush.msra.mxu3 %v8764_v63 }
 0xc94   :  { %3475 = vmatpush.msrb.mxu2 %v8524_v6  ;;  %3361 = vmatpush.msrb.mxu0 %v10574_v40 }
 0xc95   :  { %3404 = vmatpush.msrb.mxu1 %v8656_v3  ;;  %3508 = vmatpush.msrb.mxu3 %v10592_v47 }
 0xc96   :  { %3477 = vmatpush.msrb.mxu2 %v8531_v12  ;;  %3365 = vmatpush.msrb.mxu0 %v10593_v41 }
 0xc97   :  { %3406 = vmatpush.msrb.mxu1 %v8664_v8  ;;  %3514 = vmatpush.msrb.mxu3 %v10594_v49 }
 0xc98   :  { %3479 = vmatpush.msrb.mxu2 %v8538_v17  ;;  %3369 = vmatpush.msrb.mxu0 %v10595_v59 }
 0xc99   :  { %3408 = vmatpush.msrb.mxu1 %v8666_v10  ;;  %3520 = vmatpush.msrb.mxu3 %v10596_v29 }
 0xc9a   :  { %3481 = vmatpush.msrb.mxu2 %v8540_v18  ;;  %3373 = vmatpush.msrb.mxu0 %v10597_v9 }
 0xc9b   :  { %3410 = vmatpush.msrb.mxu1 %v8743_v52  ;;  %3526 = vmatpush.msrb.mxu3 %v10598_v27 }
 0xc9c   :  { %3377 = vmatpush.msrb.mxu0 %v10599_v33 }
 0xc9d   :  { %3412 = vmatpush.msrb.mxu1 %v8751_v55 }
 0xc9e   :  { %3381 = vmatpush.msrb.mxu0 %v10600_v46 }
 0xc9f   :  { %3414 = vmatpush.msrb.mxu1 %v8764_v63 }
 0xca0   :  { %3385 = vmatpush.msrb.mxu0 %v10601_v23 }
 0xcf1   :  { %v2793_v48 = vpop.f32.mrf.mxu0 }
 0xcf3   :  { %v2824_v50 = vpop.f32.mrf.mxu1 }
 0xcf5   :  { %v2755_v32 = vpop.f32.mrf.mxu3 }
 0xcf9   :  { %v2966_v60 = vpop.f32.mrf.mxu0 }
 0xcfb   :  { %v3007_v7 = vpop.f32.mrf.mxu1 }
 0xcfc   :  { %v3008_v27 = vadd.f32 %v3007_v7, %v2966_v60 }
 0xcfd   :  { %v2694_v25 = vpop.f32.mrf.mxu2  ;;  %v2898_v44 = vpop.f32.mrf.mxu3 }
 0xcfe   :  { %v2695_v5 = vadd.f32 %v10602_v53, %v2694_v25 }
 0xd00   :  { %v2756_v0 = vadd.f32 %v2755_v32, %v2695_v5 }
 0xd01   :  { %v3037_v58 = vpop.f32.mrf.mxu0 }
 0xd02   :  { %v2794_v57 = vadd.f32 %v2793_v48, %v2756_v0  ;;  %v3038_v29 = vadd.f32 %v3037_v58, %v3008_v27 }
 0xd03   :  { %v3064_v59 = vpop.f32.mrf.mxu1 }
 0xd04   :  { %v2825_v51 = vadd.f32 %v2824_v50, %v2794_v57  ;;  %v3065_v23 = vadd.f32 %v3064_v59, %v3038_v29 }
 0xd05   :  { %v3122_v47 = vpop.f32.mrf.mxu3 }
 0xd06   :  { %v2869_v33 = vpop.f32.mrf.mxu2 }
 0xd07   :  { %v2870_v9 = vadd.f32 %v2869_v33, %v2825_v51 }
 0xd09   :  { %v2899_v46 = vadd.f32 %v2898_v44, %v2870_v9 }
 0xd0b   :  { %8192 = vtanh.f32 %v2899_v46  ;;  %v8078_v33 = vmul.f32 -1.442695, %v2899_v46 }
 0xd0e   :  { %v3097_v49 = vpop.f32.mrf.mxu2 }
 0xd0f   :  { %v3098_v41 = vadd.f32 %v3097_v49, %v3065_v23 }
 0xd11   :  { %v8193_v40 = vpop.eup %8192  ;;  %v3123_v56 = vadd.f32 %v3122_v47, %v3098_v41 }
 0xd12   :  { %2923 = vrot.lane.b32.xlu0 %v8193_v40, %s8424_s21 }
 0xd13   :  { %v3126_v32 = vrot.slane %v3123_v56, 6 }
 0xd15   :  { %v3128_v48 = vadd.f32 %v3126_v32, %v9199_v21 }
 0xd17   :  { %8194 = vtanh.f32 %v3128_v48  ;;  %v8079_v27 = vmul.f32 -1.442695, %v3128_v48 }
 0xd18   :  { %8196 = vpow2.f32 %v8078_v33 }
 0xd19   :  { %8198 = vpow2.f32 %v8079_v27 }
 0xd1d   :  { %v8195_v50 = vpop.eup %8194 }
 0xd1e   :  { %3154 = vrot.lane.b32.xlu1 %v8195_v50, %s8424_s21  ;;  %v8197_v9 = vpop.eup %8196 }
 0xd1f   :  { %v2904_v60 = vadd.f32 1.0, %v8197_v9  ;;  %v8199_v49 = vpop.eup %8198 }
 0xd20   :  { %v3132_v29 = vadd.f32 1.0, %v8199_v49 }
 0xd21   :  { %8200 = vrcp.f32 %v2904_v60  ;;  %v2916_v5 = vand.u32 2147483648, %v2904_v60  ;;  %vm2910_vm1 = vweird.f32 %v2904_v60  ;;  %v2914_v46 = vand.u32 2147483647, %v2904_v60 }
 0xd22   :  { %8202 = vrcp.f32 %v3132_v29  ;;  %v3144_v50 = vand.u32 2147483648, %v3132_v29  ;;  %vm3138_vm6 = vweird.f32 %v3132_v29  ;;  %v3142_v33 = vand.u32 2147483647, %v3132_v29 }
 0xd23   :  { %v2917_v57 = vor.u32 1.1754944e-38, %v2916_v5  ;;  %vm2915_vm4 = vcmp.eq.f32.partialorder %v2914_v46, 8.507059e+37 }
 0xd24   :  { %v3145_v27 = vor.u32 1.1754944e-38, %v3144_v50  ;;  %vm3143_vm9 = vcmp.eq.f32.partialorder %v3142_v33, 8.507059e+37 }
 0xd27   :  { %v8201_v59 = vpop.eup %8200 }
 0xd28   :  { %v2906_v47 = vmul.f32 %v8201_v59, %v2904_v60  ;;  %v8203_v41 = vpop.eup %8202  ;;  %vm2911_vm15 = vweird.f32 %v8201_v59 }
 0xd29   :  { %v3134_v25 = vmul.f32 %v8203_v41, %v3132_v29  ;;  %vm2912_vm2 = vmor %vm2910_vm1, %vm2911_vm15  ;;  %vm3139_vm5 = vweird.f32 %v8203_v41  ;;  %v3150_v29 = vrot.slane %v9206_v4, 6 }
 0xd2a   :  { %v2907_v40 = vsub.f32 1.0, %v2906_v47  ;;  %vm3140_vm7 = vmor %vm3138_vm6, %vm3139_vm5 }
 0xd2b   :  { %v3135_v0 = vsub.f32 1.0, %v3134_v25 }
 0xd2c   :  { %v2908_v56 = vmul.f32 %v8201_v59, %v2907_v40 }
 0xd2d   :  { %v3136_v32 = vmul.f32 %v8203_v41, %v3135_v0 }
 0xd2e   :  { %v2909_v23 = vadd.f32 %v8201_v59, %v2908_v56 }
 0xd2f   :  { %v3137_v48 = vadd.f32 %v8203_v41, %v3136_v32 }
 0xd30   :  { %v2913_v7 = vsel %vm2912_vm2, %v8201_v59, %v2909_v23 }
 0xd31   :  { %v2918_v51 = vsel %vm2915_vm4, %v2917_v57, %v2913_v7  ;;  %v3141_v9 = vsel %vm3140_vm7, %v8203_v41, %v3137_v48 }
 0xd32   :  { %v3146_v49 = vsel %vm3143_vm9, %v3145_v27, %v3141_v9  ;;  %v2921_v47 = vmul.f32 %v2918_v51, %v9211_v61 }
 0xd33   :  { %v3152_v41 = vmul.f32 %v3150_v29, %v3146_v49 }
 0xd84   :  { %v2924_v44 = vpop.permute.xlu0 %2923 }
 0xd85   :  { %v2926_v58 = vmul.f32 %v2924_v44, %v2918_v51 }
 0xd87   :  { %2928 = vrot.lane.b32.xlu2 %v2926_v58, %s8425_s22 }
 0xd90   :  { %v3155_v60 = vpop.permute.xlu1 %3154 }
 0xd91   :  { %v3157_v59 = vmul.f32 %v3155_v60, %v3146_v49 }
 0xd93   :  { %3159 = vrot.lane.b32.xlu0 %v3157_v59, %s8425_s22 }
 0xde1   :  { %v2929_v40 = vpop.permute.xlu2 %2928 }
 0xde2   :  { %v9299_v56 = vadd.f32 %v2929_v40, %v2921_v47 }
 0xde4   :  { %8204 = vtanh.f32 %v9299_v56 }
 0xdea   :  { %v8205_v23 = vpop.eup %8204 }
 0xdeb   :  { %2934 = vrot.lane.b32.xlu1 %v8205_v23, %s8424_s21 }
 0xe05   :  { %v3160_v25 = vpop.permute.xlu0 %3159 }
 0xe06   :  { %v9304_v5 = vadd.f32 %v3160_v25, %v3152_v41 }
 0xe08   :  { %8206 = vtanh.f32 %v9304_v5 }
 0xe0e   :  { %v8207_v46 = vpop.eup %8206 }
 0xe0f   :  { %3165 = vrot.lane.b32.xlu2 %v8207_v46, %s8424_s21  ;;  %v10603_v46 = vld [vmem:[#allocation30_spill] sm:$0xff] }
 0xe5d   :  { %v2935_v61 = vpop.permute.xlu1 %2934 }
 0xe5e   :  { %v2937_v7 = vmul.f32 %v2935_v61, %v2918_v51  ;;  %v10604_v61 = vld [vmem:[#allocation24_spill] sm:$0xff] }
 0xe60   :  { %v3174_v0 = vrot.slane %v2937_v7, 6  ;;  %v10605_v7 = vld [vmem:[#allocation14_spill] sm:$0xff] }
 0xe62   :  { %3175 = vrot.lane.b32.xlu1 %v3174_v0, %s8424_s21  ;;  %v10606_v0 = vld [vmem:[#allocation25_spill] sm:$0xff] }
 0xe69   :  { %v3166_v57 = vpop.permute.xlu2 %3165 }
 0xe6a   :  { %v3168_v44 = vmul.f32 %v3166_v57, %v3146_v49  ;;  %v10607_v57 = vld [vmem:[#allocation15_spill] sm:$0xff] }
 0xe6c   :  { %v3457_v58 = vrot.slane %v3168_v44, 2  ;;  %3170 = vrot.lane.b32.xlu0 %v3168_v44, %s8425_s22  ;;  %v10608_v44 = vld [vmem:[#allocation26_spill] sm:$0xff] }
 0xe6e   :  { %3458 = vrot.lane.b32.xlu2 %v3457_v58, %s8425_s22  ;;  %v10609_v58 = vld [vmem:[#allocation16_spill] sm:$0xff] }
 0xec8   :  { %v3459_v4 = vpop.permute.xlu2 %3458 }
 0xec9   :  { %v3460_v32 = vsel %vm324_vm3, %v3459_v4, 0  ;;  %v10610_v4 = vld [vmem:[#allocation27_spill] sm:$0xff] }
 0xeca   :  { %v3482_v48 = vand.u32 4294901760, %v3460_v32 }
 0xecc   :  { %v3483_v51 = vsub.f32 %v3460_v32, %v3482_v48  ;;  %v10611_v32 = vld [vmem:[#allocation17_spill] sm:$0xff] }
 0xece   :  { %v3484_v47 = vand.u32 4294901760, %v3483_v51 }
 0xed0   :  { %v3485_v23 = vsub.f32 %v3483_v51, %v3484_v47 }
 0xed2   :  { %v3486_v25 = vand.u32 4294901760, %v3485_v23 }
 0xed4   :  { %v3176_v50 = vpop.permute.xlu1 %3175 }
 0xede   :  { %v3171_v33 = vpop.permute.xlu0 %3170 }
 0xedf   :  { %v3178_v9 = vsel %vm324_vm3, %v3171_v33, %v3176_v50  ;;  %v10613_v50 = vld [vmem:[#allocation29_spill] sm:$0xff]  ;;  %v10614_v33 = vld [vmem:[#allocation31_spill] sm:$0xff] }
 0xee0   :  { %v3180_v27 = vrot.slane %v3178_v9, 2 }
 0xee2   :  { %v3181_v60 = vsel %vm576_vm8, %v3180_v27, 0 }
 0xee3   :  { %v3207_v59 = vand.u32 4294901760, %v3181_v60 }
 0xee5   :  { %v3208_v49 = vsub.f32 %v3181_v60, %v3207_v59  ;;  %3273 = vmatmul.f32.vlgmr.msra.gmra.mxu1 %v3207_v59 }
 0xee6   :  { %3635 = vmatpush.msra.mxu1 %v8524_v6 }
 0xee7   :  { %3311 = vmatmul.f32.vlgmr.msra.gmra.mxu2 %v3208_v49  ;;  %v3209_v40 = vand.u32 4294901760, %v3208_v49 }
 0xee8   :  { %3546 = vmatpush.msra.mxu2 %v8534_v15  ;;  %3637 = vmatpush.msra.mxu1 %v8531_v12 }
 0xee9   :  { %3342 = vmatmul.f32.vlgmr.msra.gmra.mxu3 %v3209_v40  ;;  %v3210_v29 = vsub.f32 %v3208_v49, %v3209_v40 }
 0xeea   :  { %3549 = vmatpush.msra.mxu2 %v8544_v22  ;;  %3575 = vmatpush.msra.mxu3 %v8524_v6 }
 0xeeb   :  { %v3211_v41 = vand.u32 4294901760, %v3210_v29  ;;  %3639 = vmatpush.msra.mxu1 %v8538_v17 }
 0xeec   :  { %3552 = vmatpush.msra.mxu2 %v8552_v26  ;;  %3577 = vmatpush.msra.mxu3 %v8531_v12 }
 0xeed   :  { %3212 = vmatmul.f32.vlgmr.msra.gmra.mxu0 %v3211_v41  ;;  %3416 = vmatmul.f32.vlgmr.msrb.gmra.mxu1 %v3207_v59 }
 0xeee   :  { %3641 = vmatpush.msra.mxu1 %v8540_v18  ;;  %3555 = vmatpush.msra.mxu2 %v8560_v31 }
 0xeef   :  { %3487 = vmatmul.f32.vlgmr.msrb.gmra.mxu2 %v3486_v25  ;;  %3579 = vmatpush.msra.mxu3 %v8538_v17 }
 0xef0   :  { %3604 = vmatpush.msra.mxu0 %v8548_v24  ;;  %3714 = vmatpush.msrb.mxu2 %v8652_v1 }
 0xef1   :  { %3528 = vmatmul.f32.vlgmr.msrb.gmra.mxu3 %v3482_v48  ;;  %3846 = vmatpush.msrb.mxu1 %v8652_v1 }
 0xef2   :  { %3581 = vmatpush.msra.mxu3 %v8540_v18  ;;  %3608 = vmatpush.msra.mxu0 %v8557_v30 }
 0xef3   :  { %3716 = vmatpush.msrb.mxu2 %v8654_v2  ;;  %3848 = vmatpush.msrb.mxu1 %v8654_v2 }
 0xef4   :  { %3751 = vmatpush.msrb.mxu3 %v8712_v35  ;;  %3612 = vmatpush.msra.mxu0 %v8565_v34 }
 0xef5   :  { %3387 = vmatmul.f32.vlgmr.msrb.gmra.mxu0 %v3207_v59  ;;  %3643 = vmatmul.f32.vlgmr.msra.gmra.mxu1 %v3482_v48 }
 0xef6   :  { %3616 = vmatpush.msra.mxu0 %v8572_v39  ;;  %3757 = vmatpush.msrb.mxu3 %v8714_v36 }
 0xef7   :  { %3558 = vmatmul.f32.vlgmr.msra.gmra.mxu2 %v3483_v51  ;;  %3850 = vmatpush.msrb.mxu1 %v8656_v3 }
 0xef8   :  { %3809 = vmatpush.msrb.mxu0 %v8669_v11  ;;  %3763 = vmatpush.msrb.mxu3 %v8722_v38 }
 0xef9   :  { %3718 = vmatpush.msrb.mxu2 %v8656_v3  ;;  %3585 = vmatmul.f32.vlgmr.msra.gmra.mxu3 %v3484_v47 }
 0xefa   :  { %3812 = vmatpush.msrb.mxu0 %v8672_v13  ;;  %3769 = vmatpush.msrb.mxu3 %v8730_v42 }
 0xefb   :  { %3720 = vmatpush.msrb.mxu2 %v8664_v8  ;;  %3852 = vmatpush.msrb.mxu1 %v8664_v8 }
 0xefc   :  { %3815 = vmatpush.msrb.mxu0 %v8675_v14  ;;  %3775 = vmatpush.msrb.mxu3 %v8734_v43 }
 0xefd   :  { %3722 = vmatpush.msrb.mxu2 %v8666_v10  ;;  %3618 = vmatmul.f32.vlgmr.msra.gmra.mxu0 %v3482_v48  ;;  %v10612_v48 = vld [vmem:[#allocation28_spill] sm:$0xff] }
 0xefe   :  { %3781 = vmatpush.msrb.mxu3 %v8781_v28  ;;  %3818 = vmatpush.msrb.mxu0 %v8680_v16 }
 0xeff   :  { %3724 = vmatpush.msrb.mxu2 %v8743_v52  ;;  %3854 = vmatpush.msrb.mxu1 %v8666_v10 }
 0xf00   :  { %3787 = vmatpush.msrb.mxu3 %v8793_v37  ;;  %3821 = vmatpush.msrb.mxu0 %v8683_v19 }
 0xf01   :  { %3726 = vmatpush.msrb.mxu2 %v8751_v55  ;;  %3856 = vmatpush.msrb.mxu1 %v8743_v52 }
 0xf02   :  { %3793 = vmatpush.msrb.mxu3 %v8801_v45  ;;  %3824 = vmatpush.msrb.mxu0 %v8749_v54 }
 0xf03   :  { %3728 = vmatpush.msrb.mxu2 %v8764_v63  ;;  %3858 = vmatpush.msrb.mxu1 %v8751_v55 }
 0xf04   :  { %3922 = vmatpush.msra.mxu3 %v8652_v1  ;;  %3827 = vmatpush.msrb.mxu0 %v8762_v62 }
 0xf05   :  { %3879 = vmatpush.msra.mxu2 %v8686_v20  ;;  %3860 = vmatpush.msrb.mxu1 %v8764_v63 }
 0xf06   :  { %3924 = vmatpush.msra.mxu3 %v8654_v2  ;;  %3830 = vmatpush.msrb.mxu0 %v10603_v46 }
 0xf07   :  { %3883 = vmatpush.msra.mxu2 %v10604_v61  ;;  %4030 = vmatpush.msra.mxu1 %v10605_v7 }
 0xf08   :  { %3926 = vmatpush.msra.mxu3 %v8656_v3  ;;  %3997 = vmatpush.msra.mxu0 %v8524_v6 }
 0xf09   :  { %3887 = vmatpush.msra.mxu2 %v10606_v0  ;;  %4036 = vmatpush.msra.mxu1 %v10607_v57 }
 0xf0a   :  { %3928 = vmatpush.msra.mxu3 %v8664_v8  ;;  %3999 = vmatpush.msra.mxu0 %v8531_v12 }
 0xf0b   :  { %3891 = vmatpush.msra.mxu2 %v10608_v44  ;;  %4042 = vmatpush.msra.mxu1 %v10609_v58 }
 0xf0c   :  { %3930 = vmatpush.msra.mxu3 %v8666_v10  ;;  %4001 = vmatpush.msra.mxu0 %v8538_v17 }
 0xf0d   :  { %3895 = vmatpush.msra.mxu2 %v10610_v4  ;;  %4048 = vmatpush.msra.mxu1 %v10611_v32 }
 0xf0e   :  { %3932 = vmatpush.msra.mxu3 %v8743_v52  ;;  %4003 = vmatpush.msra.mxu0 %v8540_v18 }
 0xf0f   :  { %3899 = vmatpush.msra.mxu2 %v10612_v48 }
 0xf10   :  { %3934 = vmatpush.msra.mxu3 %v8751_v55 }
 0xf11   :  { %3903 = vmatpush.msra.mxu2 %v10613_v50 }
 0xf12   :  { %3936 = vmatpush.msra.mxu3 %v8764_v63 }
 0xf13   :  { %3907 = vmatpush.msra.mxu2 %v10614_v33 }
 0xf62   :  { %v3274_v9 = vpop.f32.mrf.mxu1 }
 0xf6a   :  { %v3213_v27 = vpop.f32.mrf.mxu0  ;;  %v3312_v51 = vpop.f32.mrf.mxu2 }
 0xf6b   :  { %v3214_v60 = vadd.f32 %v10602_v53, %v3213_v27  ;;  %v3417_v25 = vpop.f32.mrf.mxu1 }
 0xf6c   :  { %v3343_v59 = vpop.f32.mrf.mxu3 }
 0xf6d   :  { %v3275_v47 = vadd.f32 %v3274_v9, %v3214_v60 }
 0xf6f   :  { %v3313_v49 = vadd.f32 %v3312_v51, %v3275_v47 }
 0xf71   :  { %v3344_v40 = vadd.f32 %v3343_v59, %v3313_v49 }
 0xf72   :  { %v3388_v23 = vpop.f32.mrf.mxu0  ;;  %v3488_v29 = vpop.f32.mrf.mxu2 }
 0xf73   :  { %v3389_v41 = vadd.f32 %v3388_v23, %v3344_v40  ;;  %v3644_v9 = vpop.f32.mrf.mxu1 }
 0xf74   :  { %v3529_v7 = vpop.f32.mrf.mxu3 }
 0xf75   :  { %v3418_v57 = vadd.f32 %v3417_v25, %v3389_v41  ;;  %v3530_v58 = vadd.f32 %v3529_v7, %v3488_v29 }
 0xf77   :  { %8208 = vtanh.f32 %v3418_v57  ;;  %v8080_v47 = vmul.f32 -1.442695, %v3418_v57 }
 0xf7a   :  { %v3559_v32 = vpop.f32.mrf.mxu2  ;;  %v3619_v44 = vpop.f32.mrf.mxu0 }
 0xf7b   :  { %v3560_v50 = vadd.f32 %v3559_v32, %v3530_v58 }
 0xf7c   :  { %v3586_v33 = vpop.f32.mrf.mxu3 }
 0xf7d   :  { %v8209_v48 = vpop.eup %8208  ;;  %v3587_v4 = vadd.f32 %v3586_v33, %v3560_v50 }
 0xf7e   :  { %3442 = vrot.lane.b32.xlu0 %v8209_v48, %s8424_s21 }
 0xf7f   :  { %v3620_v53 = vadd.f32 %v3619_v44, %v3587_v4 }
 0xf81   :  { %v3645_v27 = vadd.f32 %v3644_v9, %v3620_v53 }
 0xf83   :  { %v3648_v51 = vrot.slane %v3645_v27, 4 }
 0xf85   :  { %v3650_v60 = vadd.f32 %v3648_v51, %v9199_v21 }
 0xf87   :  { %8210 = vtanh.f32 %v3650_v60  ;;  %v8081_v23 = vmul.f32 -1.442695, %v3650_v60 }
 0xf88   :  { %8212 = vpow2.f32 %v8080_v47 }
 0xf8d   :  { %v8211_v59 = vpop.eup %8210 }
 0xf8e   :  { %3676 = vrot.lane.b32.xlu1 %v8211_v59, %s8424_s21  ;;  %v8213_v49 = vpop.eup %8212 }
 0xf8f   :  { %v3423_v40 = vadd.f32 1.0, %v8213_v49 }
 0xf91   :  { %8214 = vrcp.f32 %v3423_v40  ;;  %v3435_v7 = vand.u32 2147483648, %v3423_v40  ;;  %vm3429_vm11 = vweird.f32 %v3423_v40  ;;  %v3433_v58 = vand.u32 2147483647, %v3423_v40 }
 0xf92   :  { %8216 = vpow2.f32 %v8081_v23 }
 0xf93   :  { %v3436_v53 = vor.u32 1.1754944e-38, %v3435_v7  ;;  %vm3434_vm13 = vcmp.eq.f32.partialorder %v3433_v58, 8.507059e+37 }
 0xf97   :  { %v8215_v50 = vpop.eup %8214 }
 0xf98   :  { %v8217_v33 = vpop.eup %8216  ;;  %v3425_v48 = vmul.f32 %v8215_v50, %v3423_v40  ;;  %vm3430_vm10 = vweird.f32 %v8215_v50 }
 0xf99   :  { %v3654_v44 = vadd.f32 1.0, %v8217_v33  ;;  %vm3431_vm12 = vmor %vm3429_vm11, %vm3430_vm10 }
 0xf9a   :  { %v3426_v4 = vsub.f32 1.0, %v3425_v48 }
 0xf9b   :  { %8218 = vrcp.f32 %v3654_v44  ;;  %v3666_v49 = vand.u32 2147483648, %v3654_v44  ;;  %vm3660_vm15 = vweird.f32 %v3654_v44  ;;  %v3664_v23 = vand.u32 2147483647, %v3654_v44 }
 0xf9c   :  { %v3427_v29 = vmul.f32 %v8215_v50, %v3426_v4 }
 0xf9d   :  { %v3667_v40 = vor.u32 1.1754944e-38, %v3666_v49  ;;  %vm3665_vm2 = vcmp.eq.f32.partialorder %v3664_v23, 8.507059e+37 }
 0xf9e   :  { %v3428_v41 = vadd.f32 %v8215_v50, %v3427_v29 }
 0xfa0   :  { %v3432_v57 = vsel %vm3431_vm12, %v8215_v50, %v3428_v41 }
 0xfa1   :  { %v8219_v25 = vpop.eup %8218  ;;  %v3437_v27 = vsel %vm3434_vm13, %v3436_v53, %v3432_v57  ;;  %vm4722_vm13 = vcmask 1041408  }
 0xfa2   :  { %v3656_v32 = vmul.f32 %v8219_v25, %v3654_v44  ;;  %vm3661_vm14 = vweird.f32 %v8219_v25  ;;  %v3440_v29 = vmul.f32 %v3437_v27, %v9299_v56  ;;  %v3672_v44 = vrot.slane %v9304_v5, 6 }
 0xfa3   :  { %vm3662_vm1 = vmor %vm3660_vm15, %vm3661_vm14  ;;  %vm4501_vm14 = vcmask 261126   ;;  %vm4718_vm15 = vcmask 15360  }
 0xfa4   :  { %v3657_v60 = vsub.f32 1.0, %v3656_v32 }
 0xfa6   :  { %v3658_v59 = vmul.f32 %v8219_v25, %v3657_v60 }
 0xfa8   :  { %v3659_v47 = vadd.f32 %v8219_v25, %v3658_v59 }
 0xfaa   :  { %v3663_v33 = vsel %vm3662_vm1, %v8219_v25, %v3659_v47 }
 0xfab   :  { %v3668_v48 = vsel %vm3665_vm2, %v3667_v40, %v3663_v33 }
 0xfac   :  { %v3674_v25 = vmul.f32 %v3672_v44, %v3668_v48 }
 0xff0   :  { %v3443_v9 = vpop.permute.xlu0 %3442 }
 0xff1   :  { %v3445_v51 = vmul.f32 %v3443_v9, %v3437_v27 }
 0xff3   :  { %3447 = vrot.lane.b32.xlu2 %v3445_v51, %s8425_s22 }
0x1000   :  { %v3677_v50 = vpop.permute.xlu1 %3676 }
0x1001   :  { %v3679_v4 = vmul.f32 %v3677_v50, %v3668_v48 }
0x1003   :  { %3681 = vrot.lane.b32.xlu0 %v3679_v4, %s8425_s22 }
0x104d   :  { %v3448_v41 = vpop.permute.xlu2 %3447 }
0x104e   :  { %v9393_v7 = vadd.f32 %v3448_v41, %v3440_v29 }
0x1050   :  { %8220 = vtanh.f32 %v9393_v7 }
0x1056   :  { %v8221_v58 = vpop.eup %8220 }
0x1057   :  { %3453 = vrot.lane.b32.xlu1 %v8221_v58, %s8424_s21 }
0x1075   :  { %v3682_v57 = vpop.permute.xlu0 %3681 }
0x1076   :  { %v9398_v32 = vadd.f32 %v3682_v57, %v3674_v25 }
0x1078   :  { %8222 = vtanh.f32 %v9398_v32 }
0x107e   :  { %v8223_v53 = vpop.eup %8222 }
0x107f   :  { %3687 = vrot.lane.b32.xlu2 %v8223_v53, %s8424_s21 }
0x10c9   :  { %v3454_v56 = vpop.permute.xlu1 %3453 }
0x10ca   :  { %v3456_v9 = vmul.f32 %v3454_v56, %v3437_v27 }
0x10cc   :  { %v3696_v51 = vrot.slane %v3456_v9, 4 }
0x10ce   :  { %3697 = vrot.lane.b32.xlu1 %v3696_v51, %s8424_s21 }
0x10d9   :  { %v3688_v60 = vpop.permute.xlu2 %3687 }
0x10da   :  { %v3690_v59 = vmul.f32 %v3688_v60, %v3668_v48 }
0x10dc   :  { %v3979_v47 = vrot.slane %v3690_v59, 4  ;;  %3692 = vrot.lane.b32.xlu0 %v3690_v59, %s8425_s22 }
0x10de   :  { %3980 = vrot.lane.b32.xlu2 %v3979_v47, %s8425_s22 }
0x1138   :  { %v3981_v5 = vpop.permute.xlu2 %3980 }
0x1139   :  { %v3982_v49 = vsel %vm324_vm3, %v3981_v5, 0 }
0x113a   :  { %v4004_v23 = vand.u32 4294901760, %v3982_v49 }
0x113c   :  { %v4005_v27 = vsub.f32 %v3982_v49, %v4004_v23 }
0x113e   :  { %v4006_v58 = vand.u32 4294901760, %v4005_v27 }
0x1140   :  { %v3698_v33 = vpop.permute.xlu1 %3697  ;;  %v4007_v25 = vsub.f32 %v4005_v27, %v4006_v58 }
0x1142   :  { %v4008_v56 = vand.u32 4294901760, %v4007_v25 }
0x114e   :  { %v3693_v40 = vpop.permute.xlu0 %3692 }
0x114f   :  { %v3700_v50 = vsel %vm324_vm3, %v3693_v40, %v3698_v33 }
0x1150   :  { %v3702_v4 = vrot.slane %v3700_v50, 4 }
0x1152   :  { %v3703_v29 = vsel %vm576_vm8, %v3702_v4, 0 }
0x1153   :  { %v3729_v41 = vand.u32 4294901760, %v3703_v29 }
0x1155   :  { %v3730_v48 = vsub.f32 %v3703_v29, %v3729_v41  ;;  %3795 = vmatmul.f32.vlgmr.msrb.gmra.mxu3 %v3729_v41 }
0x1156   :  { %4157 = vmatpush.msrb.mxu3 %v8524_v6 }
0x1157   :  { %3833 = vmatmul.f32.vlgmr.msrb.gmra.mxu0 %v3730_v48  ;;  %v3731_v44 = vand.u32 4294901760, %v3730_v48 }
0x1158   :  { %4068 = vmatpush.msrb.mxu0 %v8534_v15  ;;  %4159 = vmatpush.msrb.mxu3 %v8531_v12  ;;  %v10617_v15 = vld [vmem:[#allocation28_spill] sm:$0xff] }
0x1159   :  { %3864 = vmatmul.f32.vlgmr.msrb.gmra.mxu1 %v3731_v44  ;;  %v3732_v57 = vsub.f32 %v3730_v48, %v3731_v44 }
0x115a   :  { %4071 = vmatpush.msrb.mxu0 %v8544_v22  ;;  %4097 = vmatpush.msrb.mxu1 %v8524_v6  ;;  %v10615_v6 = vld [vmem:[#allocation26_spill] sm:$0xff] }
0x115b   :  { %v3733_v53 = vand.u32 4294901760, %v3732_v57  ;;  %4161 = vmatpush.msrb.mxu3 %v8538_v17 }
0x115c   :  { %4074 = vmatpush.msrb.mxu0 %v8552_v26  ;;  %4099 = vmatpush.msrb.mxu1 %v8531_v12  ;;  %v10616_v12 = vld [vmem:[#allocation27_spill] sm:$0xff] }
0x115d   :  { %3734 = vmatmul.f32.vlgmr.msrb.gmra.mxu2 %v3733_v53  ;;  %3938 = vmatmul.f32.vlgmr.msra.gmra.mxu3 %v3729_v41 }
0x115e   :  { %4163 = vmatpush.msrb.mxu3 %v8540_v18  ;;  %4126 = vmatpush.msrb.mxu2 %v8548_v24 }
0x115f   :  { %4009 = vmatmul.f32.vlgmr.msra.gmra.mxu0 %v4008_v56  ;;  %4101 = vmatpush.msrb.mxu1 %v8538_v17  ;;  %v10618_v17 = vld [vmem:[#allocation29_spill] sm:$0xff] }
0x1160   :  { %4077 = vmatpush.msrb.mxu0 %v8560_v31  ;;  %4130 = vmatpush.msrb.mxu2 %v8557_v30 }
0x1161   :  { %4050 = vmatmul.f32.vlgmr.msra.gmra.mxu1 %v4004_v23  ;;  %4368 = vmatpush.msra.mxu3 %v8652_v1 }
0x1162   :  { %4236 = vmatpush.msra.mxu0 %v8652_v1  ;;  %4103 = vmatpush.msrb.mxu1 %v8540_v18  ;;  %v10619_v18 = vld [vmem:[#allocation31_spill] sm:$0xff] }
0x1163   :  { %4134 = vmatpush.msrb.mxu2 %v8565_v34  ;;  %4370 = vmatpush.msra.mxu3 %v8654_v2  ;;  %v9475_v34 = vld [vmem:[%s10472_s5] ss:$0 sm:$0xff] }
0x1164   :  { %4273 = vmatpush.msra.mxu1 %v8712_v35  ;;  %4238 = vmatpush.msra.mxu0 %v8654_v2 }
0x1165   :  { %4138 = vmatpush.msrb.mxu2 %v8572_v39  ;;  %4165 = vmatmul.f32.vlgmr.msrb.gmra.mxu3 %v4004_v23 }
0x1166   :  { %3909 = vmatmul.f32.vlgmr.msra.gmra.mxu2 %v3729_v41  ;;  %4279 = vmatpush.msra.mxu1 %v8714_v36 }
0x1167   :  { %4331 = vmatpush.msra.mxu2 %v8669_v11  ;;  %4080 = vmatmul.f32.vlgmr.msrb.gmra.mxu0 %v4005_v27 }
0x1168   :  { %4285 = vmatpush.msra.mxu1 %v8722_v38  ;;  %4240 = vmatpush.msra.mxu0 %v8656_v3 }
0x1169   :  { %4334 = vmatpush.msra.mxu2 %v8672_v13  ;;  %4107 = vmatmul.f32.vlgmr.msrb.gmra.mxu1 %v4006_v58 }
0x116a   :  { %4291 = vmatpush.msra.mxu1 %v8730_v42  ;;  %4242 = vmatpush.msra.mxu0 %v8664_v8 }
0x116b   :  { %4337 = vmatpush.msra.mxu2 %v8675_v14  ;;  %4372 = vmatpush.msra.mxu3 %v8656_v3 }
0x116c   :  { %4297 = vmatpush.msra.mxu1 %v8734_v43  ;;  %4244 = vmatpush.msra.mxu0 %v8666_v10 }
0x116d   :  { %4340 = vmatpush.msra.mxu2 %v8680_v16  ;;  %4374 = vmatpush.msra.mxu3 %v8664_v8 }
0x116e   :  { %4140 = vmatmul.f32.vlgmr.msrb.gmra.mxu2 %v4004_v23  ;;  %4303 = vmatpush.msra.mxu1 %v8781_v28 }
0x116f   :  { %4343 = vmatpush.msra.mxu2 %v8683_v19  ;;  %4246 = vmatpush.msra.mxu0 %v8743_v52 }
0x1170   :  { %4309 = vmatpush.msra.mxu1 %v8793_v37  ;;  %4376 = vmatpush.msra.mxu3 %v8666_v10 }
0x1171   :  { %4346 = vmatpush.msra.mxu2 %v8749_v54  ;;  %4248 = vmatpush.msra.mxu0 %v8751_v55 }
0x1172   :  { %4315 = vmatpush.msra.mxu1 %v8801_v45  ;;  %4378 = vmatpush.msra.mxu3 %v8743_v52 }
0x1173   :  { %4349 = vmatpush.msra.mxu2 %v8762_v62  ;;  %4250 = vmatpush.msra.mxu0 %v8764_v63 }
0x1174   :  { %4444 = vmatpush.msrb.mxu1 %v8652_v1  ;;  %4380 = vmatpush.msra.mxu3 %v8751_v55 }
0x1175   :  { %4352 = vmatpush.msra.mxu2 %v10603_v46  ;;  %4401 = vmatpush.msrb.mxu0 %v8686_v20 }
0x1176   :  { %4446 = vmatpush.msrb.mxu1 %v8654_v2  ;;  %4382 = vmatpush.msra.mxu3 %v8764_v63 }
0x1177   :  { %4405 = vmatpush.msrb.mxu0 %v10604_v61 }
0x1178   :  { %4448 = vmatpush.msrb.mxu1 %v8656_v3 }
0x1179   :  { %4409 = vmatpush.msrb.mxu0 %v10606_v0 }
0x117a   :  { %4450 = vmatpush.msrb.mxu1 %v8664_v8 }
0x117b   :  { %4413 = vmatpush.msrb.mxu0 %v10615_v6 }
0x117c   :  { %4452 = vmatpush.msrb.mxu1 %v8666_v10 }
0x117d   :  { %4417 = vmatpush.msrb.mxu0 %v10616_v12 }
0x117e   :  { %4454 = vmatpush.msrb.mxu1 %v8743_v52 }
0x117f   :  { %4421 = vmatpush.msrb.mxu0 %v10617_v15 }
0x1180   :  { %4456 = vmatpush.msrb.mxu1 %v8751_v55 }
0x1181   :  { %4425 = vmatpush.msrb.mxu0 %v10618_v17 }
0x1182   :  { %4458 = vmatpush.msrb.mxu1 %v8764_v63 }
0x1183   :  { %4429 = vmatpush.msrb.mxu0 %v10619_v18 }
0x11d4   :  { %v3834_v22 = vpop.f32.mrf.mxu0 }
0x11d6   :  { %v3865_v24 = vpop.f32.mrf.mxu1 }
0x11d8   :  { %v3796_v26 = vpop.f32.mrf.mxu3 }
0x11dc   :  { %v4010_v30 = vpop.f32.mrf.mxu0 }
0x11de   :  { %v4051_v1 = vpop.f32.mrf.mxu1 }
0x11df   :  { %v4052_v14 = vadd.f32 %v4051_v1, %v4010_v30 }
0x11e0   :  { %v3735_v31 = vpop.f32.mrf.mxu2  ;;  %v3939_v8 = vpop.f32.mrf.mxu3 }
0x11e1   :  { %v3736_v39 = vadd.f32 %v9475_v34, %v3735_v31 }
0x11e3   :  { %v3797_v2 = vadd.f32 %v3796_v26, %v3736_v39 }
0x11e4   :  { %v4081_v11 = vpop.f32.mrf.mxu0 }
0x11e5   :  { %v3835_v3 = vadd.f32 %v3834_v22, %v3797_v2  ;;  %v4082_v19 = vadd.f32 %v4081_v11, %v4052_v14  ;;  %v4194_v22 = vrot.slane %v9398_v32, 6  ;;  %v4527_v32 = vld [vmem:[#allocation6 + $0x18] sm:$0xff]  ;;  %v4526_v11 = vld [vmem:[#allocation6 + $0x10] sm:$0xff] }
0x11e6   :  { %v4108_v35 = vpop.f32.mrf.mxu1  ;;  %v9502_v14 = vand.u32 4294901760, %v4526_v11 }
0x11e7   :  { %v3866_v10 = vadd.f32 %v3865_v24, %v3835_v3  ;;  %v4109_v36 = vadd.f32 %v4108_v35, %v4082_v19 }
0x11e8   :  { %v4166_v43 = vpop.f32.mrf.mxu3  ;;  %v9511_v35 = vsub.f32 %v4526_v11, %v9502_v14 }
0x11e9   :  { %v3910_v13 = vpop.f32.mrf.mxu2 }
0x11ea   :  { %v3911_v16 = vadd.f32 %v3910_v13, %v3866_v10  ;;  %v9496_v10 = vand.u32 4294901760, %v4527_v32 }
0x11ec   :  { %v3940_v20 = vadd.f32 %v3939_v8, %v3911_v16  ;;  %4546 = vmatpush.msrb.mxu2 %v9496_v10  ;;  %v9500_v13 = vsub.f32 %v4527_v32, %v9496_v10  ;;  %v4525_v16 = vld [vmem:[#allocation6 + $0x8] sm:$0xff] }
0x11ee   :  { %8224 = vtanh.f32 %v3940_v20  ;;  %v8082_v28 = vmul.f32 -1.442695, %v3940_v20  ;;  %4548 = vmatpush.msrb.mxu2 %v9502_v14  ;;  %v9506_v19 = vand.u32 4294901760, %v9500_v13  ;;  %v9508_v20 = vand.u32 4294901760, %v4525_v16 }
0x11f0   :  { %4550 = vmatpush.msrb.mxu2 %v9508_v20 }
0x11f1   :  { %v4141_v38 = vpop.f32.mrf.mxu2 }
0x11f2   :  { %v4142_v42 = vadd.f32 %v4141_v38, %v4109_v36  ;;  %v4524_v36 = vld [vmem:[#allocation6] sm:$0xff]  ;;  %v4577_v38 = vsub.f32 %v9500_v13, %v9506_v19 }
0x11f4   :  { %v8225_v52 = vpop.eup %8224  ;;  %v4167_v54 = vadd.f32 %v4166_v43, %v4142_v42  ;;  %v9517_v42 = vand.u32 4294901760, %v9511_v35  ;;  %v9519_v43 = vand.u32 4294901760, %v4524_v36 }
0x11f5   :  { %3964 = vrot.lane.b32.xlu0 %v8225_v52, %s8424_s21  ;;  %v9522_v52 = vsub.f32 %v4525_v16, %v9508_v20 }
0x11f6   :  { %v4170_v55 = vrot.slane %v4167_v54, 2  ;;  %v9524_v54 = vand.u32 4294901760, %v4577_v38  ;;  %4552 = vmatpush.msrb.mxu2 %v9519_v43 }
0x11f8   :  { %v4172_v62 = vadd.f32 %v4170_v55, %v9199_v21  ;;  %v4583_v55 = vsub.f32 %v9511_v35, %v9517_v42  ;;  %4579 = vmatpush.msrb.mxu3 %v9524_v54 }
0x11fa   :  { %8226 = vtanh.f32 %v4172_v62  ;;  %v8083_v45 = vmul.f32 -1.442695, %v4172_v62  ;;  %v9530_v62 = vand.u32 4294901760, %v9522_v52 }
0x11fb   :  { %8228 = vpow2.f32 %v8082_v28  ;;  %v9536_v28 = vand.u32 4294901760, %v4583_v55 }
0x11fc   :  { %8230 = vpow2.f32 %v8083_v45 }
0x11fd   :  { %4585 = vmatpush.msrb.mxu3 %v9536_v28 }
0x1200   :  { %v8227_v63 = vpop.eup %8226 }
0x1201   :  { %4198 = vrot.lane.b32.xlu1 %v8227_v63, %s8424_s21  ;;  %v8229_v37 = vpop.eup %8228  ;;  %v9533_v63 = vsub.f32 %v4524_v36, %v9519_v43 }
0x1202   :  { %v3945_v46 = vadd.f32 1.0, %v8229_v37  ;;  %v8231_v61 = vpop.eup %8230  ;;  %v4589_v37 = vsub.f32 %v9522_v52, %v9530_v62 }
0x1203   :  { %v4176_v9 = vadd.f32 1.0, %v8231_v61  ;;  %v9541_v45 = vand.u32 4294901760, %v9533_v63 }
0x1204   :  { %8232 = vrcp.f32 %v3945_v46  ;;  %v3957_v49 = vand.u32 2147483648, %v3945_v46  ;;  %vm3951_vm5 = vweird.f32 %v3945_v46  ;;  %v3955_v23 = vand.u32 2147483647, %v3945_v46 }
0x1205   :  { %8234 = vrcp.f32 %v4176_v9  ;;  %v4188_v48 = vand.u32 2147483648, %v4176_v9  ;;  %vm4182_vm10 = vweird.f32 %v4176_v9  ;;  %v4186_v44 = vand.u32 2147483647, %v4176_v9 }
0x1206   :  { %v3958_v50 = vor.u32 1.1754944e-38, %v3957_v49  ;;  %vm3956_vm7 = vcmp.eq.f32.partialorder %v3955_v23, 8.507059e+37  ;;  %v4595_v61 = vsub.f32 %v9533_v63, %v9541_v45 }
0x1207   :  { %v4189_v57 = vor.u32 1.1754944e-38, %v4188_v48  ;;  %vm4187_vm12 = vcmp.eq.f32.partialorder %v4186_v44, 8.507059e+37 }
0x120a   :  { %v8233_v0 = vpop.eup %8232 }
0x120b   :  { %v3947_v51 = vmul.f32 %v8233_v0, %v3945_v46  ;;  %v8235_v47 = vpop.eup %8234  ;;  %vm3952_vm4 = vweird.f32 %v8233_v0  ;;  %v9544_v46 = vand.u32 4294901760, %v4589_v37 }
0x120c   :  { %v4178_v5 = vmul.f32 %v8235_v47, %v4176_v9  ;;  %vm3953_vm6 = vmor %vm3951_vm5, %vm3952_vm4  ;;  %vm4183_vm9 = vweird.f32 %v8235_v47 }
0x120d   :  { %v3948_v60 = vsub.f32 1.0, %v3947_v51  ;;  %vm4184_vm11 = vmor %vm4182_vm10, %vm4183_vm9  ;;  %4591 = vmatpush.msrb.mxu3 %v9544_v46  ;;  %v4523_v51 = vld [vmem:[%s10473_s6] sm:$0x3] }
0x120e   :  { %v4179_v40 = vsub.f32 1.0, %v4178_v5 }
0x120f   :  { %v3949_v59 = vmul.f32 %v8233_v0, %v3948_v60 }
0x1210   :  { %v4180_v41 = vmul.f32 %v8235_v47, %v4179_v40 }
0x1211   :  { %v3950_v21 = vadd.f32 %v8233_v0, %v3949_v59  ;;  %v4724_v59 = vsel %vm4722_vm13, %v4523_v51, 0 }
0x1212   :  { %v4181_v58 = vadd.f32 %v8235_v47, %v4180_v41  ;;  %v4741_v23 = vand.u32 4294901760, %v4724_v59 }
0x1213   :  { %v3954_v33 = vsel %vm3953_vm6, %v8233_v0, %v3950_v21  ;;  %v9549_v0 = vand.u32 4294901760, %v4595_v61 }
0x1214   :  { %v3959_v27 = vsel %vm3956_vm7, %v3958_v50, %v3954_v33  ;;  %v4185_v25 = vsel %vm4184_vm11, %v8235_v47, %v4181_v58  ;;  %v4522_v58 = vld [vmem:[%s10480_s13] sm:$0x3] }
0x1215   :  { %v4190_v56 = vsel %vm4187_vm12, %v4189_v57, %v4185_v25  ;;  %v3962_v12 = vmul.f32 %v3959_v27, %v9393_v7  ;;  %4597 = vmatpush.msrb.mxu3 %v9549_v0  ;;  %v4720_v25 = vsel %vm4718_vm15, %v4522_v58, 0 }
0x1216   :  { %v4196_v24 = vmul.f32 %v4194_v22, %v4190_v56 }
0x1267   :  { %v3965_v4 = vpop.permute.xlu0 %3964 }
0x1268   :  { %v3967_v29 = vmul.f32 %v3965_v4, %v3959_v27 }
0x126a   :  { %3969 = vrot.lane.b32.xlu2 %v3967_v29, %s8425_s22 }
0x1273   :  { %v4199_v53 = vpop.permute.xlu1 %4198 }
0x1274   :  { %v4201_v6 = vmul.f32 %v4199_v53, %v4190_v56 }
0x1276   :  { %4203 = vrot.lane.b32.xlu0 %v4201_v6, %s8425_s22 }
0x12c4   :  { %v3970_v15 = vpop.permute.xlu2 %3969 }
0x12c5   :  { %v9484_v17 = vadd.f32 %v3970_v15, %v3962_v12  ;;  %v4743_v12 = vand.u32 4294901760, %v4720_v25 }
0x12c7   :  { %8236 = vtanh.f32 %v9484_v17  ;;  %v4744_v22 = vsub.f32 %v4720_v25, %v4743_v12  ;;  %v8108_v25 = vld [vmem:[%s10475_s8] ss:$0 sm:$0xff] }
0x12cd   :  { %v8237_v18 = vpop.eup %8236 }
0x12ce   :  { %3975 = vrot.lane.b32.xlu1 %v8237_v18, %s8424_s21 }
0x12e8   :  { %v4204_v26 = vpop.permute.xlu0 %4203 }
0x12e9   :  { %v9489_v30 = vadd.f32 %v4204_v26, %v4196_v24  ;;  %v4745_v24 = vand.u32 4294901760, %v4744_v22 }
0x12eb   :  { %10620 = vst [vmem:[#allocation18_spill] sm:$0xff] %v9489_v30  ;;  %8238 = vtanh.f32 %v9489_v30  ;;  %v4746_v26 = vsub.f32 %v4744_v22, %v4745_v24 }
0x12f1   :  { %v8239_v31 = vpop.eup %8238 }
0x12f2   :  { %4209 = vrot.lane.b32.xlu2 %v8239_v31, %s8424_s21  ;;  %v4747_v31 = vand.u32 4294901760, %v4746_v26 }
0x1340   :  { %v3976_v7 = vpop.permute.xlu1 %3975 }
0x1341   :  { %v3978_v39 = vmul.f32 %v3976_v7, %v3959_v27  ;;  %v4768_v27 = vsub.f32 %v4724_v59, %v4741_v23 }
0x1343   :  { %v4218_v1 = vrot.slane %v3978_v39, 2  ;;  %v4769_v44 = vand.u32 4294901760, %v4768_v27 }
0x1345   :  { %4219 = vrot.lane.b32.xlu1 %v4218_v1, %s8424_s21  ;;  %v4770_v6 = vsub.f32 %v4768_v27, %v4769_v44 }
0x1347   :  { %v4771_v18 = vand.u32 4294901760, %v4770_v6 }
0x134c   :  { %v4210_v2 = vpop.permute.xlu2 %4209 }
0x134d   :  { %v4212_v3 = vmul.f32 %v4210_v2, %v4190_v56 }
0x134f   :  { %v4528_v8 = vrot.slane %v4212_v3, 6  ;;  %4214 = vrot.lane.b32.xlu0 %v4212_v3, %s8425_s22 }
0x1351   :  { %4529 = vrot.lane.b32.xlu2 %v4528_v8, %s8425_s22 }
0x13ab   :  { %v4530_v9 = vpop.permute.xlu2 %4529 }
0x13ac   :  { %v4531_v60 = vsel %vm324_vm3, %v4530_v9, 0 }
0x13ad   :  { %v4553_v47 = vand.u32 4294901760, %v4531_v60 }
0x13af   :  { %v4554_v40 = vsub.f32 %v4531_v60, %v4553_v47 }
0x13b1   :  { %v4555_v29 = vand.u32 4294901760, %v4554_v40 }
0x13b3   :  { %v4556_v57 = vsub.f32 %v4554_v40, %v4555_v29 }
0x13b5   :  { %v4557_v15 = vand.u32 4294901760, %v4556_v57 }
0x13b7   :  { %v4220_v21 = vpop.permute.xlu1 %4219 }
0x13c1   :  { %v4215_v5 = vpop.permute.xlu0 %4214 }
0x13c2   :  { %v4222_v49 = vsel %vm324_vm3, %v4215_v5, %v4220_v21  ;;  %4502 = vst.msk [vmem:[#allocation2 - $0x6] sm:$0xc0] %vm4501_vm14, %v4215_v5 }
0x13c3   :  { %v4224_v33 = vrot.slane %v4222_v49, 6 }
0x13c5   :  { %v4225_v50 = vsel %vm576_vm8, %v4224_v33, 0 }
0x13c6   :  { %v4251_v4 = vand.u32 4294901760, %v4225_v50 }
0x13c8   :  { %v4252_v41 = vsub.f32 %v4225_v50, %v4251_v4  ;;  %4317 = vmatmul.f32.vlgmr.msra.gmra.mxu1 %v4251_v4 }
0x13c9   :  { %4706 = vmatpush.msra.mxu1 %v9496_v10 }
0x13ca   :  { %v4253_v48 = vand.u32 4294901760, %v4252_v41  ;;  %4355 = vmatmul.f32.vlgmr.msra.gmra.mxu2 %v4252_v41 }
0x13cb   :  { %4617 = vmatpush.msra.mxu2 %v9500_v13  ;;  %4708 = vmatpush.msra.mxu1 %v9502_v14 }
0x13cc   :  { %v4254_v53 = vsub.f32 %v4252_v41, %v4253_v48  ;;  %4386 = vmatmul.f32.vlgmr.msra.gmra.mxu3 %v4253_v48 }
0x13cd   :  { %4620 = vmatpush.msra.mxu2 %v9511_v35  ;;  %4646 = vmatpush.msra.mxu3 %v9496_v10 }
0x13ce   :  { %v4255_v56 = vand.u32 4294901760, %v4254_v53  ;;  %4710 = vmatpush.msra.mxu1 %v9508_v20 }
0x13cf   :  { %4623 = vmatpush.msra.mxu2 %v9522_v52  ;;  %4648 = vmatpush.msra.mxu3 %v9502_v14 }
0x13d0   :  { %4256 = vmatmul.f32.vlgmr.msra.gmra.mxu0 %v4255_v56  ;;  %4460 = vmatmul.f32.vlgmr.msrb.gmra.mxu1 %v4251_v4 }
0x13d1   :  { %4712 = vmatpush.msra.mxu1 %v9519_v43  ;;  %4626 = vmatpush.msra.mxu2 %v9533_v63 }
0x13d2   :  { %4558 = vmatmul.f32.vlgmr.msrb.gmra.mxu2 %v4557_v15  ;;  %4650 = vmatpush.msra.mxu3 %v9508_v20 }
0x13d3   :  { %4675 = vmatpush.msra.mxu0 %v9506_v19  ;;  %4742 = vmatpush.msrb.mxu2 %v4741_v23 }
0x13d4   :  { %4599 = vmatmul.f32.vlgmr.msrb.gmra.mxu3 %v4553_v47  ;;  %4818 = vmatpush.msrb.mxu1 %v4741_v23 }
0x13d5   :  { %4652 = vmatpush.msra.mxu3 %v9519_v43  ;;  %4679 = vmatpush.msra.mxu0 %v9517_v42 }
0x13d7   :  { %4772 = vmatpush.msrb.mxu3 %v4771_v18  ;;  %4683 = vmatpush.msra.mxu0 %v9530_v62 }
0x13d8   :  { %4431 = vmatmul.f32.vlgmr.msrb.gmra.mxu0 %v4251_v4  ;;  %4714 = vmatmul.f32.vlgmr.msra.gmra.mxu1 %v4553_v47 }
0x13d9   :  { %4687 = vmatpush.msra.mxu0 %v9541_v45 }
0x13da   :  { %4629 = vmatmul.f32.vlgmr.msra.gmra.mxu2 %v4554_v40 }
0x13db   :  { %4795 = vmatpush.msrb.mxu0 %v4768_v27  ;;  %4844 = vmatpush.msra.mxu2 %v4769_v44 }
0x13dc   :  { %4656 = vmatmul.f32.vlgmr.msra.gmra.mxu3 %v4555_v29 }
0x13dd   :  { %4866 = vmatpush.msra.mxu3 %v4741_v23 }
0x13e0   :  { %4689 = vmatmul.f32.vlgmr.msra.gmra.mxu0 %v4553_v47  ;;  %4822 = vmatmul.f32.vlgmr.msrb.gmra.mxu1 %v4745_v24 }
0x13e2   :  { %4748 = vmatmul.f32.vlgmr.msrb.gmra.mxu2 %v4747_v31 }
0x13e4   :  { %4774 = vmatmul.f32.vlgmr.msrb.gmra.mxu3 %v4743_v12 }
0x13e8   :  { %4798 = vmatmul.f32.vlgmr.msrb.gmra.mxu0 %v4744_v22 }
0x13ea   :  { %4846 = vmatmul.f32.vlgmr.msra.gmra.mxu2 %v4743_v12 }
0x13ec   :  { %4868 = vmatmul.f32.vlgmr.msra.gmra.mxu3 %v4743_v12 }
0x1445   :  { %v4318_v7 = vpop.f32.mrf.mxu1 }
0x144d   :  { %v4257_v39 = vpop.f32.mrf.mxu0  ;;  %v4356_v1 = vpop.f32.mrf.mxu2 }
0x144e   :  { %v4258_v2 = vadd.f32 %v9475_v34, %v4257_v39  ;;  %v4461_v55 = vpop.f32.mrf.mxu1 }
0x144f   :  { %v4387_v3 = vpop.f32.mrf.mxu3 }
0x1450   :  { %v4319_v8 = vadd.f32 %v4318_v7, %v4258_v2 }
0x1452   :  { %v4357_v32 = vadd.f32 %v4356_v1, %v4319_v8 }
0x1454   :  { %v4388_v11 = vadd.f32 %v4387_v3, %v4357_v32 }
0x1455   :  { %v4432_v16 = vpop.f32.mrf.mxu0  ;;  %v4559_v36 = vpop.f32.mrf.mxu2 }
0x1456   :  { %v4433_v38 = vadd.f32 %v4432_v16, %v4388_v11  ;;  %v4715_v49 = vpop.f32.mrf.mxu1 }
0x1457   :  { %v4600_v37 = vpop.f32.mrf.mxu3 }
0x1458   :  { %v4462_v61 = vadd.f32 %v4461_v55, %v4433_v38  ;;  %v4601_v9 = vadd.f32 %v4600_v37, %v4559_v36 }
0x145a   :  { %8240 = vtanh.f32 %v4462_v61  ;;  %v8084_v12 = vmul.f32 -1.442695, %v4462_v61 }
0x145d   :  { %v4630_v51 = vpop.f32.mrf.mxu2  ;;  %v4690_v59 = vpop.f32.mrf.mxu0 }
0x145e   :  { %v4631_v60 = vadd.f32 %v4630_v51, %v4601_v9  ;;  %v4823_v29 = vpop.f32.mrf.mxu1 }
0x145f   :  { %v4657_v47 = vpop.f32.mrf.mxu3 }
0x1460   :  { %v8241_v21 = vpop.eup %8240  ;;  %v4658_v5 = vadd.f32 %v4657_v47, %v4631_v60 }
0x1461   :  { %4486 = vrot.lane.b32.xlu0 %v8241_v21, %s8424_s21 }
0x1462   :  { %v4691_v34 = vadd.f32 %v4690_v59, %v4658_v5 }
0x1464   :  { %v4716_v23 = vadd.f32 %v4715_v49, %v4691_v34 }
0x1465   :  { %v4749_v33 = vpop.f32.mrf.mxu2  ;;  %v4799_v4 = vpop.f32.mrf.mxu0 }
0x1466   :  { %v4750_v40 = vadd.f32 %v4749_v33, %v4716_v23 }
0x1467   :  { %v4775_v50 = vpop.f32.mrf.mxu3 }
0x1468   :  { %v4776_v27 = vadd.f32 %v4775_v50, %v4750_v40 }
0x146a   :  { %v4800_v41 = vadd.f32 %v4799_v4, %v4776_v27  ;;  %v4897_v4 = vrot.slane %v9489_v30, 6 }
0x146c   :  { %v4824_v58 = vadd.f32 %v4823_v29, %v4800_v41 }
0x146d   :  { %v4847_v48 = vpop.f32.mrf.mxu2 }
0x146e   :  { %v4848_v44 = vadd.f32 %v4847_v48, %v4824_v58 }
0x146f   :  { %v4869_v57 = vpop.f32.mrf.mxu3 }
0x1470   :  { %v4870_v53 = vadd.f32 %v4869_v57, %v4848_v44  ;;  %v4931_v57 = vld [vmem:[#allocation8 + $0x38] sm:$0xff] }
0x1472   :  { %v4876_v56 = vadd.f32 %v8108_v25, %v4870_v53  ;;  %v9603_v53 = vand.u32 4294901760, %v4931_v57 }
0x1474   :  { %8242 = vtanh.f32 %v4876_v56  ;;  %v8085_v24 = vmul.f32 -1.442695, %v4876_v56  ;;  %v4930_v56 = vld [vmem:[#allocation8 + $0x30] sm:$0xff]  ;;  %4948 = vmatpush.msra.mxu0 %v9603_v53  ;;  %5080 = vmatpush.msrb.mxu3 %v9603_v53 }
0x1475   :  { %8244 = vpow2.f32 %v8084_v12  ;;  %v4928_v12 = vld [vmem:[#allocation8 + $0x20] sm:$0xff] }
0x147a   :  { %v8243_v6 = vpop.eup %8242 }
0x147b   :  { %4901 = vrot.lane.b32.xlu1 %v8243_v6, %s8424_s21  ;;  %v8245_v15 = vpop.eup %8244  ;;  %v4929_v6 = vld [vmem:[#allocation8 + $0x28] sm:$0xff] }
0x147c   :  { %v4467_v18 = vadd.f32 1.0, %v8245_v15  ;;  %v9605_v15 = vand.u32 4294901760, %v4930_v56 }
0x147e   :  { %8246 = vrcp.f32 %v4467_v18  ;;  %v4479_v3 = vand.u32 2147483648, %v4467_v18  ;;  %vm4473_vm2 = vweird.f32 %v4467_v18  ;;  %v4477_v8 = vand.u32 2147483647, %v4467_v18  ;;  %4950 = vmatpush.msra.mxu0 %v9605_v15  ;;  %5082 = vmatpush.msrb.mxu3 %v9605_v15 }
0x147f   :  { %8248 = vpow2.f32 %v8085_v24  ;;  %v4927_v24 = vld [vmem:[#allocation8 + $0x18] sm:$0xff] }
0x1480   :  { %v4480_v11 = vor.u32 1.1754944e-38, %v4479_v3  ;;  %vm4478_vm5 = vcmp.eq.f32.partialorder %v4477_v8, 8.507059e+37  ;;  %v4924_v3 = vld [vmem:[#allocation8] sm:$0xff]  ;;  %v9623_v8 = vsub.f32 %v4930_v56, %v9605_v15 }
0x1484   :  { %v8247_v22 = vpop.eup %8246 }
0x1485   :  { %v4469_v26 = vmul.f32 %v8247_v22, %v4467_v18  ;;  %v8249_v39 = vpop.eup %8248  ;;  %vm4474_vm1 = vweird.f32 %v8247_v22  ;;  %v9607_v18 = vand.u32 4294901760, %v4929_v6 }
0x1486   :  { %v4880_v2 = vadd.f32 1.0, %v8249_v39  ;;  %vm4475_vm4 = vmor %vm4473_vm2, %vm4474_vm1  ;;  %v9615_v39 = vand.u32 4294901760, %v4927_v24 }
0x1487   :  { %v4470_v31 = vsub.f32 1.0, %v4469_v26  ;;  %v4926_v26 = vld [vmem:[#allocation8 + $0x10] sm:$0xff]  ;;  %4952 = vmatpush.msra.mxu0 %v9607_v18  ;;  %5084 = vmatpush.msrb.mxu3 %v9607_v18 }
0x1488   :  { %8250 = vrcp.f32 %v4880_v2  ;;  %v4892_v60 = vand.u32 2147483648, %v4880_v2  ;;  %vm4886_vm7 = vweird.f32 %v4880_v2  ;;  %v4890_v59 = vand.u32 2147483647, %v4880_v2 }
0x1489   :  { %v4471_v7 = vmul.f32 %v8247_v22, %v4470_v31  ;;  %v4925_v31 = vld [vmem:[#allocation8 + $0x8] sm:$0xff] }
0x148a   :  { %v4893_v21 = vor.u32 1.1754944e-38, %v4892_v60  ;;  %vm4891_vm10 = vcmp.eq.f32.partialorder %v4890_v59, 8.507059e+37 }
0x148b   :  { %v4472_v1 = vadd.f32 %v8247_v22, %v4471_v7  ;;  %v9612_v7 = vsub.f32 %v4931_v57, %v9603_v53 }
0x148d   :  { %v4476_v32 = vsel %vm4475_vm4, %v8247_v22, %v4472_v1  ;;  %v9609_v22 = vand.u32 4294901760, %v4928_v12  ;;  %v9617_v1 = vand.u32 4294901760, %v4926_v26  ;;  %5043 = vmatpush.msrb.mxu2 %v9612_v7  ;;  %vm5411_vm4 = vcmask 9216  }
0x148e   :  { %v4481_v36 = vsel %vm4478_vm5, %v4480_v11, %v4476_v32  ;;  %v8251_v55 = vpop.eup %8250  ;;  %v9626_v32 = vsub.f32 %v4929_v6, %v9607_v18 }
0x148f   :  { %v4882_v37 = vmul.f32 %v8251_v55, %v4880_v2  ;;  %vm4887_vm6 = vweird.f32 %v8251_v55  ;;  %v4484_v23 = vmul.f32 %v4481_v36, %v9484_v17  ;;  %v9620_v2 = vand.u32 4294901760, %v4925_v31  ;;  %5046 = vmatpush.msrb.mxu2 %v9623_v8  ;;  %4954 = vmatpush.msra.mxu0 %v9609_v22 }
0x1490   :  { %vm4888_vm9 = vmor %vm4886_vm7, %vm4887_vm6  ;;  %v9629_v11 = vsub.f32 %v4928_v12, %v9609_v22  ;;  %5086 = vmatpush.msrb.mxu3 %v9609_v22 }
0x1491   :  { %v4883_v61 = vsub.f32 1.0, %v4882_v37  ;;  %v9645_v37 = vand.u32 4294901760, %v9623_v8  ;;  %v9662_v59 = vsub.f32 %v4925_v31, %v9620_v2  ;;  %5049 = vmatpush.msrb.mxu2 %v9626_v32  ;;  %4956 = vmatpush.msra.mxu0 %v9615_v39 }
0x1492   :  { %5088 = vmatpush.msrb.mxu3 %v9615_v39 }
0x1493   :  { %v4884_v9 = vmul.f32 %v8251_v55, %v4883_v61  ;;  %v9648_v61 = vand.u32 4294901760, %v9626_v32  ;;  %10624 = vst [vmem:[#allocation22_spill] sm:$0xff] %v9662_v59  ;;  %5052 = vmatpush.msrb.mxu2 %v9629_v11  ;;  %4958 = vmatpush.msra.mxu0 %v9617_v1 }
0x1494   :  { %5090 = vmatpush.msrb.mxu3 %v9617_v1 }
0x1495   :  { %v4885_v51 = vadd.f32 %v8251_v55, %v4884_v9  ;;  %v9651_v9 = vand.u32 4294901760, %v9629_v11  ;;  %4960 = vmatpush.msra.mxu0 %v9620_v2 }
0x1496   :  { %5092 = vmatpush.msrb.mxu3 %v9620_v2 }
0x1497   :  { %v4889_v47 = vsel %vm4888_vm9, %v8251_v55, %v4885_v51  ;;  %v9642_v55 = vand.u32 4294901760, %v4924_v3 }
0x1498   :  { %v4894_v49 = vsel %vm4891_vm10, %v4893_v21, %v4889_v47  ;;  %v4989_v47 = vsub.f32 %v9623_v8, %v9645_v37  ;;  %v4995_v21 = vsub.f32 %v9626_v32, %v9648_v61 }
0x1499   :  { %v4899_v27 = vmul.f32 %v4897_v4, %v4894_v49  ;;  %4962 = vmatpush.msra.mxu0 %v9642_v55  ;;  %5094 = vmatpush.msrb.mxu3 %v9642_v55 }
0x14d3   :  { %v4487_v16 = vpop.permute.xlu0 %4486 }
0x14d4   :  { %v4489_v38 = vmul.f32 %v4487_v16, %v4481_v36  ;;  %v9632_v16 = vand.u32 4294901760, %v9612_v7 }
0x14d6   :  { %4491 = vrot.lane.b32.xlu2 %v4489_v38, %s8425_s22  ;;  %v9640_v38 = vsub.f32 %v4926_v26, %v9617_v1  ;;  %v4983_v51 = vsub.f32 %v9612_v7, %v9632_v16  ;;  %5113 = vmatpush.msrb.mxu0 %v9632_v16 }
0x14d8   :  { %5117 = vmatpush.msrb.mxu0 %v9645_v37 }
0x14da   :  { %5121 = vmatpush.msrb.mxu0 %v9648_v61 }
0x14dc   :  { %5125 = vmatpush.msrb.mxu0 %v9651_v9 }
0x14ed   :  { %v4902_v5 = vpop.permute.xlu1 %4901 }
0x14ee   :  { %v4904_v34 = vmul.f32 %v4902_v5, %v4894_v49  ;;  %v9669_v5 = vand.u32 4294901760, %v4983_v51 }
0x14f0   :  { %4906 = vrot.lane.b32.xlu0 %v4904_v34, %s8425_s22  ;;  %v9674_v34 = vand.u32 4294901760, %v9640_v38  ;;  %4985 = vmatpush.msra.mxu1 %v9669_v5 }
0x1530   :  { %v4492_v33 = vpop.permute.xlu2 %4491 }
0x1531   :  { %v9589_v40 = vadd.f32 %v4492_v33, %v4484_v23  ;;  %v9679_v23 = vsub.f32 %v4924_v3, %v9642_v55  ;;  %v9681_v33 = vand.u32 4294901760, %v4989_v47 }
0x1533   :  { %10621 = vst [vmem:[#allocation20_spill] sm:$0xff] %v9589_v40  ;;  %8252 = vtanh.f32 %v9589_v40  ;;  %4991 = vmatpush.msra.mxu1 %v9681_v33 }
0x1534   :  { %10625 = vst [vmem:[#allocation23_spill] sm:$0xff] %v9679_v23 }
0x1539   :  { %v8253_v50 = vpop.eup %8252 }
0x153a   :  { %4497 = vrot.lane.b32.xlu1 %v8253_v50, %s8424_s21  ;;  %v9685_v50 = vand.u32 4294901760, %v4995_v21 }
0x153c   :  { %4997 = vmatpush.msra.mxu1 %v9685_v50 }
0x1562   :  { %v4907_v29 = vpop.permute.xlu0 %4906 }
0x1563   :  { %v9594_v41 = vadd.f32 %v4907_v29, %v4899_v27  ;;  %v9690_v27 = vand.u32 4294901760, %v9662_v59 }
0x1565   :  { %10622 = vst [vmem:[#allocation19_spill] sm:$0xff] %v9594_v41  ;;  %8254 = vtanh.f32 %v9594_v41 }
0x1566   :  { %10626 = vst [vmem:[#allocation32_spill] sm:$0xff] %v9690_v27 }
0x156b   :  { %v8255_v58 = vpop.eup %8254 }
0x156c   :  { %4912 = vrot.lane.b32.xlu2 %v8255_v58, %s8424_s21  ;;  %v5013_v58 = vsub.f32 %v9640_v38, %v9674_v34 }
0x156e   :  { %v9715_v57 = vand.u32 4294901760, %v5013_v58  ;;  %v8109_v58 = vld [vmem:[%s10477_s10] ss:$0 sm:$0xff] }
0x15ac   :  { %v4498_v17 = vpop.permute.xlu1 %4497 }
0x15ad   :  { %v9598_v48 = vmul.f32 %v4498_v17, %v4481_v36  ;;  %v9635_v36 = vsub.f32 %v4927_v24, %v9615_v39  ;;  %v9701_v17 = vand.u32 4294901760, %v9679_v23 }
0x15af   :  { %10623 = vst [vmem:[#allocation21_spill] sm:$0xff] %v9598_v48  ;;  %4920 = vrot.lane.b32.xlu1 %v9598_v48, %s8424_s21  ;;  %v9657_v60 = vand.u32 4294901760, %v9635_v36  ;;  %5055 = vmatpush.msrb.mxu2 %v9635_v36  ;;  %v5025_v56 = vsub.f32 %v9679_v23, %v9701_v17 }
0x15b0   :  { %10627 = vst [vmem:[#allocation30_spill] sm:$0xff] %v9701_v17 }
0x15b1   :  { %v5007_v4 = vsub.f32 %v9635_v36, %v9657_v60  ;;  %5058 = vmatpush.msrb.mxu2 %v9640_v38  ;;  %v9728_v12 = vand.u32 4294901760, %v5025_v56  ;;  %5129 = vmatpush.msrb.mxu0 %v9657_v60 }
0x15b3   :  { %5061 = vmatpush.msrb.mxu2 %v9662_v59  ;;  %5133 = vmatpush.msrb.mxu0 %v9674_v34 }
0x15b5   :  { %5064 = vmatpush.msrb.mxu2 %v9679_v23  ;;  %5137 = vmatpush.msrb.mxu0 %v9690_v27 }
0x15b7   :  { %5141 = vmatpush.msrb.mxu0 %v9701_v17 }
0x15c6   :  { %v4913_v44 = vpop.permute.xlu2 %4912 }
0x15c7   :  { %v4915_v25 = vmul.f32 %v4913_v44, %v4894_v49  ;;  %v5001_v49 = vsub.f32 %v9629_v11, %v9651_v9  ;;  %v9707_v44 = vand.u32 4294901760, %v5007_v4 }
0x15c9   :  { %4917 = vrot.lane.b32.xlu0 %v4915_v25, %s8425_s22  ;;  %v9696_v29 = vand.u32 4294901760, %v5001_v49  ;;  %v5019_v25 = vsub.f32 %v9662_v59, %v9690_v27 }
0x15cb   :  { %5003 = vmatpush.msra.mxu1 %v9696_v29  ;;  %v9723_v6 = vand.u32 4294901760, %v5019_v25 }
0x15cd   :  { %5009 = vmatpush.msra.mxu1 %v9707_v44 }
0x15cf   :  { %5015 = vmatpush.msra.mxu1 %v9715_v57 }
0x15d1   :  { %5021 = vmatpush.msra.mxu1 %v9723_v6 }
0x15d3   :  { %5027 = vmatpush.msra.mxu1 %v9728_v12 }
0x15d5   :  { %5156 = vmatpush.msrb.mxu1 %v9603_v53 }
0x15d7   :  { %5158 = vmatpush.msrb.mxu1 %v9605_v15 }
0x15d9   :  { %5160 = vmatpush.msrb.mxu1 %v9607_v18 }
0x15db   :  { %5162 = vmatpush.msrb.mxu1 %v9609_v22 }
0x15dd   :  { %5164 = vmatpush.msrb.mxu1 %v9615_v39 }
0x15df   :  { %5166 = vmatpush.msrb.mxu1 %v9617_v1 }
0x15e1   :  { %5168 = vmatpush.msrb.mxu1 %v9620_v2 }
0x15e3   :  { %5170 = vmatpush.msrb.mxu1 %v9642_v55 }
0x1621   :  { %v4921_v24 = vpop.permute.xlu1 %4920 }
0x163b   :  { %v9747_v26 = vpop.permute.xlu0 %4917 }
0x163c   :  { %v4923_v31 = vsel %vm324_vm3, %v9747_v26, %v4921_v24 }
0x163d   :  { %v4937_v3 = vsel %vm576_vm8, %v4923_v31, 0 }
0x163e   :  { %v4963_v51 = vand.u32 4294901760, %v4937_v3 }
0x1640   :  { %v4964_v47 = vsub.f32 %v4937_v3, %v4963_v51  ;;  %5029 = vmatmul.f32.vlgmr.msra.gmra.mxu1 %v4963_v51 }
0x1642   :  { %v4965_v21 = vand.u32 4294901760, %v4964_v47  ;;  %5067 = vmatmul.f32.vlgmr.msrb.gmra.mxu2 %v4964_v47 }
0x1644   :  { %v4966_v49 = vsub.f32 %v4964_v47, %v4965_v21  ;;  %5098 = vmatmul.f32.vlgmr.msrb.gmra.mxu3 %v4965_v21 }
0x1646   :  { %v4967_v4 = vand.u32 4294901760, %v4966_v49 }
0x1648   :  { %4968 = vmatmul.f32.vlgmr.msra.gmra.mxu0 %v4967_v4  ;;  %5172 = vmatmul.f32.vlgmr.msrb.gmra.mxu1 %v4963_v51 }
0x1650   :  { %5143 = vmatmul.f32.vlgmr.msrb.gmra.mxu0 %v4963_v51 }
0x16bd   :  { %v5030_v25 = vpop.f32.mrf.mxu1 }
0x16c5   :  { %v4969_v56 = vpop.f32.mrf.mxu0  ;;  %v5068_v31 = vpop.f32.mrf.mxu2 }
0x16c6   :  { %v4970_v24 = vadd.f32 %v8109_v58, %v4969_v56  ;;  %v5173_v47 = vpop.f32.mrf.mxu1 }
0x16c7   :  { %v5099_v3 = vpop.f32.mrf.mxu3 }
0x16c8   :  { %v5031_v48 = vadd.f32 %v5030_v25, %v4970_v24 }
0x16ca   :  { %v5069_v30 = vadd.f32 %v5068_v31, %v5031_v48 }
0x16cc   :  { %v5100_v41 = vadd.f32 %v5099_v3, %v5069_v30 }
0x16cd   :  { %v5144_v23 = vpop.f32.mrf.mxu0 }
0x16ce   :  { %v5145_v17 = vadd.f32 %v5144_v23, %v5100_v41 }
0x16d0   :  { %v5174_v21 = vadd.f32 %v5173_v47, %v5145_v17 }
0x16d2   :  { %8256 = vtanh.f32 %v5174_v21  ;;  %v8086_v51 = vmul.f32 -1.442695, %v5174_v21 }
0x16d4   :  { %8258 = vpow2.f32 %v8086_v51 }
0x16d8   :  { %v8257_v49 = vpop.eup %8256 }
0x16d9   :  { %5198 = vrot.lane.b32.xlu2 %v8257_v49, %s8424_s21 }
0x16da   :  { %v8259_v4 = vpop.eup %8258 }
0x16db   :  { %v5179_v59 = vadd.f32 1.0, %v8259_v4  ;;  %v5215_v4 = vld [vmem:[#allocation9 + $0x10] sm:$0xff] }
0x16dd   :  { %8260 = vrcp.f32 %v5179_v59  ;;  %v5191_v30 = vand.u32 2147483648, %v5179_v59  ;;  %vm5185_vm12 = vweird.f32 %v5179_v59  ;;  %v5189_v41 = vand.u32 2147483647, %v5179_v59 }
0x16df   :  { %v5192_v17 = vor.u32 1.1754944e-38, %v5191_v30  ;;  %vm5190_vm2 = vcmp.eq.f32.partialorder %v5189_v41, 8.507059e+37 }
0x16e3   :  { %v8261_v27 = vpop.eup %8260 }
0x16e4   :  { %v5181_v58 = vmul.f32 %v8261_v27, %v5179_v59  ;;  %vm5186_vm11 = vweird.f32 %v8261_v27  ;;  %v5216_v59 = vld [vmem:[#allocation9 + $0x18] sm:$0xff] }
0x16e5   :  { %vm5187_vm1 = vmor %vm5185_vm12, %vm5186_vm11 }
0x16e6   :  { %v5182_v25 = vsub.f32 1.0, %v5181_v58  ;;  %v9764_v58 = vand.u32 4294901760, %v5215_v4 }
0x16e8   :  { %v5183_v56 = vmul.f32 %v8261_v27, %v5182_v25 }
0x16ea   :  { %v5184_v48 = vadd.f32 %v8261_v27, %v5183_v56  ;;  %v9771_v56 = vsub.f32 %v5215_v4, %v9764_v58 }
0x16ec   :  { %v5188_v23 = vsel %vm5187_vm1, %v8261_v27, %v5184_v48  ;;  %v9762_v27 = vand.u32 4294901760, %v5216_v59  ;;  %v9778_v30 = vand.u32 4294901760, %v9771_v56 }
0x16ed   :  { %v5193_v31 = vsel %vm5190_vm2, %v5192_v17, %v5188_v23 }
0x16ee   :  { %v5196_v47 = vmul.f32 %v5193_v31, %v9589_v40  ;;  %v9767_v25 = vsub.f32 %v5216_v59, %v9762_v27  ;;  %5399 = vmatpush.msra.mxu1 %v9762_v27  ;;  %5239 = vmatpush.msra.mxu2 %v9762_v27  ;;  %10629 = vst [vmem:[#allocation14_spill] sm:$0xff] %v9778_v30  ;;  %v5213_v59 = vld [vmem:[#allocation9] sm:$0xff] }
0x16ef   :  { %v5276_v23 = vsub.f32 %v9771_v56, %v9778_v30 }
0x16f0   :  { %v9775_v48 = vand.u32 4294901760, %v9767_v25  ;;  %5401 = vmatpush.msra.mxu1 %v9764_v58  ;;  %5241 = vmatpush.msra.mxu2 %v9764_v58 }
0x16f2   :  { %v5270_v41 = vsub.f32 %v9767_v25, %v9775_v48  ;;  %5368 = vmatpush.msra.mxu0 %v9775_v48 }
0x16f4   :  { %v9787_v17 = vand.u32 4294901760, %v5270_v41  ;;  %5372 = vmatpush.msra.mxu0 %v9778_v30  ;;  %v9804_v41 = vand.u32 4294901760, %v5213_v59 }
0x16f6   :  { %5272 = vmatpush.msra.mxu3 %v9787_v17 }
0x1733   :  { %v5199_v24 = vpop.permute.xlu2 %5198 }
0x1734   :  { %v5201_v3 = vmul.f32 %v5199_v24, %v5193_v31  ;;  %v9789_v24 = vand.u32 4294901760, %v5276_v23 }
0x1736   :  { %5203 = vrot.lane.b32.xlu0 %v5201_v3, %s8425_s22  ;;  %5278 = vmatpush.msra.mxu3 %v9789_v24 }
0x17a8   :  { %v5204_v21 = vpop.permute.xlu0 %5203 }
0x17a9   :  { %v9758_v49 = vadd.f32 %v5204_v21, %v5196_v47  ;;  %v5214_v21 = vld [vmem:[#allocation9 + $0x8] sm:$0xff] }
0x17ab   :  { %10628 = vst [vmem:[#allocation24_spill] sm:$0xff] %v9758_v49  ;;  %8262 = vtanh.f32 %v9758_v49 }
0x17b1   :  { %v8263_v51 = vpop.eup %8262 }
0x17b2   :  { %5209 = vrot.lane.b32.xlu1 %v8263_v51, %s8424_s21  ;;  %v9798_v51 = vand.u32 4294901760, %v5214_v21 }
0x17b4   :  { %v9801_v4 = vsub.f32 %v5214_v21, %v9798_v51  ;;  %5403 = vmatpush.msra.mxu1 %v9798_v51  ;;  %5243 = vmatpush.msra.mxu2 %v9798_v51 }
0x17b6   :  { %v9808_v23 = vand.u32 4294901760, %v9801_v4  ;;  %5405 = vmatpush.msra.mxu1 %v9804_v41  ;;  %5245 = vmatpush.msra.mxu2 %v9804_v41 }
0x17b8   :  { %10630 = vst [vmem:[#allocation25_spill] sm:$0xff] %v9808_v23  ;;  %5533 = vmatpush.msrb.mxu1 %v9496_v10  ;;  %5310 = vmatpush.msrb.mxu2 %v9767_v25 }
0x17b9   :  { %5376 = vmatpush.msra.mxu0 %v9808_v23 }
0x17ba   :  { %5535 = vmatpush.msrb.mxu1 %v9502_v14  ;;  %5313 = vmatpush.msrb.mxu2 %v9771_v56 }
0x17bc   :  { %5537 = vmatpush.msrb.mxu1 %v9508_v20  ;;  %5316 = vmatpush.msrb.mxu2 %v9801_v4 }
0x17be   :  { %5539 = vmatpush.msrb.mxu1 %v9519_v43 }
0x1824   :  { %v5210_v3 = vpop.permute.xlu1 %5209 }
0x1825   :  { %v9794_v47 = vmul.f32 %v5210_v3, %v5193_v31  ;;  %v9811_v31 = vsub.f32 %v5213_v59, %v9804_v41  ;;  %v5282_v3 = vsub.f32 %v9801_v4, %v9808_v23 }
0x1827   :  { %5222 = vrot.lane.b32.xlu2 %v9794_v47, %s8425_s22  ;;  %10631 = vst [vmem:[#allocation15_spill] sm:$0xff] %v9811_v31  ;;  %v9821_v21 = vand.u32 4294901760, %v9811_v31  ;;  %v9825_v59 = vand.u32 4294901760, %v5282_v3  ;;  %5319 = vmatpush.msrb.mxu2 %v9811_v31 }
0x1829   :  { %10632 = vst [vmem:[#allocation16_spill] sm:$0xff] %v9821_v21  ;;  %v5288_v40 = vsub.f32 %v9811_v31, %v9821_v21  ;;  %5380 = vmatpush.msra.mxu0 %v9821_v21  ;;  %5284 = vmatpush.msra.mxu3 %v9825_v59 }
0x182b   :  { %5504 = vmatpush.msrb.mxu0 %v9500_v13  ;;  %v9833_v49 = vand.u32 4294901760, %v5288_v40  ;;  %v5418_v13 = vsel %vm324_vm3, %v9747_v26, 0 }
0x182c   :  { %v5440_v21 = vand.u32 4294901760, %v5418_v13 }
0x182d   :  { %5507 = vmatpush.msrb.mxu0 %v9511_v35  ;;  %5290 = vmatpush.msra.mxu3 %v9833_v49 }
0x182f   :  { %5339 = vmatpush.msrb.mxu3 %v9762_v27  ;;  %5510 = vmatpush.msrb.mxu0 %v9522_v52 }
0x1831   :  { %5341 = vmatpush.msrb.mxu3 %v9764_v58  ;;  %5513 = vmatpush.msrb.mxu0 %v9533_v63  ;;  %v5441_v63 = vsub.f32 %v5418_v13, %v5440_v21 }
0x1833   :  { %5343 = vmatpush.msrb.mxu3 %v9798_v51  ;;  %v5442_v26 = vand.u32 4294901760, %v5441_v63 }
0x1835   :  { %5345 = vmatpush.msrb.mxu3 %v9804_v41 }
0x1881   :  { %v5223_v35 = vpop.permute.xlu2 %5222 }
0x1882   :  { %v5224_v40 = vsel %vm324_vm3, %v5223_v35, 0 }
0x1883   :  { %v5246_v3 = vand.u32 4294901760, %v5224_v40 }
0x1885   :  { %v5247_v23 = vsub.f32 %v5224_v40, %v5246_v3  ;;  %5292 = vmatmul.f32.vlgmr.msra.gmra.mxu3 %v5246_v3  ;;  %5382 = vmatmul.f32.vlgmr.msra.gmra.mxu0 %v5246_v3 }
0x1886   :  { %5407 = vmatmul.f32.vlgmr.msra.gmra.mxu1 %v5246_v3  ;;  %5466 = vmatpush.msra.mxu3 %v9524_v54  ;;  %v5443_v54 = vsub.f32 %v5441_v63, %v5442_v26 }
0x1887   :  { %v5248_v52 = vand.u32 4294901760, %v5247_v23 }
0x1888   :  { %5472 = vmatpush.msra.mxu3 %v9536_v28 }
0x1889   :  { %v5249_v31 = vsub.f32 %v5247_v23, %v5248_v52 }
0x188a   :  { %5478 = vmatpush.msra.mxu3 %v9544_v46 }
0x188b   :  { %v5250_v30 = vand.u32 4294901760, %v5249_v31 }
0x188c   :  { %5484 = vmatpush.msra.mxu3 %v9549_v0 }
0x188d   :  { %5251 = vmatmul.f32.vlgmr.msra.gmra.mxu2 %v5250_v30  ;;  %5349 = vmatmul.f32.vlgmr.msrb.gmra.mxu3 %v5248_v52 }
0x188e   :  { %5516 = vmatmul.f32.vlgmr.msrb.gmra.mxu0 %v5441_v63  ;;  %5543 = vmatmul.f32.vlgmr.msrb.gmra.mxu1 %v5442_v26  ;;  %v8111_v63 = vld [vmem:[%s10475_s8] ss:$0 sm:$0xff] }
0x188f   :  { %5433 = vmatpush.msra.mxu2 %v9496_v10  ;;  %5593 = vmatpush.msrb.mxu3 %v9496_v10  ;;  %v5444_v10 = vand.u32 4294901760, %v5443_v54 }
0x1891   :  { %5435 = vmatpush.msra.mxu2 %v9502_v14  ;;  %5595 = vmatpush.msrb.mxu3 %v9502_v14  ;;  %v5413_v14 = vld [vmem:[%s10473_s6] sm:$0x3] }
0x1893   :  { %5437 = vmatpush.msra.mxu2 %v9508_v20  ;;  %5597 = vmatpush.msrb.mxu3 %v9508_v20  ;;  %v5609_v20 = vsel %vm4722_vm13, %v5413_v14, 0 }
0x1895   :  { %5322 = vmatmul.f32.vlgmr.msrb.gmra.mxu2 %v5247_v23  ;;  %5486 = vmatmul.f32.vlgmr.msra.gmra.mxu3 %v5440_v21 }
0x1896   :  { %5439 = vmatpush.msra.mxu2 %v9519_v43  ;;  %5599 = vmatpush.msrb.mxu3 %v9519_v43  ;;  %v5626_v43 = vand.u32 4294901760, %v5609_v20 }
0x1898   :  { %5562 = vmatpush.msrb.mxu2 %v9506_v19  ;;  %v5653_v28 = vsub.f32 %v5609_v20, %v5626_v43  ;;  %5627 = vmatpush.msra.mxu0 %v5626_v43 }
0x1899   :  { %5703 = vmatpush.msra.mxu3 %v5626_v43 }
0x189a   :  { %5566 = vmatpush.msrb.mxu2 %v9517_v42  ;;  %v5654_v19 = vand.u32 4294901760, %v5653_v28 }
0x189c   :  { %5570 = vmatpush.msrb.mxu2 %v9530_v62  ;;  %v5655_v42 = vsub.f32 %v5653_v28, %v5654_v19  ;;  %5729 = vmatpush.msrb.mxu0 %v5654_v19 }
0x189d   :  { %5445 = vmatmul.f32.vlgmr.msra.gmra.mxu2 %v5444_v10  ;;  %5601 = vmatmul.f32.vlgmr.msrb.gmra.mxu3 %v5440_v21 }
0x189e   :  { %5574 = vmatpush.msrb.mxu2 %v9541_v45  ;;  %5868 = vmatpush.msrb.mxu3 %v9669_v5  ;;  %v5656_v62 = vand.u32 4294901760, %v5655_v42  ;;  %v8110_v45 = vld [vmem:[%s10479_s12] ss:$0 sm:$0xff] }
0x18a0   :  { %5680 = vmatpush.msra.mxu2 %v5653_v28  ;;  %5874 = vmatpush.msrb.mxu3 %v9681_v33 }
0x18a1   :  { %5657 = vmatpush.msra.mxu1 %v5656_v62 }
0x18a2   :  { %5880 = vmatpush.msrb.mxu3 %v9685_v50 }
0x18a3   :  { %5751 = vmatpush.msrb.mxu1 %v5626_v43 }
0x18a4   :  { %5886 = vmatpush.msrb.mxu3 %v9696_v29 }
0x18a5   :  { %5576 = vmatmul.f32.vlgmr.msrb.gmra.mxu2 %v5440_v21 }
0x18a6   :  { %5831 = vmatpush.msrb.mxu2 %v9603_v53  ;;  %5892 = vmatpush.msrb.mxu3 %v9707_v44 }
0x18a8   :  { %5833 = vmatpush.msrb.mxu2 %v9605_v15  ;;  %5898 = vmatpush.msrb.mxu3 %v9715_v57 }
0x18aa   :  { %5835 = vmatpush.msrb.mxu2 %v9607_v18  ;;  %5904 = vmatpush.msrb.mxu3 %v9723_v6 }
0x18ac   :  { %5837 = vmatpush.msrb.mxu2 %v9609_v22  ;;  %5910 = vmatpush.msrb.mxu3 %v9728_v12 }
0x18ae   :  { %5839 = vmatpush.msrb.mxu2 %v9615_v39 }
0x18b0   :  { %5841 = vmatpush.msrb.mxu2 %v9617_v1 }
0x18b2   :  { %5843 = vmatpush.msrb.mxu2 %v9620_v2 }
0x18b4   :  { %5845 = vmatpush.msrb.mxu2 %v9642_v55 }
0x1902   :  { %v5383_v6 = vpop.f32.mrf.mxu0 }
0x1903   :  { %v5408_v23 = vpop.f32.mrf.mxu1 }
0x1908   :  { %v5293_v46 = vpop.f32.mrf.mxu3 }
0x1910   :  { %v5252_v0 = vpop.f32.mrf.mxu2  ;;  %v5350_v44 = vpop.f32.mrf.mxu3 }
0x1911   :  { %v5253_v5 = vadd.f32 %v8110_v45, %v5252_v0 }
0x1913   :  { %v5294_v33 = vadd.f32 %v5293_v46, %v5253_v5 }
0x1918   :  { %v5323_v50 = vpop.f32.mrf.mxu2 }
0x1919   :  { %v5324_v29 = vadd.f32 %v5323_v50, %v5294_v33 }
0x191b   :  { %v5351_v57 = vadd.f32 %v5350_v44, %v5324_v29 }
0x191d   :  { %v5384_v30 = vadd.f32 %v5383_v6, %v5351_v57  ;;  %v10637_v6 = vld [vmem:[#allocation19_spill] sm:$0xff] }
0x191f   :  { %v5409_v12 = vadd.f32 %v5408_v23, %v5384_v30 }
0x1921   :  { %5412 = vst.msk [vmem:[%s10481_s14] sm:$0x3] %vm5411_vm4, %v5409_v12  ;;  %v5606_v31 = vsel %vm4718_vm15, %v5409_v12, 0 }
0x1922   :  { %v5628_v21 = vand.u32 4294901760, %v5606_v31 }
0x1924   :  { %v5629_v13 = vsub.f32 %v5606_v31, %v5628_v21  ;;  %5659 = vmatmul.f32.vlgmr.msra.gmra.mxu1 %v5628_v21 }
0x1925   :  { %5963 = vmatpush.msra.mxu1 %v9603_v53 }
0x1926   :  { %5683 = vmatmul.f32.vlgmr.msra.gmra.mxu2 %v5629_v13  ;;  %v5630_v35 = vand.u32 4294901760, %v5629_v13 }
0x1927   :  { %5965 = vmatpush.msra.mxu1 %v9605_v15  ;;  %5996 = vmatpush.msra.mxu2 %v9632_v16 }
0x1928   :  { %5707 = vmatmul.f32.vlgmr.msra.gmra.mxu3 %v5630_v35  ;;  %v5631_v40 = vsub.f32 %v5629_v13, %v5630_v35 }
0x1929   :  { %5967 = vmatpush.msra.mxu1 %v9607_v18  ;;  %6039 = vmatpush.msra.mxu3 %v9603_v53  ;;  %v10633_v53 = vld [vmem:[#allocation32_spill] sm:$0xff] }
0x192a   :  { %v5632_v3 = vand.u32 4294901760, %v5631_v40  ;;  %6000 = vmatpush.msra.mxu2 %v9645_v37 }
0x192b   :  { %5969 = vmatpush.msra.mxu1 %v9609_v22  ;;  %6041 = vmatpush.msra.mxu3 %v9605_v15  ;;  %v10634_v15 = vld [vmem:[#allocation22_spill] sm:$0xff] }
0x192c   :  { %5633 = vmatmul.f32.vlgmr.msra.gmra.mxu0 %v5632_v3  ;;  %5753 = vmatmul.f32.vlgmr.msrb.gmra.mxu1 %v5628_v21 }
0x192d   :  { %5926 = vmatpush.msra.mxu0 %v9612_v7  ;;  %5971 = vmatpush.msra.mxu1 %v9615_v39  ;;  %v5446_v7 = vpop.f32.mrf.mxu2 }
0x192e   :  { %6043 = vmatpush.msra.mxu3 %v9607_v18  ;;  %6004 = vmatpush.msra.mxu2 %v9648_v61  ;;  %v10635_v18 = vld [vmem:[#allocation30_spill] sm:$0xff] }
0x192f   :  { %5929 = vmatpush.msra.mxu0 %v9623_v8  ;;  %5973 = vmatpush.msra.mxu1 %v9617_v1 }
0x1930   :  { %6045 = vmatpush.msra.mxu3 %v9609_v22  ;;  %6008 = vmatpush.msra.mxu2 %v9651_v9  ;;  %v10636_v22 = vld [vmem:[#allocation23_spill] sm:$0xff] }
0x1931   :  { %5932 = vmatpush.msra.mxu0 %v9626_v32  ;;  %5975 = vmatpush.msra.mxu1 %v9620_v2  ;;  %v5544_v32 = vpop.f32.mrf.mxu1 }
0x1932   :  { %6047 = vmatpush.msra.mxu3 %v9615_v39  ;;  %6012 = vmatpush.msra.mxu2 %v9657_v60  ;;  %v5487_v39 = vpop.f32.mrf.mxu3 }
0x1933   :  { %5935 = vmatpush.msra.mxu0 %v9629_v11  ;;  %5977 = vmatpush.msra.mxu1 %v9642_v55 }
0x1934   :  { %5731 = vmatmul.f32.vlgmr.msrb.gmra.mxu0 %v5628_v21  ;;  %6049 = vmatpush.msra.mxu3 %v9617_v1  ;;  %v5488_v1 = vadd.f32 %v5487_v39, %v5446_v7  ;;  %v10640_v39 = vld [vmem:[#allocation25_spill] sm:$0xff] }
0x1935   :  { %5938 = vmatpush.msra.mxu0 %v9635_v36  ;;  %6016 = vmatpush.msra.mxu2 %v9674_v34  ;;  %v5577_v11 = vpop.f32.mrf.mxu2 }
0x1936   :  { %6051 = vmatpush.msra.mxu3 %v9620_v2  ;;  %6155 = vmatpush.msrb.mxu1 %v9787_v17  ;;  %v5517_v2 = vpop.f32.mrf.mxu0 }
0x1937   :  { %5941 = vmatpush.msra.mxu0 %v9640_v38  ;;  %6020 = vmatpush.msra.mxu2 %v10633_v53  ;;  %v5518_v8 = vadd.f32 %v5517_v2, %v5488_v1 }
0x1938   :  { %6053 = vmatpush.msra.mxu3 %v9642_v55  ;;  %6161 = vmatpush.msrb.mxu1 %v9789_v24 }
0x1939   :  { %5944 = vmatpush.msra.mxu0 %v10634_v15  ;;  %6024 = vmatpush.msra.mxu2 %v10635_v18  ;;  %v5545_v16 = vadd.f32 %v5544_v32, %v5518_v8 }
0x193a   :  { %6167 = vmatpush.msrb.mxu1 %v9825_v59  ;;  %v5602_v38 = vpop.f32.mrf.mxu3 }
0x193b   :  { %5947 = vmatpush.msra.mxu0 %v10636_v22  ;;  %v5578_v36 = vadd.f32 %v5577_v11, %v5545_v16 }
0x193c   :  { %6173 = vmatpush.msrb.mxu1 %v9833_v49 }
0x193d   :  { %6122 = vmatpush.msrb.mxu0 %v9762_v27  ;;  %v5603_v55 = vadd.f32 %v5602_v38, %v5578_v36 }
0x193f   :  { %6124 = vmatpush.msrb.mxu0 %v9764_v58 }
0x1941   :  { %6126 = vmatpush.msrb.mxu0 %v9798_v51 }
0x1943   :  { %6128 = vmatpush.msrb.mxu0 %v9804_v41 }
0x19a1   :  { %v5660_v37 = vpop.f32.mrf.mxu1 }
0x19a9   :  { %v5634_v61 = vpop.f32.mrf.mxu0  ;;  %v5684_v34 = vpop.f32.mrf.mxu2 }
0x19aa   :  { %v5635_v9 = vadd.f32 %v5634_v61, %v5603_v55  ;;  %v5754_v26 = vpop.f32.mrf.mxu1 }
0x19ab   :  { %v5708_v17 = vpop.f32.mrf.mxu3 }
0x19ac   :  { %v5661_v60 = vadd.f32 %v5660_v37, %v5635_v9 }
0x19ae   :  { %v5685_v49 = vadd.f32 %v5684_v34, %v5661_v60 }
0x19b0   :  { %v5709_v24 = vadd.f32 %v5708_v17, %v5685_v49 }
0x19b1   :  { %v5732_v59 = vpop.f32.mrf.mxu0 }
0x19b2   :  { %v5733_v52 = vadd.f32 %v5732_v59, %v5709_v24 }
0x19b4   :  { %v5755_v54 = vadd.f32 %v5754_v26, %v5733_v52 }
0x19b6   :  { %v5761_v10 = vadd.f32 %v8111_v63, %v5755_v54 }
0x19b8   :  { %8264 = vtanh.f32 %v5761_v10  ;;  %v8087_v20 = vmul.f32 -1.442695, %v5761_v10 }
0x19ba   :  { %8266 = vpow2.f32 %v8087_v20  ;;  %v10642_v20 = vld [vmem:[#allocation24_spill] sm:$0xff] }
0x19be   :  { %v8265_v14 = vpop.eup %8264 }
0x19bf   :  { %5784 = vrot.lane.b32.xlu0 %v8265_v14, %s8424_s21 }
0x19c0   :  { %v8267_v43 = vpop.eup %8266 }
0x19c1   :  { %v5765_v28 = vadd.f32 1.0, %v8267_v43 }
0x19c3   :  { %8268 = vrcp.f32 %v5765_v28  ;;  %v5777_v0 = vand.u32 2147483648, %v5765_v28  ;;  %vm5771_vm6 = vweird.f32 %v5765_v28  ;;  %v5775_v5 = vand.u32 2147483647, %v5765_v28 }
0x19c5   :  { %v5778_v50 = vor.u32 1.1754944e-38, %v5777_v0  ;;  %vm5776_vm9 = vcmp.eq.f32.partialorder %v5775_v5, 8.507059e+37  ;;  %v6299_v5 = vld [vmem:[#allocation6 + $0x10] sm:$0xff] }
0x19c9   :  { %v8269_v19 = vpop.eup %8268 }
0x19ca   :  { %v5767_v42 = vmul.f32 %v8269_v19, %v5765_v28  ;;  %vm5772_vm5 = vweird.f32 %v8269_v19 }
0x19cb   :  { %vm5773_vm7 = vmor %vm5771_vm6, %vm5772_vm5 }
0x19cc   :  { %v5768_v62 = vsub.f32 1.0, %v5767_v42 }
0x19ce   :  { %v5769_v45 = vmul.f32 %v8269_v19, %v5768_v62 }
0x19d0   :  { %v5770_v46 = vadd.f32 %v8269_v19, %v5769_v45 }
0x19d2   :  { %v5774_v33 = vsel %vm5773_vm7, %v8269_v19, %v5770_v46  ;;  %v6300_v46 = vld [vmem:[#allocation6 + $0x18] sm:$0xff] }
0x19d3   :  { %v5779_v44 = vsel %vm5776_vm9, %v5778_v50, %v5774_v33  ;;  %v9981_v0 = vand.u32 4294901760, %v6300_v46  ;;  %v9987_v50 = vand.u32 4294901760, %v6299_v5 }
0x19d4   :  { %v5782_v30 = vmul.f32 %v5779_v44, %v10637_v6  ;;  %v6297_v6 = vld [vmem:[#allocation6] sm:$0xff] }
0x19d5   :  { %v9984_v33 = vsub.f32 %v6300_v46, %v9981_v0 }
0x1a31   :  { %v5785_v29 = vpop.permute.xlu0 %5784 }
0x1a32   :  { %v5787_v57 = vmul.f32 %v5785_v29, %v5779_v44  ;;  %v6298_v29 = vld [vmem:[#allocation6 + $0x8] sm:$0xff] }
0x1a34   :  { %5789 = vrot.lane.b32.xlu1 %v5787_v57, %s8425_s22  ;;  %v9994_v57 = vand.u32 4294901760, %v6298_v29 }
0x1a3c   :  { %5803 = vrot.lane.b32.xlu1 %v9794_v47, %s8424_s21 }
0x1aa6   :  { %v5790_v23 = vpop.permute.xlu1 %5789 }
0x1aa7   :  { %v9941_v12 = vadd.f32 %v5790_v23, %v5782_v30  ;;  %v9998_v30 = vsub.f32 %v6298_v29, %v9994_v57  ;;  %v10001_v23 = vand.u32 4294901760, %v6297_v6 }
0x1aa9   :  { %8270 = vtanh.f32 %v9941_v12 }
0x1aae   :  { %v5804_v35 = vpop.permute.xlu1 %5803 }
0x1aaf   :  { %v8271_v31 = vpop.eup %8270 }
0x1ab0   :  { %5795 = vrot.lane.b32.xlu2 %v8271_v31, %s8424_s21  ;;  %v10005_v31 = vsub.f32 %v6297_v6, %v10001_v23 }
0x1b0a   :  { %v5796_v21 = vpop.permute.xlu2 %5795 }
0x1b0b   :  { %v5798_v13 = vmul.f32 %v5796_v21, %v5779_v44  ;;  %v9991_v44 = vsub.f32 %v6299_v5, %v9987_v50  ;;  %v10010_v21 = vand.u32 4294901760, %v9984_v33 }
0x1b0d   :  { %5800 = vrot.lane.b32.xlu0 %v5798_v13, %s8425_s22  ;;  %v10013_v13 = vand.u32 4294901760, %v9991_v44 }
0x1b7f   :  { %v9946_v40 = vpop.permute.xlu0 %5800 }
0x1b80   :  { %v5806_v47 = vsel %vm324_vm3, %v9946_v40, %v5804_v35  ;;  %v6347_v35 = vsub.f32 %v9984_v33, %v10010_v21 }
0x1b81   :  { %v5820_v3 = vsel %vm576_vm8, %v5806_v47, 0  ;;  %v10018_v47 = vand.u32 4294901760, %v9998_v30 }
0x1b82   :  { %v5846_v53 = vand.u32 4294901760, %v5820_v3 }
0x1b84   :  { %v5847_v15 = vsub.f32 %v5820_v3, %v5846_v53  ;;  %5912 = vmatmul.f32.vlgmr.msrb.gmra.mxu3 %v5846_v53  ;;  %v6353_v3 = vsub.f32 %v9991_v44, %v10013_v13 }
0x1b85   :  { %6282 = vmatpush.msrb.mxu3 %v9762_v27 }
0x1b86   :  { %v5848_v18 = vand.u32 4294901760, %v5847_v15  ;;  %5950 = vmatmul.f32.vlgmr.msra.gmra.mxu0 %v5847_v15 }
0x1b87   :  { %6284 = vmatpush.msrb.mxu3 %v9764_v58  ;;  %6193 = vmatpush.msra.mxu0 %v9767_v25  ;;  %v10638_v25 = vld [vmem:[#allocation14_spill] sm:$0xff] }
0x1b88   :  { %v5849_v22 = vsub.f32 %v5847_v15, %v5848_v18  ;;  %5981 = vmatmul.f32.vlgmr.msra.gmra.mxu1 %v5848_v18  ;;  %v6301_v15 = vsel %vm324_vm3, %v9946_v40, 0 }
0x1b89   :  { %6286 = vmatpush.msrb.mxu3 %v9798_v51  ;;  %6222 = vmatpush.msra.mxu1 %v9762_v27  ;;  %v10639_v27 = vld [vmem:[#allocation15_spill] sm:$0xff] }
0x1b8a   :  { %v5850_v7 = vand.u32 4294901760, %v5849_v22  ;;  %6196 = vmatpush.msra.mxu0 %v9771_v56  ;;  %v10641_v56 = vld [vmem:[#allocation16_spill] sm:$0xff] }
0x1b8b   :  { %6288 = vmatpush.msrb.mxu3 %v9804_v41  ;;  %6224 = vmatpush.msra.mxu1 %v9764_v58  ;;  %v8112_v58 = vld [vmem:[%s10477_s10] ss:$0 sm:$0xff] }
0x1b8c   :  { %5851 = vmatmul.f32.vlgmr.msrb.gmra.mxu2 %v5850_v7  ;;  %6055 = vmatmul.f32.vlgmr.msra.gmra.mxu3 %v5846_v53  ;;  %v10028_v7 = vand.u32 4294901760, %v6347_v35 }
0x1b8d   :  { %6251 = vmatpush.msrb.mxu2 %v9775_v48  ;;  %6226 = vmatpush.msra.mxu1 %v9798_v51 }
0x1b8e   :  { %6199 = vmatpush.msra.mxu0 %v9801_v4  ;;  %6416 = vmatpush.msra.mxu3 %v9981_v0 }
0x1b8f   :  { %6255 = vmatpush.msrb.mxu2 %v10638_v25  ;;  %6228 = vmatpush.msra.mxu1 %v9804_v41  ;;  %v6359_v25 = vsub.f32 %v9998_v30, %v10018_v47 }
0x1b90   :  { %6202 = vmatpush.msra.mxu0 %v10639_v27  ;;  %6418 = vmatpush.msra.mxu3 %v9987_v50 }
0x1b91   :  { %6259 = vmatpush.msrb.mxu2 %v10640_v39  ;;  %v6323_v39 = vand.u32 4294901760, %v6301_v15  ;;  %v10037_v40 = vand.u32 4294901760, %v6359_v25 }
0x1b92   :  { %6420 = vmatpush.msra.mxu3 %v9994_v57 }
0x1b93   :  { %6263 = vmatpush.msrb.mxu2 %v10641_v56  ;;  %v10032_v56 = vand.u32 4294901760, %v6353_v3 }
0x1b94   :  { %6026 = vmatmul.f32.vlgmr.msra.gmra.mxu2 %v5846_v53  ;;  %6422 = vmatpush.msra.mxu3 %v10001_v23  ;;  %v10023_v53 = vand.u32 4294901760, %v10005_v31 }
0x1b95   :  { %6387 = vmatpush.msra.mxu2 %v9984_v33 }
0x1b97   :  { %6390 = vmatpush.msra.mxu2 %v9991_v44 }
0x1b99   :  { %6393 = vmatpush.msra.mxu2 %v9998_v30 }
0x1b9b   :  { %6396 = vmatpush.msra.mxu2 %v10005_v31 }
0x1c03   :  { %v5951_v4 = vpop.f32.mrf.mxu0 }
0x1c05   :  { %v5982_v32 = vpop.f32.mrf.mxu1 }
0x1c07   :  { %v5913_v48 = vpop.f32.mrf.mxu3 }
0x1c0f   :  { %v5852_v1 = vpop.f32.mrf.mxu2  ;;  %v6056_v36 = vpop.f32.mrf.mxu3 }
0x1c10   :  { %v5853_v51 = vadd.f32 %v8112_v58, %v5852_v1  ;;  %v6365_v58 = vsub.f32 %v10005_v31, %v10023_v53 }
0x1c12   :  { %v5914_v2 = vadd.f32 %v5913_v48, %v5853_v51  ;;  %v6324_v51 = vsub.f32 %v6301_v15, %v6323_v39 }
0x1c14   :  { %v5952_v8 = vadd.f32 %v5951_v4, %v5914_v2  ;;  %v10040_v2 = vand.u32 4294901760, %v6365_v58 }
0x1c16   :  { %v5983_v11 = vadd.f32 %v5982_v32, %v5952_v8  ;;  %v6325_v32 = vand.u32 4294901760, %v6324_v51 }
0x1c17   :  { %v6027_v41 = vpop.f32.mrf.mxu2 }
0x1c18   :  { %v6028_v16 = vadd.f32 %v6027_v41, %v5983_v11  ;;  %v6326_v11 = vsub.f32 %v6324_v51, %v6325_v32 }
0x1c1a   :  { %v6057_v38 = vadd.f32 %v6056_v36, %v6028_v16  ;;  %v6327_v41 = vand.u32 4294901760, %v6326_v11  ;;  %v6296_v16 = vld [vmem:[%s10473_s6] sm:$0x3] }
0x1c1b   :  { %v6492_v36 = vsel %vm4722_vm13, %v6296_v16, 0 }
0x1c1c   :  { %8272 = vtanh.f32 %v6057_v38  ;;  %v8088_v37 = vmul.f32 -1.442695, %v6057_v38  ;;  %v6509_v38 = vand.u32 4294901760, %v6492_v36 }
0x1c1e   :  { %8274 = vpow2.f32 %v8088_v37 }
0x1c22   :  { %v8273_v55 = vpop.eup %8272 }
0x1c23   :  { %6081 = vrot.lane.b32.xlu2 %v8273_v55, %s8424_s21  ;;  %v6536_v55 = vsub.f32 %v6492_v36, %v6509_v38 }
0x1c24   :  { %v8275_v61 = vpop.eup %8274 }
0x1c25   :  { %v6062_v9 = vadd.f32 1.0, %v8275_v61  ;;  %v6537_v37 = vand.u32 4294901760, %v6536_v55 }
0x1c27   :  { %8276 = vrcp.f32 %v6062_v9  ;;  %v6074_v59 = vand.u32 2147483648, %v6062_v9  ;;  %vm6068_vm11 = vweird.f32 %v6062_v9  ;;  %v6072_v52 = vand.u32 2147483647, %v6062_v9 }
0x1c28   :  { %v6538_v61 = vsub.f32 %v6536_v55, %v6537_v37 }
0x1c29   :  { %v6075_v26 = vor.u32 1.1754944e-38, %v6074_v59  ;;  %vm6073_vm1 = vcmp.eq.f32.partialorder %v6072_v52, 8.507059e+37 }
0x1c2d   :  { %v8277_v60 = vpop.eup %8276 }
0x1c2e   :  { %v6064_v34 = vmul.f32 %v8277_v60, %v6062_v9  ;;  %vm6069_vm10 = vweird.f32 %v8277_v60  ;;  %v6539_v9 = vand.u32 4294901760, %v6538_v61 }
0x1c2f   :  { %vm6070_vm12 = vmor %vm6068_vm11, %vm6069_vm10 }
0x1c30   :  { %v6065_v49 = vsub.f32 1.0, %v6064_v34 }
0x1c32   :  { %v6066_v17 = vmul.f32 %v8277_v60, %v6065_v49 }
0x1c34   :  { %v6067_v24 = vadd.f32 %v8277_v60, %v6066_v17 }
0x1c36   :  { %v6071_v63 = vsel %vm6070_vm12, %v8277_v60, %v6067_v24  ;;  %v8113_v60 = vld [vmem:[%s10479_s12] ss:$0 sm:$0xff] }
0x1c37   :  { %v6076_v10 = vsel %vm6073_vm1, %v6075_v26, %v6071_v63 }
0x1c38   :  { %v6079_v43 = vmul.f32 %v6076_v10, %v10642_v20 }
0x1c7d   :  { %v6082_v54 = vpop.permute.xlu2 %6081 }
0x1c7e   :  { %v6084_v14 = vmul.f32 %v6082_v54, %v6076_v10 }
0x1c80   :  { %6086 = vrot.lane.b32.xlu0 %v6084_v14, %s8425_s22 }
0x1cf2   :  { %v6087_v28 = vpop.permute.xlu0 %6086 }
0x1cf3   :  { %v9973_v19 = vadd.f32 %v6087_v28, %v6079_v43 }
0x1cf5   :  { %8278 = vtanh.f32 %v9973_v19 }
0x1cfb   :  { %v8279_v42 = vpop.eup %8278 }
0x1cfc   :  { %6092 = vrot.lane.b32.xlu1 %v8279_v42, %s8424_s21 }
0x1d6e   :  { %v6093_v62 = vpop.permute.xlu1 %6092 }
0x1d6f   :  { %v9977_v45 = vmul.f32 %v6093_v62, %v6076_v10 }
0x1d71   :  { %6105 = vrot.lane.b32.xlu2 %v9977_v45, %s8425_s22 }
0x1dcb   :  { %v6106_v18 = vpop.permute.xlu2 %6105 }
0x1dcc   :  { %v6107_v22 = vsel %vm324_vm3, %v6106_v18, 0 }
0x1dcd   :  { %v6129_v27 = vand.u32 4294901760, %v6107_v22 }
0x1dcf   :  { %v6130_v48 = vsub.f32 %v6107_v22, %v6129_v27  ;;  %6175 = vmatmul.f32.vlgmr.msrb.gmra.mxu1 %v6129_v27  ;;  %6265 = vmatmul.f32.vlgmr.msrb.gmra.mxu2 %v6129_v27 }
0x1dd0   :  { %6290 = vmatmul.f32.vlgmr.msrb.gmra.mxu3 %v6129_v27  ;;  %6349 = vmatpush.msrb.mxu1 %v10028_v7 }
0x1dd1   :  { %v6131_v1 = vand.u32 4294901760, %v6130_v48  ;;  %6510 = vmatpush.msrb.mxu2 %v6509_v38  ;;  %6540 = vmatpush.msrb.mxu3 %v6539_v9 }
0x1dd2   :  { %6355 = vmatpush.msrb.mxu1 %v10032_v56 }
0x1dd3   :  { %v6132_v4 = vsub.f32 %v6130_v48, %v6131_v1 }
0x1dd4   :  { %6361 = vmatpush.msrb.mxu1 %v10037_v40 }
0x1dd5   :  { %v6133_v8 = vand.u32 4294901760, %v6132_v4 }
0x1dd6   :  { %6367 = vmatpush.msrb.mxu1 %v10040_v2 }
0x1dd7   :  { %6134 = vmatmul.f32.vlgmr.msrb.gmra.mxu0 %v6133_v8  ;;  %6232 = vmatmul.f32.vlgmr.msra.gmra.mxu1 %v6131_v1 }
0x1dd8   :  { %6399 = vmatmul.f32.vlgmr.msra.gmra.mxu2 %v6324_v51  ;;  %6426 = vmatmul.f32.vlgmr.msra.gmra.mxu3 %v6325_v32 }
0x1dd9   :  { %6316 = vmatpush.msrb.mxu0 %v9981_v0  ;;  %6476 = vmatpush.msra.mxu1 %v9981_v0 }
0x1dda   :  { %6612 = vmatpush.msra.mxu2 %v6537_v37  ;;  %6634 = vmatpush.msra.mxu3 %v6509_v38 }
0x1ddb   :  { %6318 = vmatpush.msrb.mxu0 %v9987_v50  ;;  %6478 = vmatpush.msra.mxu1 %v9987_v50 }
0x1ddd   :  { %6320 = vmatpush.msrb.mxu0 %v9994_v57  ;;  %6480 = vmatpush.msra.mxu1 %v9994_v57 }
0x1ddf   :  { %6205 = vmatmul.f32.vlgmr.msra.gmra.mxu0 %v6130_v48  ;;  %6369 = vmatmul.f32.vlgmr.msrb.gmra.mxu1 %v6323_v39 }
0x1de0   :  { %6322 = vmatpush.msrb.mxu0 %v10001_v23  ;;  %6482 = vmatpush.msra.mxu1 %v10001_v23 }
0x1de2   :  { %6445 = vmatpush.msra.mxu0 %v10010_v21  ;;  %6586 = vmatpush.msrb.mxu1 %v6509_v38  ;;  %v8114_v38 = vld [vmem:[%s10475_s8] ss:$0 sm:$0xff] }
0x1de4   :  { %6449 = vmatpush.msra.mxu0 %v10013_v13 }
0x1de6   :  { %6453 = vmatpush.msra.mxu0 %v10018_v47 }
0x1de7   :  { %6328 = vmatmul.f32.vlgmr.msrb.gmra.mxu0 %v6327_v41  ;;  %6484 = vmatmul.f32.vlgmr.msra.gmra.mxu1 %v6323_v39 }
0x1de8   :  { %6457 = vmatpush.msra.mxu0 %v10023_v53 }
0x1dea   :  { %6563 = vmatpush.msrb.mxu0 %v6536_v55 }
0x1def   :  { %6459 = vmatmul.f32.vlgmr.msra.gmra.mxu0 %v6323_v39 }
0x1e4c   :  { %v6176_v34 = vpop.f32.mrf.mxu1 }
0x1e52   :  { %v6266_v54 = vpop.f32.mrf.mxu2 }
0x1e53   :  { %v6291_v14 = vpop.f32.mrf.mxu3 }
0x1e54   :  { %v6135_v49 = vpop.f32.mrf.mxu0  ;;  %v6233_v63 = vpop.f32.mrf.mxu1 }
0x1e55   :  { %v6136_v17 = vadd.f32 %v8113_v60, %v6135_v49 }
0x1e57   :  { %v6177_v24 = vadd.f32 %v6176_v34, %v6136_v17 }
0x1e5b   :  { %v6400_v3 = vpop.f32.mrf.mxu2  ;;  %v6427_v18 = vpop.f32.mrf.mxu3 }
0x1e5c   :  { %v6206_v59 = vpop.f32.mrf.mxu0  ;;  %v6370_v6 = vpop.f32.mrf.mxu1 }
0x1e5d   :  { %v6207_v52 = vadd.f32 %v6206_v59, %v6177_v24 }
0x1e5f   :  { %v6234_v26 = vadd.f32 %v6233_v63, %v6207_v52 }
0x1e61   :  { %v6267_v10 = vadd.f32 %v6266_v54, %v6234_v26 }
0x1e63   :  { %v6292_v20 = vadd.f32 %v6291_v14, %v6267_v10 }
0x1e64   :  { %v6329_v29 = vpop.f32.mrf.mxu0  ;;  %v6485_v39 = vpop.f32.mrf.mxu1 }
0x1e65   :  { %8089 = vst.msk [vmem:[%s10481_s14 + $0x2] sm:$0x3] %vm5411_vm4, %v6292_v20  ;;  %v6489_v43 = vsel %vm4718_vm15, %v6292_v20, 0  ;;  %v6371_v35 = vadd.f32 %v6370_v6, %v6329_v29  ;;  %v6697_v29 = vld [vmem:[#allocation8 + $0x38] sm:$0xff]  ;;  %v6696_v6 = vld [vmem:[#allocation8 + $0x30] sm:$0xff] }
0x1e66   :  { %v6511_v28 = vand.u32 4294901760, %v6489_v43 }
0x1e67   :  { %v6401_v15 = vadd.f32 %v6400_v3, %v6371_v35  ;;  %v6695_v35 = vld [vmem:[#allocation8 + $0x28] sm:$0xff]  ;;  %v10084_v3 = vand.u32 4294901760, %v6697_v29 }
0x1e68   :  { %v6512_v42 = vsub.f32 %v6489_v43, %v6511_v28  ;;  %6542 = vmatmul.f32.vlgmr.msrb.gmra.mxu3 %v6511_v28 }
0x1e69   :  { %v6428_v25 = vadd.f32 %v6427_v18, %v6401_v15  ;;  %v10086_v15 = vand.u32 4294901760, %v6696_v6  ;;  %v10088_v18 = vand.u32 4294901760, %v6695_v35  ;;  %6714 = vmatpush.msra.mxu0 %v10084_v3  ;;  %6846 = vmatpush.msrb.mxu3 %v10084_v3 }
0x1e6a   :  { %6566 = vmatmul.f32.vlgmr.msrb.gmra.mxu0 %v6512_v42  ;;  %v6513_v62 = vand.u32 4294901760, %v6512_v42 }
0x1e6b   :  { %6716 = vmatpush.msra.mxu0 %v10086_v15  ;;  %6848 = vmatpush.msrb.mxu3 %v10086_v15 }
0x1e6c   :  { %6590 = vmatmul.f32.vlgmr.msrb.gmra.mxu1 %v6513_v62  ;;  %v6514_v46 = vsub.f32 %v6512_v42, %v6513_v62  ;;  %v6460_v22 = vpop.f32.mrf.mxu0 }
0x1e6d   :  { %v6461_v27 = vadd.f32 %v6460_v22, %v6428_v25  ;;  %v6693_v22 = vld [vmem:[#allocation8 + $0x18] sm:$0xff]  ;;  %6718 = vmatpush.msra.mxu0 %v10088_v18  ;;  %6850 = vmatpush.msrb.mxu3 %v10088_v18 }
0x1e6e   :  { %v6515_v5 = vand.u32 4294901760, %v6514_v46 }
0x1e6f   :  { %v6486_v58 = vadd.f32 %v6485_v39, %v6461_v27  ;;  %v10092_v27 = vand.u32 4294901760, %v6693_v22 }
0x1e70   :  { %6516 = vmatmul.f32.vlgmr.msrb.gmra.mxu2 %v6515_v5  ;;  %6636 = vmatmul.f32.vlgmr.msra.gmra.mxu3 %v6511_v28 }
0x1e78   :  { %6614 = vmatmul.f32.vlgmr.msra.gmra.mxu2 %v6511_v28 }
0x1ee7   :  { %v6567_v8 = vpop.f32.mrf.mxu0 }
0x1ee9   :  { %v6591_v11 = vpop.f32.mrf.mxu1 }
0x1eeb   :  { %v6543_v48 = vpop.f32.mrf.mxu3 }
0x1ef3   :  { %v6517_v1 = vpop.f32.mrf.mxu2  ;;  %v6637_v55 = vpop.f32.mrf.mxu3 }
0x1ef4   :  { %v6518_v51 = vadd.f32 %v6517_v1, %v6486_v58  ;;  %v6691_v58 = vld [vmem:[#allocation8 + $0x8] sm:$0xff]  ;;  %v10097_v1 = vsub.f32 %v6697_v29, %v10084_v3 }
0x1ef6   :  { %v6544_v4 = vadd.f32 %v6543_v48, %v6518_v51  ;;  %v6690_v48 = vld [vmem:[#allocation8] sm:$0xff]  ;;  %v10100_v51 = vsub.f32 %v6696_v6, %v10086_v15  ;;  %6809 = vmatpush.msrb.mxu2 %v10097_v1 }
0x1ef8   :  { %v6568_v32 = vadd.f32 %v6567_v8, %v6544_v4  ;;  %v10103_v4 = vsub.f32 %v6695_v35, %v10088_v18  ;;  %v10107_v8 = vand.u32 4294901760, %v6691_v58  ;;  %6812 = vmatpush.msrb.mxu2 %v10100_v51 }
0x1efa   :  { %v6592_v41 = vadd.f32 %v6591_v11, %v6568_v32  ;;  %v10113_v11 = vsub.f32 %v6693_v22, %v10092_v27  ;;  %6815 = vmatpush.msrb.mxu2 %v10103_v4 }
0x1efb   :  { %v6615_v16 = vpop.f32.mrf.mxu2 }
0x1efc   :  { %v6616_v36 = vadd.f32 %v6615_v16, %v6592_v41  ;;  %v10119_v16 = vand.u32 4294901760, %v10097_v1 }
0x1efe   :  { %v6638_v37 = vadd.f32 %v6637_v55, %v6616_v36  ;;  %v10122_v36 = vand.u32 4294901760, %v10100_v51  ;;  %v10129_v55 = vand.u32 4294901760, %v6690_v48 }
0x1f00   :  { %v6644_v61 = vadd.f32 %v8114_v38, %v6638_v37  ;;  %v10125_v38 = vand.u32 4294901760, %v10103_v4 }
0x1f02   :  { %8280 = vtanh.f32 %v6644_v61  ;;  %v8090_v60 = vmul.f32 -1.442695, %v6644_v61  ;;  %v10135_v61 = vsub.f32 %v6691_v58, %v10107_v8 }
0x1f04   :  { %8282 = vpow2.f32 %v8090_v60  ;;  %10644 = vst [vmem:[#allocation26_spill] sm:$0xff] %v10135_v61  ;;  %v6755_v60 = vsub.f32 %v10100_v51, %v10122_v36 }
0x1f08   :  { %v8281_v9 = vpop.eup %8280 }
0x1f09   :  { %6667 = vrot.lane.b32.xlu0 %v8281_v9, %s8424_s21  ;;  %v6749_v9 = vsub.f32 %v10097_v1, %v10119_v16 }
0x1f0a   :  { %v8283_v34 = vpop.eup %8282 }
0x1f0b   :  { %v6648_v49 = vadd.f32 1.0, %v8283_v34  ;;  %v6761_v34 = vsub.f32 %v10103_v4, %v10125_v38 }
0x1f0d   :  { %8284 = vrcp.f32 %v6648_v49  ;;  %v6660_v26 = vand.u32 2147483648, %v6648_v49  ;;  %vm6654_vm5 = vweird.f32 %v6648_v49  ;;  %v6658_v54 = vand.u32 2147483647, %v6648_v49 }
0x1f0f   :  { %v6661_v14 = vor.u32 1.1754944e-38, %v6660_v26  ;;  %vm6659_vm7 = vcmp.eq.f32.partialorder %v6658_v54, 8.507059e+37  ;;  %v10166_v26 = vand.u32 4294901760, %v6761_v34 }
0x1f13   :  { %v8285_v17 = vpop.eup %8284 }
0x1f14   :  { %v6650_v24 = vmul.f32 %v8285_v17, %v6648_v49  ;;  %vm6655_vm2 = vweird.f32 %v8285_v17  ;;  %v10145_v49 = vand.u32 4294901760, %v10113_v11 }
0x1f15   :  { %vm6656_vm6 = vmor %vm6654_vm5, %vm6655_vm2 }
0x1f16   :  { %v6651_v59 = vsub.f32 1.0, %v6650_v24  ;;  %v10153_v24 = vand.u32 4294901760, %v6749_v9  ;;  %v6773_v54 = vsub.f32 %v10113_v11, %v10145_v49 }
0x1f18   :  { %v6652_v52 = vmul.f32 %v8285_v17, %v6651_v59  ;;  %v10155_v59 = vand.u32 4294901760, %v6755_v60  ;;  %6751 = vmatpush.msra.mxu1 %v10153_v24 }
0x1f1a   :  { %v6653_v63 = vadd.f32 %v8285_v17, %v6652_v52  ;;  %6757 = vmatpush.msra.mxu1 %v10155_v59 }
0x1f1c   :  { %v6657_v10 = vsel %vm6656_vm6, %v8285_v17, %v6653_v63  ;;  %v10162_v63 = vsub.f32 %v6690_v48, %v10129_v55  ;;  %6763 = vmatpush.msra.mxu1 %v10166_v26 }
0x1f1d   :  { %v10072_v43 = vsel %vm6659_vm7, %v6661_v14, %v6657_v10  ;;  %v10171_v10 = vand.u32 4294901760, %v10135_v61 }
0x1f1e   :  { %v6665_v42 = vmul.f32 %v10072_v43, %v9941_v12  ;;  %v6692_v12 = vld [vmem:[#allocation8 + $0x10] sm:$0xff]  ;;  %10645 = vst [vmem:[#allocation27_spill] sm:$0xff] %v10162_v63 }
0x1f1f   :  { %v10094_v39 = vand.u32 4294901760, %v6692_v12  ;;  %10646 = vst [vmem:[#allocation28_spill] sm:$0xff] %v10171_v10 }
0x1f21   :  { %v10116_v41 = vsub.f32 %v6692_v12, %v10094_v39 }
0x1f23   :  { %v10150_v17 = vand.u32 4294901760, %v10116_v41 }
0x1f7b   :  { %v6668_v20 = vpop.permute.xlu0 %6667 }
0x1f7c   :  { %v6670_v28 = vmul.f32 %v6668_v20, %v10072_v43  ;;  %v6779_v20 = vsub.f32 %v10116_v41, %v10150_v17 }
0x1f7e   :  { %6672 = vrot.lane.b32.xlu1 %v6670_v28, %s8425_s22  ;;  %v10182_v28 = vand.u32 4294901760, %v10162_v63 }
0x1f80   :  { %10647 = vst [vmem:[#allocation29_spill] sm:$0xff] %v10182_v28  ;;  %v6791_v29 = vsub.f32 %v10162_v63, %v10182_v28 }
0x1f82   :  { %v10209_v35 = vand.u32 4294901760, %v6791_v29 }
0x1f86   :  { %6686 = vrot.lane.b32.xlu1 %v9977_v45, %s8424_s21  ;;  %v6694_v45 = vld [vmem:[#allocation8 + $0x20] sm:$0xff] }
0x1f87   :  { %v10090_v25 = vand.u32 4294901760, %v6694_v45 }
0x1f89   :  { %v10110_v32 = vsub.f32 %v6694_v45, %v10090_v25  ;;  %6720 = vmatpush.msra.mxu0 %v10090_v25  ;;  %6852 = vmatpush.msrb.mxu3 %v10090_v25 }
0x1f8b   :  { %v10132_v37 = vand.u32 4294901760, %v10110_v32  ;;  %6818 = vmatpush.msrb.mxu2 %v10110_v32  ;;  %6722 = vmatpush.msra.mxu0 %v10092_v27 }
0x1f8c   :  { %6854 = vmatpush.msrb.mxu3 %v10092_v27 }
0x1f8d   :  { %v6767_v52 = vsub.f32 %v10110_v32, %v10132_v37  ;;  %6821 = vmatpush.msrb.mxu2 %v10113_v11  ;;  %6724 = vmatpush.msra.mxu0 %v10094_v39 }
0x1f8e   :  { %6856 = vmatpush.msrb.mxu3 %v10094_v39 }
0x1f8f   :  { %v10177_v14 = vand.u32 4294901760, %v6767_v52  ;;  %6824 = vmatpush.msrb.mxu2 %v10116_v41  ;;  %6726 = vmatpush.msra.mxu0 %v10107_v8 }
0x1f90   :  { %6858 = vmatpush.msrb.mxu3 %v10107_v8 }
0x1f91   :  { %6769 = vmatpush.msra.mxu1 %v10177_v14  ;;  %6827 = vmatpush.msrb.mxu2 %v10135_v61 }
0x1f92   :  { %6728 = vmatpush.msra.mxu0 %v10129_v55  ;;  %6860 = vmatpush.msrb.mxu3 %v10129_v55 }
0x1f93   :  { %6830 = vmatpush.msrb.mxu2 %v10162_v63 }
0x1f94   :  { %6879 = vmatpush.msrb.mxu0 %v10119_v16 }
0x1f96   :  { %6883 = vmatpush.msrb.mxu0 %v10122_v36 }
0x1f98   :  { %6887 = vmatpush.msrb.mxu0 %v10125_v38 }
0x1f9a   :  { %6891 = vmatpush.msrb.mxu0 %v10132_v37 }
0x1f9c   :  { %6895 = vmatpush.msrb.mxu0 %v10145_v49 }
0x1f9e   :  { %6899 = vmatpush.msrb.mxu0 %v10150_v17 }
0x1fa0   :  { %6903 = vmatpush.msrb.mxu0 %v10171_v10 }
0x1fa2   :  { %6907 = vmatpush.msrb.mxu0 %v10182_v28 }
0x1ff0   :  { %v6673_v62 = vpop.permute.xlu1 %6672 }
0x1ff1   :  { %v10080_v46 = vadd.f32 %v6673_v62, %v6665_v42  ;;  %v10188_v42 = vand.u32 4294901760, %v6773_v54  ;;  %v6785_v62 = vsub.f32 %v10135_v61, %v10171_v10 }
0x1ff3   :  { %10643 = vst [vmem:[#allocation17_spill] sm:$0xff] %v10080_v46  ;;  %8286 = vtanh.f32 %v10080_v46  ;;  %6775 = vmatpush.msra.mxu1 %v10188_v42  ;;  %v10204_v6 = vand.u32 4294901760, %v6785_v62 }
0x1ff9   :  { %v8287_v5 = vpop.eup %8286 }
0x1ffa   :  { %6678 = vrot.lane.b32.xlu2 %v8287_v5, %s8424_s21  ;;  %v10196_v5 = vand.u32 4294901760, %v6779_v20  ;;  %v8115_v20 = vld [vmem:[%s10477_s10] ss:$0 sm:$0xff] }
0x1ffc   :  { %6781 = vmatpush.msra.mxu1 %v10196_v5 }
0x1ffe   :  { %6787 = vmatpush.msra.mxu1 %v10204_v6 }
0x2000   :  { %6793 = vmatpush.msra.mxu1 %v10209_v35 }
0x2002   :  { %6922 = vmatpush.msrb.mxu1 %v10084_v3 }
0x2004   :  { %6924 = vmatpush.msrb.mxu1 %v10086_v15 }
0x2006   :  { %6926 = vmatpush.msrb.mxu1 %v10088_v18 }
0x2008   :  { %6928 = vmatpush.msrb.mxu1 %v10090_v25 }
0x200a   :  { %6930 = vmatpush.msrb.mxu1 %v10092_v27 }
0x200c   :  { %6932 = vmatpush.msrb.mxu1 %v10094_v39 }
0x200e   :  { %6934 = vmatpush.msrb.mxu1 %v10107_v8 }
0x2010   :  { %6936 = vmatpush.msrb.mxu1 %v10129_v55 }
0x2054   :  { %v6679_v45 = vpop.permute.xlu2 %6678 }
0x2055   :  { %v6681_v22 = vmul.f32 %v6679_v45, %v10072_v43  ;;  %v6687_v43 = vpop.permute.xlu1 %6686 }
0x2057   :  { %6683 = vrot.lane.b32.xlu0 %v6681_v22, %s8425_s22 }
0x20c9   :  { %v10230_v12 = vpop.permute.xlu0 %6683 }
0x20ca   :  { %v6689_v58 = vsel %vm324_vm3, %v10230_v12, %v6687_v43 }
0x20cb   :  { %v6703_v48 = vsel %vm576_vm8, %v6689_v58, 0 }
0x20cc   :  { %v6729_v9 = vand.u32 4294901760, %v6703_v48 }
0x20ce   :  { %v6730_v60 = vsub.f32 %v6703_v48, %v6729_v9  ;;  %6795 = vmatmul.f32.vlgmr.msra.gmra.mxu1 %v6729_v9 }
0x20d0   :  { %v6731_v34 = vand.u32 4294901760, %v6730_v60  ;;  %6833 = vmatmul.f32.vlgmr.msrb.gmra.mxu2 %v6730_v60 }
0x20d2   :  { %v6732_v52 = vsub.f32 %v6730_v60, %v6731_v34  ;;  %6864 = vmatmul.f32.vlgmr.msrb.gmra.mxu3 %v6731_v34 }
0x20d4   :  { %v6733_v54 = vand.u32 4294901760, %v6732_v52 }
0x20d6   :  { %6734 = vmatmul.f32.vlgmr.msra.gmra.mxu0 %v6733_v54  ;;  %6938 = vmatmul.f32.vlgmr.msrb.gmra.mxu1 %v6729_v9 }
0x20de   :  { %6909 = vmatmul.f32.vlgmr.msrb.gmra.mxu0 %v6729_v9 }
0x214b   :  { %v6796_v62 = vpop.f32.mrf.mxu1 }
0x2153   :  { %v6735_v29 = vpop.f32.mrf.mxu0  ;;  %v6834_v43 = vpop.f32.mrf.mxu2 }
0x2154   :  { %v6736_v45 = vadd.f32 %v8115_v20, %v6735_v29  ;;  %v6939_v60 = vpop.f32.mrf.mxu1 }
0x2155   :  { %v6865_v48 = vpop.f32.mrf.mxu3 }
0x2156   :  { %v6797_v22 = vadd.f32 %v6796_v62, %v6736_v45 }
0x2158   :  { %v6835_v58 = vadd.f32 %v6834_v43, %v6797_v22 }
0x215a   :  { %v6866_v46 = vadd.f32 %v6865_v48, %v6835_v58 }
0x215b   :  { %v6910_v63 = vpop.f32.mrf.mxu0 }
0x215c   :  { %v6911_v28 = vadd.f32 %v6910_v63, %v6866_v46 }
0x215e   :  { %v6940_v34 = vadd.f32 %v6939_v60, %v6911_v28 }
0x2160   :  { %8288 = vtanh.f32 %v6940_v34  ;;  %v8091_v9 = vmul.f32 -1.442695, %v6940_v34 }
0x2162   :  { %8290 = vpow2.f32 %v8091_v9 }
0x2166   :  { %v8289_v52 = vpop.eup %8288 }
0x2167   :  { %6964 = vrot.lane.b32.xlu2 %v8289_v52, %s8424_s21 }
0x2168   :  { %v8291_v54 = vpop.eup %8290 }
0x2169   :  { %v6945_v61 = vadd.f32 1.0, %v8291_v54  ;;  %v6981_v54 = vld [vmem:[#allocation9 + $0x10] sm:$0xff] }
0x216b   :  { %8292 = vrcp.f32 %v6945_v61  ;;  %v6957_v22 = vand.u32 2147483648, %v6945_v61  ;;  %vm6951_vm10 = vweird.f32 %v6945_v61  ;;  %v6955_v46 = vand.u32 2147483647, %v6945_v61 }
0x216d   :  { %v6958_v28 = vor.u32 1.1754944e-38, %v6957_v22  ;;  %vm6956_vm12 = vcmp.eq.f32.partialorder %v6955_v46, 8.507059e+37 }
0x2171   :  { %v8293_v10 = vpop.eup %8292 }
0x2172   :  { %v6947_v20 = vmul.f32 %v8293_v10, %v6945_v61  ;;  %vm6952_vm9 = vweird.f32 %v8293_v10  ;;  %v6982_v61 = vld [vmem:[#allocation9 + $0x18] sm:$0xff] }
0x2173   :  { %vm6953_vm11 = vmor %vm6951_vm10, %vm6952_vm9 }
0x2174   :  { %v6948_v62 = vsub.f32 1.0, %v6947_v20  ;;  %v10247_v20 = vand.u32 4294901760, %v6981_v54 }
0x2176   :  { %v6949_v29 = vmul.f32 %v8293_v10, %v6948_v62 }
0x2178   :  { %v6950_v45 = vadd.f32 %v8293_v10, %v6949_v29 }
0x217a   :  { %v6954_v63 = vsel %vm6953_vm11, %v8293_v10, %v6950_v45  ;;  %v10245_v10 = vand.u32 4294901760, %v6982_v61 }
0x217b   :  { %v6959_v58 = vsel %vm6956_vm12, %v6958_v28, %v6954_v63 }
0x217c   :  { %v6962_v60 = vmul.f32 %v6959_v58, %v9973_v19  ;;  %v10250_v62 = vsub.f32 %v6982_v61, %v10245_v10  ;;  %7165 = vmatpush.msra.mxu1 %v10245_v10  ;;  %v10254_v19 = vsub.f32 %v6981_v54, %v10247_v20  ;;  %7005 = vmatpush.msra.mxu2 %v10245_v10 }
0x217e   :  { %v10258_v29 = vand.u32 4294901760, %v10250_v62  ;;  %v10261_v45 = vand.u32 4294901760, %v10254_v19  ;;  %7167 = vmatpush.msra.mxu1 %v10247_v20  ;;  %7007 = vmatpush.msra.mxu2 %v10247_v20 }
0x2180   :  { %10649 = vst [vmem:[#allocation32_spill] sm:$0xff] %v10261_v45  ;;  %v7036_v22 = vsub.f32 %v10250_v62, %v10258_v29  ;;  %7134 = vmatpush.msra.mxu0 %v10258_v29  ;;  %v7042_v46 = vsub.f32 %v10254_v19, %v10261_v45 }
0x2182   :  { %v10270_v63 = vand.u32 4294901760, %v7036_v22  ;;  %v10272_v28 = vand.u32 4294901760, %v7042_v46  ;;  %7138 = vmatpush.msra.mxu0 %v10261_v45 }
0x2184   :  { %7038 = vmatpush.msra.mxu3 %v10270_v63 }
0x2186   :  { %7044 = vmatpush.msra.mxu3 %v10272_v28 }
0x21c1   :  { %v6965_v43 = vpop.permute.xlu2 %6964 }
0x21c2   :  { %v6967_v48 = vmul.f32 %v6965_v43, %v6959_v58 }
0x21c4   :  { %6969 = vrot.lane.b32.xlu0 %v6967_v48, %s8425_s22 }
0x2236   :  { %v6970_v34 = vpop.permute.xlu0 %6969 }
0x2237   :  { %v10241_v52 = vadd.f32 %v6970_v34, %v6962_v60  ;;  %v6980_v60 = vld [vmem:[#allocation9 + $0x8] sm:$0xff] }
0x2238   :  { %v10281_v34 = vand.u32 4294901760, %v6980_v60 }
0x2239   :  { %10648 = vst [vmem:[#allocation31_spill] sm:$0xff] %v10241_v52  ;;  %8294 = vtanh.f32 %v10241_v52 }
0x223a   :  { %v10284_v61 = vsub.f32 %v6980_v60, %v10281_v34  ;;  %7169 = vmatpush.msra.mxu1 %v10281_v34  ;;  %7009 = vmatpush.msra.mxu2 %v10281_v34 }
0x223c   :  { %v10291_v22 = vand.u32 4294901760, %v10284_v61 }
0x223e   :  { %10650 = vst [vmem:[#allocation22_spill] sm:$0xff] %v10291_v22  ;;  %v7048_v46 = vsub.f32 %v10284_v61, %v10291_v22  ;;  %7142 = vmatpush.msra.mxu0 %v10291_v22 }
0x223f   :  { %v8295_v9 = vpop.eup %8294 }
0x2240   :  { %6975 = vrot.lane.b32.xlu1 %v8295_v9, %s8424_s21  ;;  %v6979_v9 = vld [vmem:[#allocation9] sm:$0xff]  ;;  %v10308_v60 = vand.u32 4294901760, %v7048_v46 }
0x2241   :  { %v10287_v54 = vand.u32 4294901760, %v6979_v9 }
0x2242   :  { %7050 = vmatpush.msra.mxu3 %v10308_v60 }
0x2243   :  { %7171 = vmatpush.msra.mxu1 %v10287_v54  ;;  %7011 = vmatpush.msra.mxu2 %v10287_v54 }
0x2245   :  { %7299 = vmatpush.msrb.mxu1 %v9981_v0  ;;  %7076 = vmatpush.msrb.mxu2 %v10250_v62 }
0x2247   :  { %7301 = vmatpush.msrb.mxu1 %v9987_v50  ;;  %7079 = vmatpush.msrb.mxu2 %v10254_v19 }
0x2249   :  { %7303 = vmatpush.msrb.mxu1 %v9994_v57  ;;  %7082 = vmatpush.msrb.mxu2 %v10284_v61 }
0x224b   :  { %7305 = vmatpush.msrb.mxu1 %v10001_v23 }
0x22b2   :  { %v6976_v43 = vpop.permute.xlu1 %6975 }
0x22b3   :  { %v10277_v48 = vmul.f32 %v6976_v43, %v6959_v58  ;;  %v10294_v58 = vsub.f32 %v6979_v9, %v10287_v54 }
0x22b5   :  { %6988 = vrot.lane.b32.xlu2 %v10277_v48, %s8425_s22  ;;  %10651 = vst [vmem:[#allocation30_spill] sm:$0xff] %v10294_v58  ;;  %v10304_v43 = vand.u32 4294901760, %v10294_v58  ;;  %7085 = vmatpush.msrb.mxu2 %v10294_v58 }
0x22b7   :  { %10652 = vst [vmem:[#allocation23_spill] sm:$0xff] %v10304_v43  ;;  %v7054_v9 = vsub.f32 %v10294_v58, %v10304_v43  ;;  %7146 = vmatpush.msra.mxu0 %v10304_v43 }
0x22b9   :  { %7270 = vmatpush.msrb.mxu0 %v9984_v33  ;;  %v10316_v52 = vand.u32 4294901760, %v7054_v9  ;;  %v7184_v33 = vsel %vm324_vm3, %v10230_v12, 0 }
0x22ba   :  { %v7206_v43 = vand.u32 4294901760, %v7184_v33 }
0x22bb   :  { %7273 = vmatpush.msrb.mxu0 %v9991_v44  ;;  %7056 = vmatpush.msra.mxu3 %v10316_v52 }
0x22bd   :  { %7105 = vmatpush.msrb.mxu3 %v10245_v10  ;;  %7276 = vmatpush.msrb.mxu0 %v9998_v30 }
0x22bf   :  { %7107 = vmatpush.msrb.mxu3 %v10247_v20  ;;  %7279 = vmatpush.msrb.mxu0 %v10005_v31  ;;  %v7207_v31 = vsub.f32 %v7184_v33, %v7206_v43 }
0x22c1   :  { %7109 = vmatpush.msrb.mxu3 %v10281_v34  ;;  %v7208_v12 = vand.u32 4294901760, %v7207_v31 }
0x22c3   :  { %7111 = vmatpush.msrb.mxu3 %v10287_v54 }
0x230f   :  { %v6989_v44 = vpop.permute.xlu2 %6988 }
0x2310   :  { %v6990_v46 = vsel %vm324_vm3, %v6989_v44, 0 }
0x2311   :  { %v7012_v9 = vand.u32 4294901760, %v6990_v46 }
0x2313   :  { %v7013_v22 = vsub.f32 %v6990_v46, %v7012_v9  ;;  %7058 = vmatmul.f32.vlgmr.msra.gmra.mxu3 %v7012_v9  ;;  %7148 = vmatmul.f32.vlgmr.msra.gmra.mxu0 %v7012_v9 }
0x2314   :  { %7173 = vmatmul.f32.vlgmr.msra.gmra.mxu1 %v7012_v9  ;;  %7232 = vmatpush.msra.mxu3 %v10028_v7  ;;  %v7209_v7 = vsub.f32 %v7207_v31, %v7208_v12 }
0x2315   :  { %v7014_v30 = vand.u32 4294901760, %v7013_v22 }
0x2316   :  { %7238 = vmatpush.msra.mxu3 %v10032_v56 }
0x2317   :  { %v7015_v58 = vsub.f32 %v7013_v22, %v7014_v30 }
0x2318   :  { %7244 = vmatpush.msra.mxu3 %v10037_v40 }
0x2319   :  { %v7016_v45 = vand.u32 4294901760, %v7015_v58 }
0x231a   :  { %7250 = vmatpush.msra.mxu3 %v10040_v2 }
0x231b   :  { %7017 = vmatmul.f32.vlgmr.msra.gmra.mxu2 %v7016_v45  ;;  %7115 = vmatmul.f32.vlgmr.msrb.gmra.mxu3 %v7014_v30 }
0x231c   :  { %7282 = vmatmul.f32.vlgmr.msrb.gmra.mxu0 %v7207_v31  ;;  %7309 = vmatmul.f32.vlgmr.msrb.gmra.mxu1 %v7208_v12  ;;  %v8117_v31 = vld [vmem:[%s10475_s8] ss:$0 sm:$0xff] }
0x231d   :  { %7199 = vmatpush.msra.mxu2 %v9981_v0  ;;  %7359 = vmatpush.msrb.mxu3 %v9981_v0  ;;  %v7210_v0 = vand.u32 4294901760, %v7209_v7 }
0x231f   :  { %7201 = vmatpush.msra.mxu2 %v9987_v50  ;;  %7361 = vmatpush.msrb.mxu3 %v9987_v50  ;;  %v7179_v50 = vld [vmem:[%s10473_s6] sm:$0x3] }
0x2321   :  { %7203 = vmatpush.msra.mxu2 %v9994_v57  ;;  %7363 = vmatpush.msrb.mxu3 %v9994_v57  ;;  %v7375_v57 = vsel %vm4722_vm13, %v7179_v50, 0 }
0x2323   :  { %7088 = vmatmul.f32.vlgmr.msrb.gmra.mxu2 %v7013_v22  ;;  %7252 = vmatmul.f32.vlgmr.msra.gmra.mxu3 %v7206_v43 }
0x2324   :  { %7205 = vmatpush.msra.mxu2 %v10001_v23  ;;  %7365 = vmatpush.msrb.mxu3 %v10001_v23  ;;  %v7392_v23 = vand.u32 4294901760, %v7375_v57 }
0x2326   :  { %7328 = vmatpush.msrb.mxu2 %v10010_v21  ;;  %v7419_v56 = vsub.f32 %v7375_v57, %v7392_v23  ;;  %7393 = vmatpush.msra.mxu0 %v7392_v23 }
0x2327   :  { %7469 = vmatpush.msra.mxu3 %v7392_v23 }
0x2328   :  { %7332 = vmatpush.msrb.mxu2 %v10013_v13  ;;  %v7420_v21 = vand.u32 4294901760, %v7419_v56 }
0x232a   :  { %7336 = vmatpush.msrb.mxu2 %v10018_v47  ;;  %v7421_v13 = vsub.f32 %v7419_v56, %v7420_v21  ;;  %7495 = vmatpush.msrb.mxu0 %v7420_v21 }
0x232b   :  { %7211 = vmatmul.f32.vlgmr.msra.gmra.mxu2 %v7210_v0  ;;  %7367 = vmatmul.f32.vlgmr.msrb.gmra.mxu3 %v7206_v43 }
0x232c   :  { %7340 = vmatpush.msrb.mxu2 %v10023_v53  ;;  %7634 = vmatpush.msrb.mxu3 %v10153_v24  ;;  %v7422_v47 = vand.u32 4294901760, %v7421_v13  ;;  %v8116_v53 = vld [vmem:[%s10479_s12] ss:$0 sm:$0xff] }
0x232e   :  { %7446 = vmatpush.msra.mxu2 %v7419_v56  ;;  %7640 = vmatpush.msrb.mxu3 %v10155_v59 }
0x232f   :  { %7423 = vmatpush.msra.mxu1 %v7422_v47 }
0x2330   :  { %7646 = vmatpush.msrb.mxu3 %v10166_v26 }
0x2331   :  { %7517 = vmatpush.msrb.mxu1 %v7392_v23 }
0x2332   :  { %7652 = vmatpush.msrb.mxu3 %v10177_v14 }
0x2333   :  { %7342 = vmatmul.f32.vlgmr.msrb.gmra.mxu2 %v7206_v43 }
0x2334   :  { %7597 = vmatpush.msrb.mxu2 %v10084_v3  ;;  %7658 = vmatpush.msrb.mxu3 %v10188_v42 }
0x2336   :  { %7599 = vmatpush.msrb.mxu2 %v10086_v15  ;;  %7664 = vmatpush.msrb.mxu3 %v10196_v5 }
0x2338   :  { %7601 = vmatpush.msrb.mxu2 %v10088_v18  ;;  %7670 = vmatpush.msrb.mxu3 %v10204_v6 }
0x233a   :  { %7603 = vmatpush.msrb.mxu2 %v10090_v25  ;;  %7676 = vmatpush.msrb.mxu3 %v10209_v35 }
0x233c   :  { %7605 = vmatpush.msrb.mxu2 %v10092_v27 }
0x233e   :  { %7607 = vmatpush.msrb.mxu2 %v10094_v39 }
0x2340   :  { %7609 = vmatpush.msrb.mxu2 %v10107_v8 }
0x2342   :  { %7611 = vmatpush.msrb.mxu2 %v10129_v55 }
0x2390   :  { %v7149_v6 = vpop.f32.mrf.mxu0 }
0x2391   :  { %v7174_v22 = vpop.f32.mrf.mxu1 }
0x2396   :  { %v7059_v40 = vpop.f32.mrf.mxu3 }
0x239e   :  { %v7018_v2 = vpop.f32.mrf.mxu2  ;;  %v7116_v42 = vpop.f32.mrf.mxu3 }
0x239f   :  { %v7019_v24 = vadd.f32 %v8116_v53, %v7018_v2 }
0x23a1   :  { %v7060_v59 = vadd.f32 %v7059_v40, %v7019_v24 }
0x23a6   :  { %v7089_v26 = vpop.f32.mrf.mxu2 }
0x23a7   :  { %v7090_v14 = vadd.f32 %v7089_v26, %v7060_v59 }
0x23a9   :  { %v7117_v5 = vadd.f32 %v7116_v42, %v7090_v14 }
0x23ab   :  { %v7150_v45 = vadd.f32 %v7149_v6, %v7117_v5  ;;  %v10657_v6 = vld [vmem:[#allocation17_spill] sm:$0xff] }
0x23ad   :  { %v7175_v35 = vadd.f32 %v7174_v22, %v7150_v45 }
0x23af   :  { %8092 = vst.msk [vmem:[%s10481_s14 + $0x4] sm:$0x3] %vm5411_vm4, %v7175_v35  ;;  %v7372_v58 = vsel %vm4718_vm15, %v7175_v35, 0 }
0x23b0   :  { %v7394_v43 = vand.u32 4294901760, %v7372_v58 }
0x23b2   :  { %v7395_v33 = vsub.f32 %v7372_v58, %v7394_v43  ;;  %7425 = vmatmul.f32.vlgmr.msra.gmra.mxu1 %v7394_v43 }
0x23b3   :  { %7729 = vmatpush.msra.mxu1 %v10084_v3 }
0x23b4   :  { %7449 = vmatmul.f32.vlgmr.msra.gmra.mxu2 %v7395_v33  ;;  %v7396_v44 = vand.u32 4294901760, %v7395_v33 }
0x23b5   :  { %7731 = vmatpush.msra.mxu1 %v10086_v15  ;;  %7762 = vmatpush.msra.mxu2 %v10119_v16 }
0x23b6   :  { %7473 = vmatmul.f32.vlgmr.msra.gmra.mxu3 %v7396_v44  ;;  %v7397_v46 = vsub.f32 %v7395_v33, %v7396_v44 }
0x23b7   :  { %7733 = vmatpush.msra.mxu1 %v10088_v18  ;;  %7805 = vmatpush.msra.mxu3 %v10084_v3  ;;  %v10653_v3 = vld [vmem:[#allocation28_spill] sm:$0xff] }
0x23b8   :  { %v7398_v9 = vand.u32 4294901760, %v7397_v46  ;;  %7766 = vmatpush.msra.mxu2 %v10122_v36 }
0x23b9   :  { %7735 = vmatpush.msra.mxu1 %v10090_v25  ;;  %7807 = vmatpush.msra.mxu3 %v10086_v15  ;;  %v10654_v15 = vld [vmem:[#allocation26_spill] sm:$0xff] }
0x23ba   :  { %7399 = vmatmul.f32.vlgmr.msra.gmra.mxu0 %v7398_v9  ;;  %7519 = vmatmul.f32.vlgmr.msrb.gmra.mxu1 %v7394_v43 }
0x23bb   :  { %7692 = vmatpush.msra.mxu0 %v10097_v1  ;;  %7737 = vmatpush.msra.mxu1 %v10092_v27 }
0x23bc   :  { %7809 = vmatpush.msra.mxu3 %v10088_v18  ;;  %7770 = vmatpush.msra.mxu2 %v10125_v38  ;;  %v10655_v18 = vld [vmem:[#allocation29_spill] sm:$0xff] }
0x23bd   :  { %7695 = vmatpush.msra.mxu0 %v10100_v51  ;;  %7739 = vmatpush.msra.mxu1 %v10094_v39  ;;  %v7283_v51 = vpop.f32.mrf.mxu0 }
0x23be   :  { %7811 = vmatpush.msra.mxu3 %v10090_v25  ;;  %7774 = vmatpush.msra.mxu2 %v10132_v37  ;;  %v10656_v25 = vld [vmem:[#allocation27_spill] sm:$0xff] }
0x23bf   :  { %7698 = vmatpush.msra.mxu0 %v10103_v4  ;;  %7741 = vmatpush.msra.mxu1 %v10107_v8 }
0x23c0   :  { %7813 = vmatpush.msra.mxu3 %v10092_v27  ;;  %7778 = vmatpush.msra.mxu2 %v10145_v49  ;;  %v7212_v27 = vpop.f32.mrf.mxu2 }
0x23c1   :  { %7701 = vmatpush.msra.mxu0 %v10110_v32  ;;  %7743 = vmatpush.msra.mxu1 %v10129_v55 }
0x23c2   :  { %7497 = vmatmul.f32.vlgmr.msrb.gmra.mxu0 %v7394_v43  ;;  %7815 = vmatpush.msra.mxu3 %v10094_v39  ;;  %v7253_v39 = vpop.f32.mrf.mxu3 }
0x23c3   :  { %7704 = vmatpush.msra.mxu0 %v10113_v11  ;;  %7782 = vmatpush.msra.mxu2 %v10150_v17  ;;  %v7254_v1 = vadd.f32 %v7253_v39, %v7212_v27  ;;  %v10660_v39 = vld [vmem:[#allocation22_spill] sm:$0xff] }
0x23c4   :  { %7817 = vmatpush.msra.mxu3 %v10107_v8  ;;  %7921 = vmatpush.msrb.mxu1 %v10270_v63  ;;  %v7310_v8 = vpop.f32.mrf.mxu1 }
0x23c5   :  { %7707 = vmatpush.msra.mxu0 %v10116_v41  ;;  %7786 = vmatpush.msra.mxu2 %v10653_v3  ;;  %v7284_v4 = vadd.f32 %v7283_v51, %v7254_v1 }
0x23c6   :  { %7819 = vmatpush.msra.mxu3 %v10129_v55  ;;  %7927 = vmatpush.msrb.mxu1 %v10272_v28 }
0x23c7   :  { %7710 = vmatpush.msra.mxu0 %v10654_v15  ;;  %7790 = vmatpush.msra.mxu2 %v10655_v18  ;;  %v7311_v11 = vadd.f32 %v7310_v8, %v7284_v4 }
0x23c8   :  { %7933 = vmatpush.msrb.mxu1 %v10308_v60  ;;  %v7343_v32 = vpop.f32.mrf.mxu2 }
0x23c9   :  { %7713 = vmatpush.msra.mxu0 %v10656_v25  ;;  %v7344_v41 = vadd.f32 %v7343_v32, %v7311_v11 }
0x23ca   :  { %7939 = vmatpush.msrb.mxu1 %v10316_v52  ;;  %v7368_v16 = vpop.f32.mrf.mxu3 }
0x23cb   :  { %7888 = vmatpush.msrb.mxu0 %v10245_v10  ;;  %v7369_v36 = vadd.f32 %v7368_v16, %v7344_v41 }
0x23cd   :  { %7890 = vmatpush.msrb.mxu0 %v10247_v20 }
0x23cf   :  { %7892 = vmatpush.msrb.mxu0 %v10281_v34 }
0x23d1   :  { %7894 = vmatpush.msrb.mxu0 %v10287_v54 }
0x242f   :  { %v7426_v38 = vpop.f32.mrf.mxu1 }
0x2437   :  { %v7400_v55 = vpop.f32.mrf.mxu0  ;;  %v7450_v17 = vpop.f32.mrf.mxu2 }
0x2438   :  { %v7401_v37 = vadd.f32 %v7400_v55, %v7369_v36  ;;  %v7520_v12 = vpop.f32.mrf.mxu1 }
0x2439   :  { %v7474_v63 = vpop.f32.mrf.mxu3 }
0x243a   :  { %v7427_v49 = vadd.f32 %v7426_v38, %v7401_v37 }
0x243c   :  { %v7451_v52 = vadd.f32 %v7450_v17, %v7427_v49 }
0x243e   :  { %v7475_v28 = vadd.f32 %v7474_v63, %v7451_v52 }
0x243f   :  { %v7498_v60 = vpop.f32.mrf.mxu0 }
0x2440   :  { %v7499_v30 = vadd.f32 %v7498_v60, %v7475_v28 }
0x2442   :  { %v7521_v7 = vadd.f32 %v7520_v12, %v7499_v30 }
0x2444   :  { %v7527_v0 = vadd.f32 %v8117_v31, %v7521_v7 }
0x2446   :  { %8296 = vtanh.f32 %v7527_v0  ;;  %v8093_v57 = vmul.f32 -1.442695, %v7527_v0 }
0x2448   :  { %8298 = vpow2.f32 %v8093_v57  ;;  %v10662_v57 = vld [vmem:[#allocation18_spill] sm:$0xff] }
0x244c   :  { %v8297_v50 = vpop.eup %8296 }
0x244d   :  { %7550 = vrot.lane.b32.xlu0 %v8297_v50, %s8424_s21 }
0x244e   :  { %v8299_v23 = vpop.eup %8298 }
0x244f   :  { %v7531_v56 = vadd.f32 1.0, %v8299_v23  ;;  %v10663_v23 = vld [vmem:[#allocation31_spill] sm:$0xff] }
0x2451   :  { %8300 = vrcp.f32 %v7531_v56  ;;  %v7543_v2 = vand.u32 2147483648, %v7531_v56  ;;  %vm7537_vm15 = vweird.f32 %v7531_v56  ;;  %v7541_v24 = vand.u32 2147483647, %v7531_v56 }
0x2453   :  { %v7544_v26 = vor.u32 1.1754944e-38, %v7543_v2  ;;  %vm7542_vm2 = vcmp.eq.f32.partialorder %v7541_v24, 8.507059e+37 }
0x2457   :  { %v8301_v21 = vpop.eup %8300 }
0x2458   :  { %v7533_v13 = vmul.f32 %v8301_v21, %v7531_v56  ;;  %vm7538_vm13 = vweird.f32 %v8301_v21 }
0x2459   :  { %vm7539_vm1 = vmor %vm7537_vm15, %vm7538_vm13 }
0x245a   :  { %v7534_v47 = vsub.f32 1.0, %v7533_v13 }
0x245c   :  { %v7535_v53 = vmul.f32 %v8301_v21, %v7534_v47 }
0x245e   :  { %v7536_v40 = vadd.f32 %v8301_v21, %v7535_v53 }
0x2460   :  { %v7540_v59 = vsel %vm7539_vm1, %v8301_v21, %v7536_v40  ;;  %v10664_v40 = vld [vmem:[#allocation21_spill] sm:$0xff] }
0x2461   :  { %v7545_v42 = vsel %vm7542_vm2, %v7544_v26, %v7540_v59  ;;  %v10665_v26 = vld [vmem:[#allocation20_spill] sm:$0xff] }
0x2462   :  { %v7548_v45 = vmul.f32 %v7545_v42, %v10657_v6 }
0x24bf   :  { %v7551_v14 = vpop.permute.xlu0 %7550 }
0x24c0   :  { %v7553_v5 = vmul.f32 %v7551_v14, %v7545_v42 }
0x24c2   :  { %7555 = vrot.lane.b32.xlu1 %v7553_v5, %s8425_s22 }
0x24ca   :  { %7569 = vrot.lane.b32.xlu1 %v10277_v48, %s8424_s21 }
0x2534   :  { %v7556_v22 = vpop.permute.xlu1 %7555 }
0x2535   :  { %v7558_v35 = vadd.f32 %v7556_v22, %v7548_v45 }
0x2537   :  { %8302 = vtanh.f32 %v7558_v35 }
0x253c   :  { %v7570_v44 = vpop.permute.xlu1 %7569 }
0x253d   :  { %v8303_v58 = vpop.eup %8302 }
0x253e   :  { %7561 = vrot.lane.b32.xlu2 %v8303_v58, %s8424_s21 }
0x2598   :  { %v7562_v43 = vpop.permute.xlu2 %7561 }
0x2599   :  { %v7564_v33 = vmul.f32 %v7562_v43, %v7545_v42  ;;  %v8119_v43 = vld [vmem:[%s10479_s12] ss:$0 sm:$0xff] }
0x259b   :  { %7566 = vrot.lane.b32.xlu0 %v7564_v33, %s8425_s22 }
0x260d   :  { %v7567_v46 = vpop.permute.xlu0 %7566 }
0x260e   :  { %v7572_v9 = vsel %vm324_vm3, %v7567_v46, %v7570_v44 }
0x260f   :  { %v7586_v3 = vsel %vm576_vm8, %v7572_v9, 0 }
0x2610   :  { %v7612_v15 = vand.u32 4294901760, %v7586_v3 }
0x2612   :  { %v7613_v48 = vsub.f32 %v7586_v3, %v7612_v15  ;;  %7678 = vmatmul.f32.vlgmr.msrb.gmra.mxu3 %v7612_v15 }
0x2613   :  { %8048 = vmatpush.msrb.mxu3 %v10245_v10 }
0x2614   :  { %v7614_v18 = vand.u32 4294901760, %v7613_v48  ;;  %7716 = vmatmul.f32.vlgmr.msra.gmra.mxu0 %v7613_v48 }
0x2615   :  { %8050 = vmatpush.msrb.mxu3 %v10247_v20  ;;  %7959 = vmatpush.msra.mxu0 %v10250_v62  ;;  %v10658_v62 = vld [vmem:[#allocation32_spill] sm:$0xff] }
0x2616   :  { %v7615_v25 = vsub.f32 %v7613_v48, %v7614_v18  ;;  %7747 = vmatmul.f32.vlgmr.msra.gmra.mxu1 %v7614_v18 }
0x2617   :  { %8052 = vmatpush.msrb.mxu3 %v10281_v34  ;;  %7988 = vmatpush.msra.mxu1 %v10245_v10  ;;  %v10659_v10 = vld [vmem:[#allocation30_spill] sm:$0xff] }
0x2618   :  { %v7616_v27 = vand.u32 4294901760, %v7615_v25  ;;  %7962 = vmatpush.msra.mxu0 %v10254_v19  ;;  %v10661_v19 = vld [vmem:[#allocation23_spill] sm:$0xff] }
0x2619   :  { %8054 = vmatpush.msrb.mxu3 %v10287_v54  ;;  %7990 = vmatpush.msra.mxu1 %v10247_v20  ;;  %v8118_v20 = vld [vmem:[%s10477_s10] ss:$0 sm:$0xff]  ;;  %s8426_s10 = smov 96  }
0x261a   :  { %7617 = vmatmul.f32.vlgmr.msrb.gmra.mxu2 %v7616_v27  ;;  %7821 = vmatmul.f32.vlgmr.msra.gmra.mxu3 %v7612_v15 }
0x261b   :  { %8017 = vmatpush.msrb.mxu2 %v10258_v29  ;;  %7992 = vmatpush.msra.mxu1 %v10281_v34 }
0x261c   :  { %7965 = vmatpush.msra.mxu0 %v10284_v61 }
0x261d   :  { %8021 = vmatpush.msrb.mxu2 %v10658_v62  ;;  %7994 = vmatpush.msra.mxu1 %v10287_v54 }
0x261e   :  { %7968 = vmatpush.msra.mxu0 %v10659_v10 }
0x261f   :  { %8025 = vmatpush.msrb.mxu2 %v10660_v39 }
0x2621   :  { %8029 = vmatpush.msrb.mxu2 %v10661_v19 }
0x2622   :  { %7792 = vmatmul.f32.vlgmr.msra.gmra.mxu2 %v7612_v15 }
0x2691   :  { %v7717_v61 = vpop.f32.mrf.mxu0 }
0x2693   :  { %v7748_v8 = vpop.f32.mrf.mxu1 }
0x2695   :  { %v7679_v29 = vpop.f32.mrf.mxu3 }
0x269d   :  { %v7618_v1 = vpop.f32.mrf.mxu2  ;;  %v7822_v41 = vpop.f32.mrf.mxu3 }
0x269e   :  { %v7619_v34 = vadd.f32 %v8118_v20, %v7618_v1 }
0x26a0   :  { %v7680_v51 = vadd.f32 %v7679_v29, %v7619_v34 }
0x26a2   :  { %v7718_v4 = vadd.f32 %v7717_v61, %v7680_v51 }
0x26a4   :  { %v7749_v32 = vadd.f32 %v7748_v8, %v7718_v4 }
0x26a5   :  { %v7793_v54 = vpop.f32.mrf.mxu2 }
0x26a6   :  { %v7794_v11 = vadd.f32 %v7793_v54, %v7749_v32 }
0x26a8   :  { %v7823_v16 = vadd.f32 %v7822_v41, %v7794_v11 }
0x26aa   :  { %8304 = vtanh.f32 %v7823_v16  ;;  %v8094_v38 = vmul.f32 -1.442695, %v7823_v16 }
0x26ac   :  { %8306 = vpow2.f32 %v8094_v38 }
0x26b0   :  { %v8305_v36 = vpop.eup %8304 }
0x26b1   :  { %7847 = vrot.lane.b32.xlu2 %v8305_v36, %s8424_s21 }
0x26b2   :  { %v8307_v55 = vpop.eup %8306 }
0x26b3   :  { %v7828_v37 = vadd.f32 1.0, %v8307_v55 }
0x26b5   :  { %8308 = vrcp.f32 %v7828_v37  ;;  %v7840_v60 = vand.u32 2147483648, %v7828_v37  ;;  %vm7834_vm5 = vweird.f32 %v7828_v37  ;;  %v7838_v30 = vand.u32 2147483647, %v7828_v37 }
0x26b7   :  { %v7841_v12 = vor.u32 1.1754944e-38, %v7840_v60  ;;  %vm7839_vm7 = vcmp.eq.f32.partialorder %v7838_v30, 8.507059e+37 }
0x26bb   :  { %v8309_v49 = vpop.eup %8308 }
0x26bc   :  { %v7830_v17 = vmul.f32 %v8309_v49, %v7828_v37  ;;  %vm7835_vm8 = vweird.f32 %v8309_v49 }
0x26bd   :  { %vm7836_vm6 = vmor %vm7834_vm5, %vm7835_vm8 }
0x26be   :  { %v7831_v52 = vsub.f32 1.0, %v7830_v17 }
0x26c0   :  { %v7832_v63 = vmul.f32 %v8309_v49, %v7831_v52 }
0x26c2   :  { %v7833_v28 = vadd.f32 %v8309_v49, %v7832_v63 }
0x26c4   :  { %v7837_v31 = vsel %vm7836_vm6, %v8309_v49, %v7833_v28 }
0x26c5   :  { %v7842_v0 = vsel %vm7839_vm7, %v7841_v12, %v7837_v31 }
0x26c6   :  { %v7845_v56 = vmul.f32 %v7842_v0, %v10663_v23 }
0x270b   :  { %v7848_v7 = vpop.permute.xlu2 %7847 }
0x270c   :  { %v7850_v50 = vmul.f32 %v7848_v7, %v7842_v0 }
0x270e   :  { %7852 = vrot.lane.b32.xlu0 %v7850_v50, %s8425_s22 }
0x2716   :  { %4504 = vrot.lane.b32.xlu0 %v10662_v57, %s8426_s10 }
0x2780   :  { %v7853_v21 = vpop.permute.xlu0 %7852 }
0x2781   :  { %v7855_v13 = vadd.f32 %v7853_v21, %v7845_v56 }
0x2783   :  { %8310 = vtanh.f32 %v7855_v13 }
0x2788   :  { %v4505_v47 = vpop.permute.xlu0 %4504 }
0x2789   :  { %v8311_v53 = vpop.eup %8310  ;;  %4507 = vst.msk [vmem:[#allocation3 - $0x6] sm:$0xc0] %vm4501_vm14, %v4505_v47 }
0x278a   :  { %7858 = vrot.lane.b32.xlu1 %v8311_v53, %s8424_s21 }
0x2792   :  { %4509 = vrot.lane.b32.xlu1 %v10664_v40, %s8425_s22 }
0x27fc   :  { %v7859_v2 = vpop.permute.xlu1 %7858 }
0x27fd   :  { %v7861_v24 = vmul.f32 %v7859_v2, %v7842_v0 }
0x27ff   :  { %7871 = vrot.lane.b32.xlu2 %v7861_v24, %s8425_s22 }
0x2804   :  { %v4510_v59 = vpop.permute.xlu1 %4509 }
0x2805   :  { %4513 = vst.msk [vmem:[#allocation2 + $0x2] sm:$0x3] %vm114_vm0, %v4510_v59 }
0x2807   :  { %4515 = vrot.lane.b32.xlu2 %v10665_v26, %s8426_s10 }
0x2859   :  { %v7872_v14 = vpop.permute.xlu2 %7871 }
0x285a   :  { %v7873_v42 = vsel %vm324_vm3, %v7872_v14, 0 }
0x285b   :  { %v7895_v5 = vand.u32 4294901760, %v7873_v42 }
0x285d   :  { %v7896_v6 = vsub.f32 %v7873_v42, %v7895_v5  ;;  %7941 = vmatmul.f32.vlgmr.msrb.gmra.mxu1 %v7895_v5  ;;  %8031 = vmatmul.f32.vlgmr.msrb.gmra.mxu2 %v7895_v5 }
0x285e   :  { %8056 = vmatmul.f32.vlgmr.msrb.gmra.mxu3 %v7895_v5 }
0x285f   :  { %v7897_v45 = vand.u32 4294901760, %v7896_v6 }
0x2861   :  { %v7898_v22 = vsub.f32 %v7896_v6, %v7897_v45  ;;  %v4516_v35 = vpop.permute.xlu2 %4515 }
0x2862   :  { %4518 = vst.msk [vmem:[#allocation3 + $0x2] sm:$0x3] %vm114_vm0, %v4516_v35 }
0x2863   :  { %v7899_v58 = vand.u32 4294901760, %v7898_v22 }
0x2865   :  { %7900 = vmatmul.f32.vlgmr.msrb.gmra.mxu0 %v7899_v58  ;;  %7998 = vmatmul.f32.vlgmr.msra.gmra.mxu1 %v7897_v45 }
0x286d   :  { %7971 = vmatmul.f32.vlgmr.msra.gmra.mxu0 %v7896_v6 }
0x28da   :  { %v7942_v33 = vpop.f32.mrf.mxu1 }
0x28e0   :  { %v8032_v25 = vpop.f32.mrf.mxu2 }
0x28e1   :  { %v8057_v62 = vpop.f32.mrf.mxu3 }
0x28e2   :  { %v7901_v44 = vpop.f32.mrf.mxu0  ;;  %v7999_v48 = vpop.f32.mrf.mxu1 }
0x28e3   :  { %v7902_v46 = vadd.f32 %v8119_v43, %v7901_v44 }
0x28e5   :  { %v7943_v9 = vadd.f32 %v7942_v33, %v7902_v46 }
0x28ea   :  { %v7972_v3 = vpop.f32.mrf.mxu0 }
0x28eb   :  { %v7973_v15 = vadd.f32 %v7972_v3, %v7943_v9 }
0x28ed   :  { %v8000_v18 = vadd.f32 %v7999_v48, %v7973_v15 }
0x28ef   :  { %v8033_v27 = vadd.f32 %v8032_v25, %v8000_v18 }
0x28f1   :  { %v8058_v10 = vadd.f32 %v8057_v62, %v8033_v27 }
0x28f3   :  { %8095 = vst.msk [vmem:[%s10481_s14 + $0x6] sm:$0x3] %vm5411_vm4, %v8058_v10 }
0x28f4   :  { %8066 = vsyncpa [#allocation5], 1 }
0x28f5   :  { %8067 = vsyncpa [#allocation7], 1 }
0x28f6   :  { %8068 = vsyncpa [#allocation10], 1 }

</bundles_post_ra>
